<compile_context>
chip_gen: v7x
topology: tpu7x:2x2x1
jax: 0.10.0
libtpu: 0.0.40
codegen_flags: <defaults>
</compile_context>

<pallas_src>
import functools

import jax
import jax.numpy as jnp
from jax.experimental import pallas as pl
from jax.experimental.pallas import tpu as pltpu


_DEFAULT_HBM_TOKEN_BLOCK = 32          # rows gathered per grid step (HBM-gather path)
_DEFAULT_RESIDENT_TOKEN_BLOCK = 256    # rows gathered per grid step (resident path)
_RESIDENT_VMEM_BUDGET = 40 * 1024 * 1024   # conservative: fits v7x's 64 MiB VMEM
_RESIDENT_VMEM_LIMIT = 48 * 1024 * 1024
_MAX_TOKENS_PER_CALL = 65536           # keeps the scalar-prefetch SMEM array bounded


def _round_up(x, m):
    return ((x + m - 1) // m) * m


def _sublane_rows(dtype):
    """Minimum packed-sublane row granularity for this dtype."""
    itemsize = jnp.dtype(dtype).itemsize
    return max(8, 32 // itemsize)      # f32 -> 8, bf16 -> 16, int8/fp8 -> 32


def _block_spec(shape, index_map, buffers=None):
    """BlockSpec with optional multi-buffering (guarded for older jax)."""
    if buffers is not None and buffers > 2:
        try:
            return pl.BlockSpec(shape, index_map, pipeline_mode=pl.Buffered(buffers))
        except TypeError:
            pass
    return pl.BlockSpec(shape, index_map)


# ---------------------------------------------------------------------------
# Kernel bodies
# ---------------------------------------------------------------------------

def _resident_gather_kernel(ids_ref, tbl_ref, o_ref, *, block_rows):
    """Gather `block_rows` rows from the VMEM-resident table; one tile store."""
    base = pl.program_id(0) * block_rows
    rows = [tbl_ref[pl.ds(ids_ref[base + j], 1), :] for j in range(block_rows)]
    o_ref[...] = jnp.concatenate(rows, axis=0)


def _hbm_gather_kernel(ids_ref, *refs):
    """refs = (row_ref_0, ..., row_ref_{TB-1}, o_ref).

    Each row_ref is a (1, 1, D) VMEM tile holding one gathered table row (the
    gather happened in the BlockSpec DMA via the prefetched ids); assemble the
    rows and write the whole (TB, D) tile with a single unmasked store.
    """
    del ids_ref  # ids are consumed by the index_maps (scalar prefetch)
    row_refs = refs[:-1]
    o_ref = refs[-1]
    rows = [r[0] for r in row_refs]            # each (1, D)
    o_ref[...] = jnp.concatenate(rows, axis=0)


# ---------------------------------------------------------------------------
# pallas_call wrappers (one chunk of <= _MAX_TOKENS_PER_CALL tokens)
# ---------------------------------------------------------------------------

def _gather_resident(flat_ids, table, block_rows):
    V, D = table.shape
    itemsize = jnp.dtype(table.dtype).itemsize
    n = flat_ids.shape[0]
    if n <= block_rows:
        block_rows = n                          # single full-extent block
    n_blocks = -(-n // block_rows)
    n_pad = n_blocks * block_rows
    if n_pad != n:                              # pad only the (cheap) id vector
        flat_ids = jnp.pad(flat_ids, (0, n_pad - n))

    kernel = functools.partial(_resident_gather_kernel, block_rows=block_rows)
    cost = pl.CostEstimate(
        flops=0, transcendentals=0,
        bytes_accessed=V * D * itemsize + n_pad * D * itemsize + n_pad * 4)

    return pl.pallas_call(
        kernel,
        out_shape=jax.ShapeDtypeStruct((n, D), table.dtype),
        grid_spec=pltpu.PrefetchScalarGridSpec(
            num_scalar_prefetch=1,
            grid=(n_blocks,),
            # Constant index_map + full-extent block => table is DMA'd once and
            # stays resident in VMEM for the whole grid.
            in_specs=[pl.BlockSpec((V, D), lambda i, ids: (0, 0))],
            out_specs=pl.BlockSpec((block_rows, D), lambda i, ids: (i, 0)),
        ),
        compiler_params=pltpu.CompilerParams(
            dimension_semantics=("parallel",),
            vmem_limit_bytes=_RESIDENT_VMEM_LIMIT,
        ),
        cost_estimate=cost,
    )(flat_ids, table)


def _gather_hbm(flat_ids, table, block_rows, buffers):
    V, D = table.shape
    itemsize = jnp.dtype(table.dtype).itemsize
    n = flat_ids.shape[0]
    if n <= block_rows:
        block_rows = n                          # single full-extent block
    n_blocks = -(-n // block_rows)
    n_pad = n_blocks * block_rows
    if n_pad != n:
        flat_ids = jnp.pad(flat_ids, (0, n_pad - n))

    # Free metadata reshape: (1, D) last-two dims are full-extent, so the
    # per-row blocks need no (8, 128) alignment and no table padding.
    table3 = table.reshape(V, 1, D)

    def row_map(i, ids, *, j):
        # Data-dependent gather: block index along V == element row index
        # because the block is one row tall.
        return (ids[i * block_rows + j], 0, 0)

    in_specs = [
        _block_spec((1, 1, D), functools.partial(row_map, j=j), buffers=buffers)
        for j in range(block_rows)
    ]
    out_spec = pl.BlockSpec((block_rows, D), lambda i, ids: (i, 0))
    cost = pl.CostEstimate(
        flops=0, transcendentals=0,
        bytes_accessed=2 * n_pad * D * itemsize + n_pad * 4)

    return pl.pallas_call(
        _hbm_gather_kernel,
        out_shape=jax.ShapeDtypeStruct((n, D), table.dtype),
        grid_spec=pltpu.PrefetchScalarGridSpec(
            num_scalar_prefetch=1,
            grid=(n_blocks,),
            in_specs=in_specs,
            out_specs=out_spec,
        ),
        compiler_params=pltpu.CompilerParams(
            dimension_semantics=("parallel",),
        ),
        cost_estimate=cost,
    )(flat_ids, *([table3] * block_rows))


# ---------------------------------------------------------------------------
# Public wrapper == MetaBrainInput.forward (embedding = nn.Embedding)
# ---------------------------------------------------------------------------

def meta_brain_input_embedding(indices, table, *,
                               token_block=_DEFAULT_HBM_TOKEN_BLOCK,
                               resident_token_block=_DEFAULT_RESIDENT_TOKEN_BLOCK,
                               input_buffers=3,
                               force_hbm_gather=False,
                               max_tokens_per_call=_MAX_TOKENS_PER_CALL):
    """Pallas equivalent of MetaBrainInput.forward with embedding = nn.Embedding.

    indices: integer array of any shape, values in [0, V)
    table:   (V, D) embedding matrix
    returns: indices.shape + (D,)
    """
    V, D = table.shape
    itemsize = jnp.dtype(table.dtype).itemsize
    flat = jnp.asarray(indices).reshape(-1).astype(jnp.int32)
    N = flat.shape[0]
    if N == 0:
        return jnp.zeros(tuple(indices.shape) + (D,), table.dtype)

    # Dtype-aware token-block granularity (full, unmasked output tiles).
    sub = _sublane_rows(table.dtype)
    hbm_tb = _round_up(max(token_block, sub), sub)
    res_tb = _round_up(max(resident_token_block, sub), sub)

    # Resident-table fast path: Pallas double-buffers blocks by default, so
    # budget 2x table + 2x output tile; sized so it also fits v7x's 64 MiB.
    table_bytes = V * D * itemsize
    resident = (not force_hbm_gather) and (
        2 * table_bytes + 2 * res_tb * D * itemsize <= _RESIDENT_VMEM_BUDGET)

    outs = []
    for start in range(0, N, max_tokens_per_call):  # bound SMEM id prefetch
        chunk = flat[start:min(start + max_tokens_per_call, N)]
        if resident:
            outs.append(_gather_resident(chunk, table, res_tb))
        else:
            outs.append(_gather_hbm(chunk, table, hbm_tb, input_buffers))
    out = outs[0] if len(outs) == 1 else jnp.concatenate(outs, axis=0)
    return out.reshape(tuple(indices.shape) + (D,))


def _reference(indices, table):
    return jnp.take(table, indices, axis=0)


if __name__ == "__main__":
    key = jax.random.PRNGKey(0)
    k1, k2, k3, k4, k5, k6 = jax.random.split(key, 6)

    # --- Test 1: default (VMEM-resident-table path), multi-block grid with a
    #     ragged final token block and a non-128-multiple embedding dim.
    B1, S1, V1, D1 = 2, 300, 1000, 96
    ids1 = jax.random.randint(k1, (B1, S1), 0, V1, dtype=jnp.int32)
    tbl1 = jax.random.normal(k2, (V1, D1), dtype=jnp.float32)
    out1 = jax.block_until_ready(jax.jit(meta_brain_input_embedding)(ids1, tbl1))
    assert out1.shape == (B1, S1, D1), out1.shape
    assert jnp.array_equal(out1, _reference(ids1, tbl1)), "resident path mismatch"

    # --- Test 2: forced HBM-gather path (scalar-prefetch BlockSpec gather),
    #     token count not a multiple of the token block.
    B2, S2, V2, D2 = 2, 41, 64, 48
    ids2 = jax.random.randint(k3, (B2, S2), 0, V2, dtype=jnp.int32)
    tbl2 = jax.random.normal(k4, (V2, D2), dtype=jnp.float32)
    fn2 = jax.jit(functools.partial(meta_brain_input_embedding,
                                    force_hbm_gather=True))
    out2 = jax.block_until_ready(fn2(ids2, tbl2))
    assert out2.shape == (B2, S2, D2), out2.shape
    assert jnp.array_equal(out2, _reference(ids2, tbl2)), "HBM path mismatch"

    # --- Test 3: bf16 table (dtype-aware sublane handling), default path.
    B3, S3, V3, D3 = 2, 19, 128, 64
    ids3 = jax.random.randint(k5, (B3, S3), 0, V3, dtype=jnp.int32)
    tbl3 = jax.random.normal(k6, (V3, D3), dtype=jnp.float32).astype(jnp.bfloat16)
    out3 = jax.block_until_ready(jax.jit(meta_brain_input_embedding)(ids3, tbl3))
    assert out3.shape == (B3, S3, D3), out3.shape
    assert jnp.array_equal(out3, _reference(ids3, tbl3)), "bf16 path mismatch"

    print("KERNEL_OK")
</pallas_src>

<mosaic_0001>
module attributes {stable_mosaic.version = 11 : i64} {
  func.func @_resident_gather_kernel(%arg0: i32, %arg1: memref<768xi32, #tpu.memory_space<smem>>, %arg2: memref<1000x96xf32, #tpu.memory_space<vmem>>, %arg3: memref<256x96xf32, #tpu.memory_space<vmem>>) attributes {dimension_semantics = [#tpu.dimension_semantics<parallel>], iteration_bounds = array<i64: 3>, scalar_prefetch = 1 : i64, scratch_operands = 0 : i64, tpu.core_type = #tpu.core_type<tc>, window_params = [{pipeline_mode = #tpu.pipeline_mode<synchronous>, transform_indices = @transform_0, window_bounds = array<i64: 1000, 96>}, {transform_indices = @transform_1, window_bounds = array<i64: 256, 96>}]} {
    %c256_i32 = arith.constant 256 : i32
    %0 = arith.muli %arg0, %c256_i32 : i32
    %c0_i32 = arith.constant 0 : i32
    %1 = arith.addi %0, %c0_i32 : i32
    %2 = arith.index_cast %1 : i32 to index
    %3 = memref.load %arg1[%2] : memref<768xi32, #tpu.memory_space<smem>>
    %4 = arith.index_cast %3 : i32 to index
    %c0 = arith.constant 0 : index
    %5 = vector.load %arg2[%4, %c0] : memref<1000x96xf32, #tpu.memory_space<vmem>>, vector<1x96xf32>
    %c1_i32 = arith.constant 1 : i32
    %6 = arith.addi %0, %c1_i32 : i32
    %7 = arith.index_cast %6 : i32 to index
    %8 = memref.load %arg1[%7] : memref<768xi32, #tpu.memory_space<smem>>
    %9 = arith.index_cast %8 : i32 to index
    %c0_0 = arith.constant 0 : index
    %10 = vector.load %arg2[%9, %c0_0] : memref<1000x96xf32, #tpu.memory_space<vmem>>, vector<1x96xf32>
    %c2_i32 = arith.constant 2 : i32
    %11 = arith.addi %0, %c2_i32 : i32
    %12 = arith.index_cast %11 : i32 to index
    %13 = memref.load %arg1[%12] : memref<768xi32, #tpu.memory_space<smem>>
    %14 = arith.index_cast %13 : i32 to index
    %c0_1 = arith.constant 0 : index
    %15 = vector.load %arg2[%14, %c0_1] : memref<1000x96xf32, #tpu.memory_space<vmem>>, vector<1x96xf32>
    %c3_i32 = arith.constant 3 : i32
    %16 = arith.addi %0, %c3_i32 : i32
    %17 = arith.index_cast %16 : i32 to index
    %18 = memref.load %arg1[%17] : memref<768xi32, #tpu.memory_space<smem>>
    %19 = arith.index_cast %18 : i32 to index
    %c0_2 = arith.constant 0 : index
    %20 = vector.load %arg2[%19, %c0_2] : memref<1000x96xf32, #tpu.memory_space<vmem>>, vector<1x96xf32>
    %c4_i32 = arith.constant 4 : i32
    %21 = arith.addi %0, %c4_i32 : i32
    %22 = arith.index_cast %21 : i32 to index
    %23 = memref.load %arg1[%22] : memref<768xi32, #tpu.memory_space<smem>>
    %24 = arith.index_cast %23 : i32 to index
    %c0_3 = arith.constant 0 : index
    %25 = vector.load %arg2[%24, %c0_3] : memref<1000x96xf32, #tpu.memory_space<vmem>>, vector<1x96xf32>
    %c5_i32 = arith.constant 5 : i32
    %26 = arith.addi %0, %c5_i32 : i32
    %27 = arith.index_cast %26 : i32 to index
    %28 = memref.load %arg1[%27] : memref<768xi32, #tpu.memory_space<smem>>
    %29 = arith.index_cast %28 : i32 to index
    %c0_4 = arith.constant 0 : index
    %30 = vector.load %arg2[%29, %c0_4] : memref<1000x96xf32, #tpu.memory_space<vmem>>, vector<1x96xf32>
    %c6_i32 = arith.constant 6 : i32
    %31 = arith.addi %0, %c6_i32 : i32
    %32 = arith.index_cast %31 : i32 to index
    %33 = memref.load %arg1[%32] : memref<768xi32, #tpu.memory_space<smem>>
    %34 = arith.index_cast %33 : i32 to index
    %c0_5 = arith.constant 0 : index
    %35 = vector.load %arg2[%34, %c0_5] : memref<1000x96xf32, #tpu.memory_space<vmem>>, vector<1x96xf32>
    %c7_i32 = arith.constant 7 : i32
    %36 = arith.addi %0, %c7_i32 : i32
    %37 = arith.index_cast %36 : i32 to index
    %38 = memref.load %arg1[%37] : memref<768xi32, #tpu.memory_space<smem>>
    %39 = arith.index_cast %38 : i32 to index
    %c0_6 = arith.constant 0 : index
    %40 = vector.load %arg2[%39, %c0_6] : memref<1000x96xf32, #tpu.memory_space<vmem>>, vector<1x96xf32>
    %c8_i32 = arith.constant 8 : i32
    %41 = arith.addi %0, %c8_i32 : i32
    %42 = arith.index_cast %41 : i32 to index
    %43 = memref.load %arg1[%42] : memref<768xi32, #tpu.memory_space<smem>>
    %44 = arith.index_cast %43 : i32 to index
    %c0_7 = arith.constant 0 : index
    %45 = vector.load %arg2[%44, %c0_7] : memref<1000x96xf32, #tpu.memory_space<vmem>>, vector<1x96xf32>
    %c9_i32 = arith.constant 9 : i32
    %46 = arith.addi %0, %c9_i32 : i32
    %47 = arith.index_cast %46 : i32 to index
    %48 = memref.load %arg1[%47] : memref<768xi32, #tpu.memory_space<smem>>
    %49 = arith.index_cast %48 : i32 to index
    %c0_8 = arith.constant 0 : index
    %50 = vector.load %arg2[%49, %c0_8] : memref<1000x96xf32, #tpu.memory_space<vmem>>, vector<1x96xf32>
    %c10_i32 = arith.constant 10 : i32
    %51 = arith.addi %0, %c10_i32 : i32
    %52 = arith.index_cast %51 : i32 to index
    %53 = memref.load %arg1[%52] : memref<768xi32, #tpu.memory_space<smem>>
    %54 = arith.index_cast %53 : i32 to index
    %c0_9 = arith.constant 0 : index
    %55 = vector.load %arg2[%54, %c0_9] : memref<1000x96xf32, #tpu.memory_space<vmem>>, vector<1x96xf32>
    %c11_i32 = arith.constant 11 : i32
    %56 = arith.addi %0, %c11_i32 : i32
    %57 = arith.index_cast %56 : i32 to index
    %58 = memref.load %arg1[%57] : memref<768xi32, #tpu.memory_space<smem>>
    %59 = arith.index_cast %58 : i32 to index
    %c0_10 = arith.constant 0 : index
    %60 = vector.load %arg2[%59, %c0_10] : memref<1000x96xf32, #tpu.memory_space<vmem>>, vector<1x96xf32>
    %c12_i32 = arith.constant 12 : i32
    %61 = arith.addi %0, %c12_i32 : i32
    %62 = arith.index_cast %61 : i32 to index
    %63 = memref.load %arg1[%62] : memref<768xi32, #tpu.memory_space<smem>>
    %64 = arith.index_cast %63 : i32 to index
    %c0_11 = arith.constant 0 : index
    %65 = vector.load %arg2[%64, %c0_11] : memref<1000x96xf32, #tpu.memory_space<vmem>>, vector<1x96xf32>
    %c13_i32 = arith.constant 13 : i32
    %66 = arith.addi %0, %c13_i32 : i32
    %67 = arith.index_cast %66 : i32 to index
    %68 = memref.load %arg1[%67] : memref<768xi32, #tpu.memory_space<smem>>
    %69 = arith.index_cast %68 : i32 to index
    %c0_12 = arith.constant 0 : index
    %70 = vector.load %arg2[%69, %c0_12] : memref<1000x96xf32, #tpu.memory_space<vmem>>, vector<1x96xf32>
    %c14_i32 = arith.constant 14 : i32
    %71 = arith.addi %0, %c14_i32 : i32
    %72 = arith.index_cast %71 : i32 to index
    %73 = memref.load %arg1[%72] : memref<768xi32, #tpu.memory_space<smem>>
    %74 = arith.index_cast %73 : i32 to index
    %c0_13 = arith.constant 0 : index
    %75 = vector.load %arg2[%74, %c0_13] : memref<1000x96xf32, #tpu.memory_space<vmem>>, vector<1x96xf32>
    %c15_i32 = arith.constant 15 : i32
    %76 = arith.addi %0, %c15_i32 : i32
    %77 = arith.index_cast %76 : i32 to index
    %78 = memref.load %arg1[%77] : memref<768xi32, #tpu.memory_space<smem>>
    %79 = arith.index_cast %78 : i32 to index
    %c0_14 = arith.constant 0 : index
    %80 = vector.load %arg2[%79, %c0_14] : memref<1000x96xf32, #tpu.memory_space<vmem>>, vector<1x96xf32>
    %c16_i32 = arith.constant 16 : i32
    %81 = arith.addi %0, %c16_i32 : i32
    %82 = arith.index_cast %81 : i32 to index
    %83 = memref.load %arg1[%82] : memref<768xi32, #tpu.memory_space<smem>>
    %84 = arith.index_cast %83 : i32 to index
    %c0_15 = arith.constant 0 : index
    %85 = vector.load %arg2[%84, %c0_15] : memref<1000x96xf32, #tpu.memory_space<vmem>>, vector<1x96xf32>
    %c17_i32 = arith.constant 17 : i32
    %86 = arith.addi %0, %c17_i32 : i32
    %87 = arith.index_cast %86 : i32 to index
    %88 = memref.load %arg1[%87] : memref<768xi32, #tpu.memory_space<smem>>
    %89 = arith.index_cast %88 : i32 to index
    %c0_16 = arith.constant 0 : index
    %90 = vector.load %arg2[%89, %c0_16] : memref<1000x96xf32, #tpu.memory_space<vmem>>, vector<1x96xf32>
    %c18_i32 = arith.constant 18 : i32
    %91 = arith.addi %0, %c18_i32 : i32
    %92 = arith.index_cast %91 : i32 to index
    %93 = memref.load %arg1[%92] : memref<768xi32, #tpu.memory_space<smem>>
    %94 = arith.index_cast %93 : i32 to index
    %c0_17 = arith.constant 0 : index
    %95 = vector.load %arg2[%94, %c0_17] : memref<1000x96xf32, #tpu.memory_space<vmem>>, vector<1x96xf32>
    %c19_i32 = arith.constant 19 : i32
    %96 = arith.addi %0, %c19_i32 : i32
    %97 = arith.index_cast %96 : i32 to index
    %98 = memref.load %arg1[%97] : memref<768xi32, #tpu.memory_space<smem>>
    %99 = arith.index_cast %98 : i32 to index
    %c0_18 = arith.constant 0 : index
    %100 = vector.load %arg2[%99, %c0_18] : memref<1000x96xf32, #tpu.memory_space<vmem>>, vector<1x96xf32>
    %c20_i32 = arith.constant 20 : i32
    %101 = arith.addi %0, %c20_i32 : i32
    %102 = arith.index_cast %101 : i32 to index
    %103 = memref.load %arg1[%102] : memref<768xi32, #tpu.memory_space<smem>>
    %104 = arith.index_cast %103 : i32 to index
    %c0_19 = arith.constant 0 : index
    %105 = vector.load %arg2[%104, %c0_19] : memref<1000x96xf32, #tpu.memory_space<vmem>>, vector<1x96xf32>
    %c21_i32 = arith.constant 21 : i32
    %106 = arith.addi %0, %c21_i32 : i32
    %107 = arith.index_cast %106 : i32 to index
    %108 = memref.load %arg1[%107] : memref<768xi32, #tpu.memory_space<smem>>
    %109 = arith.index_cast %108 : i32 to index
    %c0_20 = arith.constant 0 : index
    %110 = vector.load %arg2[%109, %c0_20] : memref<1000x96xf32, #tpu.memory_space<vmem>>, vector<1x96xf32>
    %c22_i32 = arith.constant 22 : i32
    %111 = arith.addi %0, %c22_i32 : i32
    %112 = arith.index_cast %111 : i32 to index
    %113 = memref.load %arg1[%112] : memref<768xi32, #tpu.memory_space<smem>>
    %114 = arith.index_cast %113 : i32 to index
    %c0_21 = arith.constant 0 : index
    %115 = vector.load %arg2[%114, %c0_21] : memref<1000x96xf32, #tpu.memory_space<vmem>>, vector<1x96xf32>
    %c23_i32 = arith.constant 23 : i32
    %116 = arith.addi %0, %c23_i32 : i32
    %117 = arith.index_cast %116 : i32 to index
    %118 = memref.load %arg1[%117] : memref<768xi32, #tpu.memory_space<smem>>
    %119 = arith.index_cast %118 : i32 to index
    %c0_22 = arith.constant 0 : index
    %120 = vector.load %arg2[%119, %c0_22] : memref<1000x96xf32, #tpu.memory_space<vmem>>, vector<1x96xf32>
    %c24_i32 = arith.constant 24 : i32
    %121 = arith.addi %0, %c24_i32 : i32
    %122 = arith.index_cast %121 : i32 to index
    %123 = memref.load %arg1[%122] : memref<768xi32, #tpu.memory_space<smem>>
    %124 = arith.index_cast %123 : i32 to index
    %c0_23 = arith.constant 0 : index
    %125 = vector.load %arg2[%124, %c0_23] : memref<1000x96xf32, #tpu.memory_space<vmem>>, vector<1x96xf32>
    %c25_i32 = arith.constant 25 : i32
    %126 = arith.addi %0, %c25_i32 : i32
    %127 = arith.index_cast %126 : i32 to index
    %128 = memref.load %arg1[%127] : memref<768xi32, #tpu.memory_space<smem>>
    %129 = arith.index_cast %128 : i32 to index
    %c0_24 = arith.constant 0 : index
    %130 = vector.load %arg2[%129, %c0_24] : memref<1000x96xf32, #tpu.memory_space<vmem>>, vector<1x96xf32>
    %c26_i32 = arith.constant 26 : i32
    %131 = arith.addi %0, %c26_i32 : i32
    %132 = arith.index_cast %131 : i32 to index
    %133 = memref.load %arg1[%132] : memref<768xi32, #tpu.memory_space<smem>>
    %134 = arith.index_cast %133 : i32 to index
    %c0_25 = arith.constant 0 : index
    %135 = vector.load %arg2[%134, %c0_25] : memref<1000x96xf32, #tpu.memory_space<vmem>>, vector<1x96xf32>
    %c27_i32 = arith.constant 27 : i32
    %136 = arith.addi %0, %c27_i32 : i32
    %137 = arith.index_cast %136 : i32 to index
    %138 = memref.load %arg1[%137] : memref<768xi32, #tpu.memory_space<smem>>
    %139 = arith.index_cast %138 : i32 to index
    %c0_26 = arith.constant 0 : index
    %140 = vector.load %arg2[%139, %c0_26] : memref<1000x96xf32, #tpu.memory_space<vmem>>, vector<1x96xf32>
    %c28_i32 = arith.constant 28 : i32
    %141 = arith.addi %0, %c28_i32 : i32
    %142 = arith.index_cast %141 : i32 to index
    %143 = memref.load %arg1[%142] : memref<768xi32, #tpu.memory_space<smem>>
    %144 = arith.index_cast %143 : i32 to index
    %c0_27 = arith.constant 0 : index
    %145 = vector.load %arg2[%144, %c0_27] : memref<1000x96xf32, #tpu.memory_space<vmem>>, vector<1x96xf32>
    %c29_i32 = arith.constant 29 : i32
    %146 = arith.addi %0, %c29_i32 : i32
    %147 = arith.index_cast %146 : i32 to index
    %148 = memref.load %arg1[%147] : memref<768xi32, #tpu.memory_space<smem>>
    %149 = arith.index_cast %148 : i32 to index
    %c0_28 = arith.constant 0 : index
    %150 = vector.load %arg2[%149, %c0_28] : memref<1000x96xf32, #tpu.memory_space<vmem>>, vector<1x96xf32>
    %c30_i32 = arith.constant 30 : i32
    %151 = arith.addi %0, %c30_i32 : i32
    %152 = arith.index_cast %151 : i32 to index
    %153 = memref.load %arg1[%152] : memref<768xi32, #tpu.memory_space<smem>>
    %154 = arith.index_cast %153 : i32 to index
    %c0_29 = arith.constant 0 : index
    %155 = vector.load %arg2[%154, %c0_29] : memref<1000x96xf32, #tpu.memory_space<vmem>>, vector<1x96xf32>
    %c31_i32 = arith.constant 31 : i32
    %156 = arith.addi %0, %c31_i32 : i32
    %157 = arith.index_cast %156 : i32 to index
    %158 = memref.load %arg1[%157] : memref<768xi32, #tpu.memory_space<smem>>
    %159 = arith.index_cast %158 : i32 to index
    %c0_30 = arith.constant 0 : index
    %160 = vector.load %arg2[%159, %c0_30] : memref<1000x96xf32, #tpu.memory_space<vmem>>, vector<1x96xf32>
    %c32_i32 = arith.constant 32 : i32
    %161 = arith.addi %0, %c32_i32 : i32
    %162 = arith.index_cast %161 : i32 to index
    %163 = memref.load %arg1[%162] : memref<768xi32, #tpu.memory_space<smem>>
    %164 = arith.index_cast %163 : i32 to index
    %c0_31 = arith.constant 0 : index
    %165 = vector.load %arg2[%164, %c0_31] : memref<1000x96xf32, #tpu.memory_space<vmem>>, vector<1x96xf32>
    %c33_i32 = arith.constant 33 : i32
    %166 = arith.addi %0, %c33_i32 : i32
    %167 = arith.index_cast %166 : i32 to index
    %168 = memref.load %arg1[%167] : memref<768xi32, #tpu.memory_space<smem>>
    %169 = arith.index_cast %168 : i32 to index
    %c0_32 = arith.constant 0 : index
    %170 = vector.load %arg2[%169, %c0_32] : memref<1000x96xf32, #tpu.memory_space<vmem>>, vector<1x96xf32>
    %c34_i32 = arith.constant 34 : i32
    %171 = arith.addi %0, %c34_i32 : i32
    %172 = arith.index_cast %171 : i32 to index
    %173 = memref.load %arg1[%172] : memref<768xi32, #tpu.memory_space<smem>>
    %174 = arith.index_cast %173 : i32 to index
    %c0_33 = arith.constant 0 : index
    %175 = vector.load %arg2[%174, %c0_33] : memref<1000x96xf32, #tpu.memory_space<vmem>>, vector<1x96xf32>
    %c35_i32 = arith.constant 35 : i32
    %176 = arith.addi %0, %c35_i32 : i32
    %177 = arith.index_cast %176 : i32 to index
    %178 = memref.load %arg1[%177] : memref<768xi32, #tpu.memory_space<smem>>
    %179 = arith.index_cast %178 : i32 to index
    %c0_34 = arith.constant 0 : index
    %180 = vector.load %arg2[%179, %c0_34] : memref<1000x96xf32, #tpu.memory_space<vmem>>, vector<1x96xf32>
    %c36_i32 = arith.constant 36 : i32
    %181 = arith.addi %0, %c36_i32 : i32
    %182 = arith.index_cast %181 : i32 to index
    %183 = memref.load %arg1[%182] : memref<768xi32, #tpu.memory_space<smem>>
    %184 = arith.index_cast %183 : i32 to index
    %c0_35 = arith.constant 0 : index
    %185 = vector.load %arg2[%184, %c0_35] : memref<1000x96xf32, #tpu.memory_space<vmem>>, vector<1x96xf32>
    %c37_i32 = arith.constant 37 : i32
    %186 = arith.addi %0, %c37_i32 : i32
    %187 = arith.index_cast %186 : i32 to index
    %188 = memref.load %arg1[%187] : memref<768xi32, #tpu.memory_space<smem>>
    %189 = arith.index_cast %188 : i32 to index
    %c0_36 = arith.constant 0 : index
    %190 = vector.load %arg2[%189, %c0_36] : memref<1000x96xf32, #tpu.memory_space<vmem>>, vector<1x96xf32>
    %c38_i32 = arith.constant 38 : i32
    %191 = arith.addi %0, %c38_i32 : i32
    %192 = arith.index_cast %191 : i32 to index
    %193 = memref.load %arg1[%192] : memref<768xi32, #tpu.memory_space<smem>>
    %194 = arith.index_cast %193 : i32 to index
    %c0_37 = arith.constant 0 : index
    %195 = vector.load %arg2[%194, %c0_37] : memref<1000x96xf32, #tpu.memory_space<vmem>>, vector<1x96xf32>
    %c39_i32 = arith.constant 39 : i32
    %196 = arith.addi %0, %c39_i32 : i32
    %197 = arith.index_cast %196 : i32 to index
    %198 = memref.load %arg1[%197] : memref<768xi32, #tpu.memory_space<smem>>
    %199 = arith.index_cast %198 : i32 to index
    %c0_38 = arith.constant 0 : index
    %200 = vector.load %arg2[%199, %c0_38] : memref<1000x96xf32, #tpu.memory_space<vmem>>, vector<1x96xf32>
    %c40_i32 = arith.constant 40 : i32
    %201 = arith.addi %0, %c40_i32 : i32
    %202 = arith.index_cast %201 : i32 to index
    %203 = memref.load %arg1[%202] : memref<768xi32, #tpu.memory_space<smem>>
    %204 = arith.index_cast %203 : i32 to index
    %c0_39 = arith.constant 0 : index
    %205 = vector.load %arg2[%204, %c0_39] : memref<1000x96xf32, #tpu.memory_space<vmem>>, vector<1x96xf32>
    %c41_i32 = arith.constant 41 : i32
    %206 = arith.addi %0, %c41_i32 : i32
    %207 = arith.index_cast %206 : i32 to index
    %208 = memref.load %arg1[%207] : memref<768xi32, #tpu.memory_space<smem>>
    %209 = arith.index_cast %208 : i32 to index
    %c0_40 = arith.constant 0 : index
    %210 = vector.load %arg2[%209, %c0_40] : memref<1000x96xf32, #tpu.memory_space<vmem>>, vector<1x96xf32>
    %c42_i32 = arith.constant 42 : i32
    %211 = arith.addi %0, %c42_i32 : i32
    %212 = arith.index_cast %211 : i32 to index
    %213 = memref.load %arg1[%212] : memref<768xi32, #tpu.memory_space<smem>>
    %214 = arith.index_cast %213 : i32 to index
    %c0_41 = arith.constant 0 : index
    %215 = vector.load %arg2[%214, %c0_41] : memref<1000x96xf32, #tpu.memory_space<vmem>>, vector<1x96xf32>
    %c43_i32 = arith.constant 43 : i32
    %216 = arith.addi %0, %c43_i32 : i32
    %217 = arith.index_cast %216 : i32 to index
    %218 = memref.load %arg1[%217] : memref<768xi32, #tpu.memory_space<smem>>
    %219 = arith.index_cast %218 : i32 to index
    %c0_42 = arith.constant 0 : index
    %220 = vector.load %arg2[%219, %c0_42] : memref<1000x96xf32, #tpu.memory_space<vmem>>, vector<1x96xf32>
    %c44_i32 = arith.constant 44 : i32
    %221 = arith.addi %0, %c44_i32 : i32
    %222 = arith.index_cast %221 : i32 to index
    %223 = memref.load %arg1[%222] : memref<768xi32, #tpu.memory_space<smem>>
    %224 = arith.index_cast %223 : i32 to index
    %c0_43 = arith.constant 0 : index
    %225 = vector.load %arg2[%224, %c0_43] : memref<1000x96xf32, #tpu.memory_space<vmem>>, vector<1x96xf32>
    %c45_i32 = arith.constant 45 : i32
    %226 = arith.addi %0, %c45_i32 : i32
    %227 = arith.index_cast %226 : i32 to index
    %228 = memref.load %arg1[%227] : memref<768xi32, #tpu.memory_space<smem>>
    %229 = arith.index_cast %228 : i32 to index
    %c0_44 = arith.constant 0 : index
    %230 = vector.load %arg2[%229, %c0_44] : memref<1000x96xf32, #tpu.memory_space<vmem>>, vector<1x96xf32>
    %c46_i32 = arith.constant 46 : i32
    %231 = arith.addi %0, %c46_i32 : i32
    %232 = arith.index_cast %231 : i32 to index
    %233 = memref.load %arg1[%232] : memref<768xi32, #tpu.memory_space<smem>>
    %234 = arith.index_cast %233 : i32 to index
    %c0_45 = arith.constant 0 : index
    %235 = vector.load %arg2[%234, %c0_45] : memref<1000x96xf32, #tpu.memory_space<vmem>>, vector<1x96xf32>
    %c47_i32 = arith.constant 47 : i32
    %236 = arith.addi %0, %c47_i32 : i32
    %237 = arith.index_cast %236 : i32 to index
    %238 = memref.load %arg1[%237] : memref<768xi32, #tpu.memory_space<smem>>
    %239 = arith.index_cast %238 : i32 to index
    %c0_46 = arith.constant 0 : index
    %240 = vector.load %arg2[%239, %c0_46] : memref<1000x96xf32, #tpu.memory_space<vmem>>, vector<1x96xf32>
    %c48_i32 = arith.constant 48 : i32
    %241 = arith.addi %0, %c48_i32 : i32
    %242 = arith.index_cast %241 : i32 to index
    %243 = memref.load %arg1[%242] : memref<768xi32, #tpu.memory_space<smem>>
    %244 = arith.index_cast %243 : i32 to index
    %c0_47 = arith.constant 0 : index
    %245 = vector.load %arg2[%244, %c0_47] : memref<1000x96xf32, #tpu.memory_space<vmem>>, vector<1x96xf32>
    %c49_i32 = arith.constant 49 : i32
    %246 = arith.addi %0, %c49_i32 : i32
    %247 = arith.index_cast %246 : i32 to index
    %248 = memref.load %arg1[%247] : memref<768xi32, #tpu.memory_space<smem>>
    %249 = arith.index_cast %248 : i32 to index
    %c0_48 = arith.constant 0 : index
    %250 = vector.load %arg2[%249, %c0_48] : memref<1000x96xf32, #tpu.memory_space<vmem>>, vector<1x96xf32>
    %c50_i32 = arith.constant 50 : i32
    %251 = arith.addi %0, %c50_i32 : i32
    %252 = arith.index_cast %251 : i32 to index
    %253 = memref.load %arg1[%252] : memref<768xi32, #tpu.memory_space<smem>>
    %254 = arith.index_cast %253 : i32 to index
    %c0_49 = arith.constant 0 : index
    %255 = vector.load %arg2[%254, %c0_49] : memref<1000x96xf32, #tpu.memory_space<vmem>>, vector<1x96xf32>
    %c51_i32 = arith.constant 51 : i32
    %256 = arith.addi %0, %c51_i32 : i32
    %257 = arith.index_cast %256 : i32 to index
    %258 = memref.load %arg1[%257] : memref<768xi32, #tpu.memory_space<smem>>
    %259 = arith.index_cast %258 : i32 to index
    %c0_50 = arith.constant 0 : index
    %260 = vector.load %arg2[%259, %c0_50] : memref<1000x96xf32, #tpu.memory_space<vmem>>, vector<1x96xf32>
    %c52_i32 = arith.constant 52 : i32
    %261 = arith.addi %0, %c52_i32 : i32
    %262 = arith.index_cast %261 : i32 to index
    %263 = memref.load %arg1[%262] : memref<768xi32, #tpu.memory_space<smem>>
    %264 = arith.index_cast %263 : i32 to index
    %c0_51 = arith.constant 0 : index
    %265 = vector.load %arg2[%264, %c0_51] : memref<1000x96xf32, #tpu.memory_space<vmem>>, vector<1x96xf32>
    %c53_i32 = arith.constant 53 : i32
    %266 = arith.addi %0, %c53_i32 : i32
    %267 = arith.index_cast %266 : i32 to index
    %268 = memref.load %arg1[%267] : memref<768xi32, #tpu.memory_space<smem>>
    %269 = arith.index_cast %268 : i32 to index
    %c0_52 = arith.constant 0 : index
    %270 = vector.load %arg2[%269, %c0_52] : memref<1000x96xf32, #tpu.memory_space<vmem>>, vector<1x96xf32>
    %c54_i32 = arith.constant 54 : i32
    %271 = arith.addi %0, %c54_i32 : i32
    %272 = arith.index_cast %271 : i32 to index
    %273 = memref.load %arg1[%272] : memref<768xi32, #tpu.memory_space<smem>>
    %274 = arith.index_cast %273 : i32 to index
    %c0_53 = arith.constant 0 : index
    %275 = vector.load %arg2[%274, %c0_53] : memref<1000x96xf32, #tpu.memory_space<vmem>>, vector<1x96xf32>
    %c55_i32 = arith.constant 55 : i32
    %276 = arith.addi %0, %c55_i32 : i32
    %277 = arith.index_cast %276 : i32 to index
    %278 = memref.load %arg1[%277] : memref<768xi32, #tpu.memory_space<smem>>
    %279 = arith.index_cast %278 : i32 to index
    %c0_54 = arith.constant 0 : index
    %280 = vector.load %arg2[%279, %c0_54] : memref<1000x96xf32, #tpu.memory_space<vmem>>, vector<1x96xf32>
    %c56_i32 = arith.constant 56 : i32
    %281 = arith.addi %0, %c56_i32 : i32
    %282 = arith.index_cast %281 : i32 to index
    %283 = memref.load %arg1[%282] : memref<768xi32, #tpu.memory_space<smem>>
    %284 = arith.index_cast %283 : i32 to index
    %c0_55 = arith.constant 0 : index
    %285 = vector.load %arg2[%284, %c0_55] : memref<1000x96xf32, #tpu.memory_space<vmem>>, vector<1x96xf32>
    %c57_i32 = arith.constant 57 : i32
    %286 = arith.addi %0, %c57_i32 : i32
    %287 = arith.index_cast %286 : i32 to index
    %288 = memref.load %arg1[%287] : memref<768xi32, #tpu.memory_space<smem>>
    %289 = arith.index_cast %288 : i32 to index
    %c0_56 = arith.constant 0 : index
    %290 = vector.load %arg2[%289, %c0_56] : memref<1000x96xf32, #tpu.memory_space<vmem>>, vector<1x96xf32>
    %c58_i32 = arith.constant 58 : i32
    %291 = arith.addi %0, %c58_i32 : i32
    %292 = arith.index_cast %291 : i32 to index
    %293 = memref.load %arg1[%292] : memref<768xi32, #tpu.memory_space<smem>>
    %294 = arith.index_cast %293 : i32 to index
    %c0_57 = arith.constant 0 : index
    %295 = vector.load %arg2[%294, %c0_57] : memref<1000x96xf32, #tpu.memory_space<vmem>>, vector<1x96xf32>
    %c59_i32 = arith.constant 59 : i32
    %296 = arith.addi %0, %c59_i32 : i32
    %297 = arith.index_cast %296 : i32 to index
    %298 = memref.load %arg1[%297] : memref<768xi32, #tpu.memory_space<smem>>
    %299 = arith.index_cast %298 : i32 to index
    %c0_58 = arith.constant 0 : index
    %300 = vector.load %arg2[%299, %c0_58] : memref<1000x96xf32, #tpu.memory_space<vmem>>, vector<1x96xf32>
    %c60_i32 = arith.constant 60 : i32
    %301 = arith.addi %0, %c60_i32 : i32
    %302 = arith.index_cast %301 : i32 to index
    %303 = memref.load %arg1[%302] : memref<768xi32, #tpu.memory_space<smem>>
    %304 = arith.index_cast %303 : i32 to index
    %c0_59 = arith.constant 0 : index
    %305 = vector.load %arg2[%304, %c0_59] : memref<1000x96xf32, #tpu.memory_space<vmem>>, vector<1x96xf32>
    %c61_i32 = arith.constant 61 : i32
    %306 = arith.addi %0, %c61_i32 : i32
    %307 = arith.index_cast %306 : i32 to index
    %308 = memref.load %arg1[%307] : memref<768xi32, #tpu.memory_space<smem>>
    %309 = arith.index_cast %308 : i32 to index
    %c0_60 = arith.constant 0 : index
    %310 = vector.load %arg2[%309, %c0_60] : memref<1000x96xf32, #tpu.memory_space<vmem>>, vector<1x96xf32>
    %c62_i32 = arith.constant 62 : i32
    %311 = arith.addi %0, %c62_i32 : i32
    %312 = arith.index_cast %311 : i32 to index
    %313 = memref.load %arg1[%312] : memref<768xi32, #tpu.memory_space<smem>>
    %314 = arith.index_cast %313 : i32 to index
    %c0_61 = arith.constant 0 : index
    %315 = vector.load %arg2[%314, %c0_61] : memref<1000x96xf32, #tpu.memory_space<vmem>>, vector<1x96xf32>
    %c63_i32 = arith.constant 63 : i32
    %316 = arith.addi %0, %c63_i32 : i32
    %317 = arith.index_cast %316 : i32 to index
    %318 = memref.load %arg1[%317] : memref<768xi32, #tpu.memory_space<smem>>
    %319 = arith.index_cast %318 : i32 to index
    %c0_62 = arith.constant 0 : index
    %320 = vector.load %arg2[%319, %c0_62] : memref<1000x96xf32, #tpu.memory_space<vmem>>, vector<1x96xf32>
    %c64_i32 = arith.constant 64 : i32
    %321 = arith.addi %0, %c64_i32 : i32
    %322 = arith.index_cast %321 : i32 to index
    %323 = memref.load %arg1[%322] : memref<768xi32, #tpu.memory_space<smem>>
    %324 = arith.index_cast %323 : i32 to index
    %c0_63 = arith.constant 0 : index
    %325 = vector.load %arg2[%324, %c0_63] : memref<1000x96xf32, #tpu.memory_space<vmem>>, vector<1x96xf32>
    %c65_i32 = arith.constant 65 : i32
    %326 = arith.addi %0, %c65_i32 : i32
    %327 = arith.index_cast %326 : i32 to index
    %328 = memref.load %arg1[%327] : memref<768xi32, #tpu.memory_space<smem>>
    %329 = arith.index_cast %328 : i32 to index
    %c0_64 = arith.constant 0 : index
    %330 = vector.load %arg2[%329, %c0_64] : memref<1000x96xf32, #tpu.memory_space<vmem>>, vector<1x96xf32>
    %c66_i32 = arith.constant 66 : i32
    %331 = arith.addi %0, %c66_i32 : i32
    %332 = arith.index_cast %331 : i32 to index
    %333 = memref.load %arg1[%332] : memref<768xi32, #tpu.memory_space<smem>>
    %334 = arith.index_cast %333 : i32 to index
    %c0_65 = arith.constant 0 : index
    %335 = vector.load %arg2[%334, %c0_65] : memref<1000x96xf32, #tpu.memory_space<vmem>>, vector<1x96xf32>
    %c67_i32 = arith.constant 67 : i32
    %336 = arith.addi %0, %c67_i32 : i32
    %337 = arith.index_cast %336 : i32 to index
    %338 = memref.load %arg1[%337] : memref<768xi32, #tpu.memory_space<smem>>
    %339 = arith.index_cast %338 : i32 to index
    %c0_66 = arith.constant 0 : index
    %340 = vector.load %arg2[%339, %c0_66] : memref<1000x96xf32, #tpu.memory_space<vmem>>, vector<1x96xf32>
    %c68_i32 = arith.constant 68 : i32
    %341 = arith.addi %0, %c68_i32 : i32
    %342 = arith.index_cast %341 : i32 to index
    %343 = memref.load %arg1[%342] : memref<768xi32, #tpu.memory_space<smem>>
    %344 = arith.index_cast %343 : i32 to index
    %c0_67 = arith.constant 0 : index
    %345 = vector.load %arg2[%344, %c0_67] : memref<1000x96xf32, #tpu.memory_space<vmem>>, vector<1x96xf32>
    %c69_i32 = arith.constant 69 : i32
    %346 = arith.addi %0, %c69_i32 : i32
    %347 = arith.index_cast %346 : i32 to index
    %348 = memref.load %arg1[%347] : memref<768xi32, #tpu.memory_space<smem>>
    %349 = arith.index_cast %348 : i32 to index
    %c0_68 = arith.constant 0 : index
    %350 = vector.load %arg2[%349, %c0_68] : memref<1000x96xf32, #tpu.memory_space<vmem>>, vector<1x96xf32>
    %c70_i32 = arith.constant 70 : i32
    %351 = arith.addi %0, %c70_i32 : i32
    %352 = arith.index_cast %351 : i32 to index
    %353 = memref.load %arg1[%352] : memref<768xi32, #tpu.memory_space<smem>>
    %354 = arith.index_cast %353 : i32 to index
    %c0_69 = arith.constant 0 : index
    %355 = vector.load %arg2[%354, %c0_69] : memref<1000x96xf32, #tpu.memory_space<vmem>>, vector<1x96xf32>
    %c71_i32 = arith.constant 71 : i32
    %356 = arith.addi %0, %c71_i32 : i32
    %357 = arith.index_cast %356 : i32 to index
    %358 = memref.load %arg1[%357] : memref<768xi32, #tpu.memory_space<smem>>
    %359 = arith.index_cast %358 : i32 to index
    %c0_70 = arith.constant 0 : index
    %360 = vector.load %arg2[%359, %c0_70] : memref<1000x96xf32, #tpu.memory_space<vmem>>, vector<1x96xf32>
    %c72_i32 = arith.constant 72 : i32
    %361 = arith.addi %0, %c72_i32 : i32
    %362 = arith.index_cast %361 : i32 to index
    %363 = memref.load %arg1[%362] : memref<768xi32, #tpu.memory_space<smem>>
    %364 = arith.index_cast %363 : i32 to index
    %c0_71 = arith.constant 0 : index
    %365 = vector.load %arg2[%364, %c0_71] : memref<1000x96xf32, #tpu.memory_space<vmem>>, vector<1x96xf32>
    %c73_i32 = arith.constant 73 : i32
    %366 = arith.addi %0, %c73_i32 : i32
    %367 = arith.index_cast %366 : i32 to index
    %368 = memref.load %arg1[%367] : memref<768xi32, #tpu.memory_space<smem>>
    %369 = arith.index_cast %368 : i32 to index
    %c0_72 = arith.constant 0 : index
    %370 = vector.load %arg2[%369, %c0_72] : memref<1000x96xf32, #tpu.memory_space<vmem>>, vector<1x96xf32>
    %c74_i32 = arith.constant 74 : i32
    %371 = arith.addi %0, %c74_i32 : i32
    %372 = arith.index_cast %371 : i32 to index
    %373 = memref.load %arg1[%372] : memref<768xi32, #tpu.memory_space<smem>>
    %374 = arith.index_cast %373 : i32 to index
    %c0_73 = arith.constant 0 : index
    %375 = vector.load %arg2[%374, %c0_73] : memref<1000x96xf32, #tpu.memory_space<vmem>>, vector<1x96xf32>
    %c75_i32 = arith.constant 75 : i32
    %376 = arith.addi %0, %c75_i32 : i32
    %377 = arith.index_cast %376 : i32 to index
    %378 = memref.load %arg1[%377] : memref<768xi32, #tpu.memory_space<smem>>
    %379 = arith.index_cast %378 : i32 to index
    %c0_74 = arith.constant 0 : index
    %380 = vector.load %arg2[%379, %c0_74] : memref<1000x96xf32, #tpu.memory_space<vmem>>, vector<1x96xf32>
    %c76_i32 = arith.constant 76 : i32
    %381 = arith.addi %0, %c76_i32 : i32
    %382 = arith.index_cast %381 : i32 to index
    %383 = memref.load %arg1[%382] : memref<768xi32, #tpu.memory_space<smem>>
    %384 = arith.index_cast %383 : i32 to index
    %c0_75 = arith.constant 0 : index
    %385 = vector.load %arg2[%384, %c0_75] : memref<1000x96xf32, #tpu.memory_space<vmem>>, vector<1x96xf32>
    %c77_i32 = arith.constant 77 : i32
    %386 = arith.addi %0, %c77_i32 : i32
    %387 = arith.index_cast %386 : i32 to index
    %388 = memref.load %arg1[%387] : memref<768xi32, #tpu.memory_space<smem>>
    %389 = arith.index_cast %388 : i32 to index
    %c0_76 = arith.constant 0 : index
    %390 = vector.load %arg2[%389, %c0_76] : memref<1000x96xf32, #tpu.memory_space<vmem>>, vector<1x96xf32>
    %c78_i32 = arith.constant 78 : i32
    %391 = arith.addi %0, %c78_i32 : i32
    %392 = arith.index_cast %391 : i32 to index
    %393 = memref.load %arg1[%392] : memref<768xi32, #tpu.memory_space<smem>>
    %394 = arith.index_cast %393 : i32 to index
    %c0_77 = arith.constant 0 : index
    %395 = vector.load %arg2[%394, %c0_77] : memref<1000x96xf32, #tpu.memory_space<vmem>>, vector<1x96xf32>
    %c79_i32 = arith.constant 79 : i32
    %396 = arith.addi %0, %c79_i32 : i32
    %397 = arith.index_cast %396 : i32 to index
    %398 = memref.load %arg1[%397] : memref<768xi32, #tpu.memory_space<smem>>
    %399 = arith.index_cast %398 : i32 to index
    %c0_78 = arith.constant 0 : index
    %400 = vector.load %arg2[%399, %c0_78] : memref<1000x96xf32, #tpu.memory_space<vmem>>, vector<1x96xf32>
    %c80_i32 = arith.constant 80 : i32
    %401 = arith.addi %0, %c80_i32 : i32
    %402 = arith.index_cast %401 : i32 to index
    %403 = memref.load %arg1[%402] : memref<768xi32, #tpu.memory_space<smem>>
    %404 = arith.index_cast %403 : i32 to index
    %c0_79 = arith.constant 0 : index
    %405 = vector.load %arg2[%404, %c0_79] : memref<1000x96xf32, #tpu.memory_space<vmem>>, vector<1x96xf32>
    %c81_i32 = arith.constant 81 : i32
    %406 = arith.addi %0, %c81_i32 : i32
    %407 = arith.index_cast %406 : i32 to index
    %408 = memref.load %arg1[%407] : memref<768xi32, #tpu.memory_space<smem>>
    %409 = arith.index_cast %408 : i32 to index
    %c0_80 = arith.constant 0 : index
    %410 = vector.load %arg2[%409, %c0_80] : memref<1000x96xf32, #tpu.memory_space<vmem>>, vector<1x96xf32>
    %c82_i32 = arith.constant 82 : i32
    %411 = arith.addi %0, %c82_i32 : i32
    %412 = arith.index_cast %411 : i32 to index
    %413 = memref.load %arg1[%412] : memref<768xi32, #tpu.memory_space<smem>>
    %414 = arith.index_cast %413 : i32 to index
    %c0_81 = arith.constant 0 : index
    %415 = vector.load %arg2[%414, %c0_81] : memref<1000x96xf32, #tpu.memory_space<vmem>>, vector<1x96xf32>
    %c83_i32 = arith.constant 83 : i32
    %416 = arith.addi %0, %c83_i32 : i32
    %417 = arith.index_cast %416 : i32 to index
    %418 = memref.load %arg1[%417] : memref<768xi32, #tpu.memory_space<smem>>
    %419 = arith.index_cast %418 : i32 to index
    %c0_82 = arith.constant 0 : index
    %420 = vector.load %arg2[%419, %c0_82] : memref<1000x96xf32, #tpu.memory_space<vmem>>, vector<1x96xf32>
    %c84_i32 = arith.constant 84 : i32
    %421 = arith.addi %0, %c84_i32 : i32
    %422 = arith.index_cast %421 : i32 to index
    %423 = memref.load %arg1[%422] : memref<768xi32, #tpu.memory_space<smem>>
    %424 = arith.index_cast %423 : i32 to index
    %c0_83 = arith.constant 0 : index
    %425 = vector.load %arg2[%424, %c0_83] : memref<1000x96xf32, #tpu.memory_space<vmem>>, vector<1x96xf32>
    %c85_i32 = arith.constant 85 : i32
    %426 = arith.addi %0, %c85_i32 : i32
    %427 = arith.index_cast %426 : i32 to index
    %428 = memref.load %arg1[%427] : memref<768xi32, #tpu.memory_space<smem>>
    %429 = arith.index_cast %428 : i32 to index
    %c0_84 = arith.constant 0 : index
    %430 = vector.load %arg2[%429, %c0_84] : memref<1000x96xf32, #tpu.memory_space<vmem>>, vector<1x96xf32>
    %c86_i32 = arith.constant 86 : i32
    %431 = arith.addi %0, %c86_i32 : i32
    %432 = arith.index_cast %431 : i32 to index
    %433 = memref.load %arg1[%432] : memref<768xi32, #tpu.memory_space<smem>>
    %434 = arith.index_cast %433 : i32 to index
    %c0_85 = arith.constant 0 : index
    %435 = vector.load %arg2[%434, %c0_85] : memref<1000x96xf32, #tpu.memory_space<vmem>>, vector<1x96xf32>
    %c87_i32 = arith.constant 87 : i32
    %436 = arith.addi %0, %c87_i32 : i32
    %437 = arith.index_cast %436 : i32 to index
    %438 = memref.load %arg1[%437] : memref<768xi32, #tpu.memory_space<smem>>
    %439 = arith.index_cast %438 : i32 to index
    %c0_86 = arith.constant 0 : index
    %440 = vector.load %arg2[%439, %c0_86] : memref<1000x96xf32, #tpu.memory_space<vmem>>, vector<1x96xf32>
    %c88_i32 = arith.constant 88 : i32
    %441 = arith.addi %0, %c88_i32 : i32
    %442 = arith.index_cast %441 : i32 to index
    %443 = memref.load %arg1[%442] : memref<768xi32, #tpu.memory_space<smem>>
    %444 = arith.index_cast %443 : i32 to index
    %c0_87 = arith.constant 0 : index
    %445 = vector.load %arg2[%444, %c0_87] : memref<1000x96xf32, #tpu.memory_space<vmem>>, vector<1x96xf32>
    %c89_i32 = arith.constant 89 : i32
    %446 = arith.addi %0, %c89_i32 : i32
    %447 = arith.index_cast %446 : i32 to index
    %448 = memref.load %arg1[%447] : memref<768xi32, #tpu.memory_space<smem>>
    %449 = arith.index_cast %448 : i32 to index
    %c0_88 = arith.constant 0 : index
    %450 = vector.load %arg2[%449, %c0_88] : memref<1000x96xf32, #tpu.memory_space<vmem>>, vector<1x96xf32>
    %c90_i32 = arith.constant 90 : i32
    %451 = arith.addi %0, %c90_i32 : i32
    %452 = arith.index_cast %451 : i32 to index
    %453 = memref.load %arg1[%452] : memref<768xi32, #tpu.memory_space<smem>>
    %454 = arith.index_cast %453 : i32 to index
    %c0_89 = arith.constant 0 : index
    %455 = vector.load %arg2[%454, %c0_89] : memref<1000x96xf32, #tpu.memory_space<vmem>>, vector<1x96xf32>
    %c91_i32 = arith.constant 91 : i32
    %456 = arith.addi %0, %c91_i32 : i32
    %457 = arith.index_cast %456 : i32 to index
    %458 = memref.load %arg1[%457] : memref<768xi32, #tpu.memory_space<smem>>
    %459 = arith.index_cast %458 : i32 to index
    %c0_90 = arith.constant 0 : index
    %460 = vector.load %arg2[%459, %c0_90] : memref<1000x96xf32, #tpu.memory_space<vmem>>, vector<1x96xf32>
    %c92_i32 = arith.constant 92 : i32
    %461 = arith.addi %0, %c92_i32 : i32
    %462 = arith.index_cast %461 : i32 to index
    %463 = memref.load %arg1[%462] : memref<768xi32, #tpu.memory_space<smem>>
    %464 = arith.index_cast %463 : i32 to index
    %c0_91 = arith.constant 0 : index
    %465 = vector.load %arg2[%464, %c0_91] : memref<1000x96xf32, #tpu.memory_space<vmem>>, vector<1x96xf32>
    %c93_i32 = arith.constant 93 : i32
    %466 = arith.addi %0, %c93_i32 : i32
    %467 = arith.index_cast %466 : i32 to index
    %468 = memref.load %arg1[%467] : memref<768xi32, #tpu.memory_space<smem>>
    %469 = arith.index_cast %468 : i32 to index
    %c0_92 = arith.constant 0 : index
    %470 = vector.load %arg2[%469, %c0_92] : memref<1000x96xf32, #tpu.memory_space<vmem>>, vector<1x96xf32>
    %c94_i32 = arith.constant 94 : i32
    %471 = arith.addi %0, %c94_i32 : i32
    %472 = arith.index_cast %471 : i32 to index
    %473 = memref.load %arg1[%472] : memref<768xi32, #tpu.memory_space<smem>>
    %474 = arith.index_cast %473 : i32 to index
    %c0_93 = arith.constant 0 : index
    %475 = vector.load %arg2[%474, %c0_93] : memref<1000x96xf32, #tpu.memory_space<vmem>>, vector<1x96xf32>
    %c95_i32 = arith.constant 95 : i32
    %476 = arith.addi %0, %c95_i32 : i32
    %477 = arith.index_cast %476 : i32 to index
    %478 = memref.load %arg1[%477] : memref<768xi32, #tpu.memory_space<smem>>
    %479 = arith.index_cast %478 : i32 to index
    %c0_94 = arith.constant 0 : index
    %480 = vector.load %arg2[%479, %c0_94] : memref<1000x96xf32, #tpu.memory_space<vmem>>, vector<1x96xf32>
    %c96_i32 = arith.constant 96 : i32
    %481 = arith.addi %0, %c96_i32 : i32
    %482 = arith.index_cast %481 : i32 to index
    %483 = memref.load %arg1[%482] : memref<768xi32, #tpu.memory_space<smem>>
    %484 = arith.index_cast %483 : i32 to index
    %c0_95 = arith.constant 0 : index
    %485 = vector.load %arg2[%484, %c0_95] : memref<1000x96xf32, #tpu.memory_space<vmem>>, vector<1x96xf32>
    %c97_i32 = arith.constant 97 : i32
    %486 = arith.addi %0, %c97_i32 : i32
    %487 = arith.index_cast %486 : i32 to index
    %488 = memref.load %arg1[%487] : memref<768xi32, #tpu.memory_space<smem>>
    %489 = arith.index_cast %488 : i32 to index
    %c0_96 = arith.constant 0 : index
    %490 = vector.load %arg2[%489, %c0_96] : memref<1000x96xf32, #tpu.memory_space<vmem>>, vector<1x96xf32>
    %c98_i32 = arith.constant 98 : i32
    %491 = arith.addi %0, %c98_i32 : i32
    %492 = arith.index_cast %491 : i32 to index
    %493 = memref.load %arg1[%492] : memref<768xi32, #tpu.memory_space<smem>>
    %494 = arith.index_cast %493 : i32 to index
    %c0_97 = arith.constant 0 : index
    %495 = vector.load %arg2[%494, %c0_97] : memref<1000x96xf32, #tpu.memory_space<vmem>>, vector<1x96xf32>
    %c99_i32 = arith.constant 99 : i32
    %496 = arith.addi %0, %c99_i32 : i32
    %497 = arith.index_cast %496 : i32 to index
    %498 = memref.load %arg1[%497] : memref<768xi32, #tpu.memory_space<smem>>
    %499 = arith.index_cast %498 : i32 to index
    %c0_98 = arith.constant 0 : index
    %500 = vector.load %arg2[%499, %c0_98] : memref<1000x96xf32, #tpu.memory_space<vmem>>, vector<1x96xf32>
    %c100_i32 = arith.constant 100 : i32
    %501 = arith.addi %0, %c100_i32 : i32
    %502 = arith.index_cast %501 : i32 to index
    %503 = memref.load %arg1[%502] : memref<768xi32, #tpu.memory_space<smem>>
    %504 = arith.index_cast %503 : i32 to index
    %c0_99 = arith.constant 0 : index
    %505 = vector.load %arg2[%504, %c0_99] : memref<1000x96xf32, #tpu.memory_space<vmem>>, vector<1x96xf32>
    %c101_i32 = arith.constant 101 : i32
    %506 = arith.addi %0, %c101_i32 : i32
    %507 = arith.index_cast %506 : i32 to index
    %508 = memref.load %arg1[%507] : memref<768xi32, #tpu.memory_space<smem>>
    %509 = arith.index_cast %508 : i32 to index
    %c0_100 = arith.constant 0 : index
    %510 = vector.load %arg2[%509, %c0_100] : memref<1000x96xf32, #tpu.memory_space<vmem>>, vector<1x96xf32>
    %c102_i32 = arith.constant 102 : i32
    %511 = arith.addi %0, %c102_i32 : i32
    %512 = arith.index_cast %511 : i32 to index
    %513 = memref.load %arg1[%512] : memref<768xi32, #tpu.memory_space<smem>>
    %514 = arith.index_cast %513 : i32 to index
    %c0_101 = arith.constant 0 : index
    %515 = vector.load %arg2[%514, %c0_101] : memref<1000x96xf32, #tpu.memory_space<vmem>>, vector<1x96xf32>
    %c103_i32 = arith.constant 103 : i32
    %516 = arith.addi %0, %c103_i32 : i32
    %517 = arith.index_cast %516 : i32 to index
    %518 = memref.load %arg1[%517] : memref<768xi32, #tpu.memory_space<smem>>
    %519 = arith.index_cast %518 : i32 to index
    %c0_102 = arith.constant 0 : index
    %520 = vector.load %arg2[%519, %c0_102] : memref<1000x96xf32, #tpu.memory_space<vmem>>, vector<1x96xf32>
    %c104_i32 = arith.constant 104 : i32
    %521 = arith.addi %0, %c104_i32 : i32
    %522 = arith.index_cast %521 : i32 to index
    %523 = memref.load %arg1[%522] : memref<768xi32, #tpu.memory_space<smem>>
    %524 = arith.index_cast %523 : i32 to index
    %c0_103 = arith.constant 0 : index
    %525 = vector.load %arg2[%524, %c0_103] : memref<1000x96xf32, #tpu.memory_space<vmem>>, vector<1x96xf32>
    %c105_i32 = arith.constant 105 : i32
    %526 = arith.addi %0, %c105_i32 : i32
    %527 = arith.index_cast %526 : i32 to index
    %528 = memref.load %arg1[%527] : memref<768xi32, #tpu.memory_space<smem>>
    %529 = arith.index_cast %528 : i32 to index
    %c0_104 = arith.constant 0 : index
    %530 = vector.load %arg2[%529, %c0_104] : memref<1000x96xf32, #tpu.memory_space<vmem>>, vector<1x96xf32>
    %c106_i32 = arith.constant 106 : i32
    %531 = arith.addi %0, %c106_i32 : i32
    %532 = arith.index_cast %531 : i32 to index
    %533 = memref.load %arg1[%532] : memref<768xi32, #tpu.memory_space<smem>>
    %534 = arith.index_cast %533 : i32 to index
    %c0_105 = arith.constant 0 : index
    %535 = vector.load %arg2[%534, %c0_105] : memref<1000x96xf32, #tpu.memory_space<vmem>>, vector<1x96xf32>
    %c107_i32 = arith.constant 107 : i32
    %536 = arith.addi %0, %c107_i32 : i32
    %537 = arith.index_cast %536 : i32 to index
    %538 = memref.load %arg1[%537] : memref<768xi32, #tpu.memory_space<smem>>
    %539 = arith.index_cast %538 : i32 to index
    %c0_106 = arith.constant 0 : index
    %540 = vector.load %arg2[%539, %c0_106] : memref<1000x96xf32, #tpu.memory_space<vmem>>, vector<1x96xf32>
    %c108_i32 = arith.constant 108 : i32
    %541 = arith.addi %0, %c108_i32 : i32
    %542 = arith.index_cast %541 : i32 to index
    %543 = memref.load %arg1[%542] : memref<768xi32, #tpu.memory_space<smem>>
    %544 = arith.index_cast %543 : i32 to index
    %c0_107 = arith.constant 0 : index
    %545 = vector.load %arg2[%544, %c0_107] : memref<1000x96xf32, #tpu.memory_space<vmem>>, vector<1x96xf32>
    %c109_i32 = arith.constant 109 : i32
    %546 = arith.addi %0, %c109_i32 : i32
    %547 = arith.index_cast %546 : i32 to index
    %548 = memref.load %arg1[%547] : memref<768xi32, #tpu.memory_space<smem>>
    %549 = arith.index_cast %548 : i32 to index
    %c0_108 = arith.constant 0 : index
    %550 = vector.load %arg2[%549, %c0_108] : memref<1000x96xf32, #tpu.memory_space<vmem>>, vector<1x96xf32>
    %c110_i32 = arith.constant 110 : i32
    %551 = arith.addi %0, %c110_i32 : i32
    %552 = arith.index_cast %551 : i32 to index
    %553 = memref.load %arg1[%552] : memref<768xi32, #tpu.memory_space<smem>>
    %554 = arith.index_cast %553 : i32 to index
    %c0_109 = arith.constant 0 : index
    %555 = vector.load %arg2[%554, %c0_109] : memref<1000x96xf32, #tpu.memory_space<vmem>>, vector<1x96xf32>
    %c111_i32 = arith.constant 111 : i32
    %556 = arith.addi %0, %c111_i32 : i32
    %557 = arith.index_cast %556 : i32 to index
    %558 = memref.load %arg1[%557] : memref<768xi32, #tpu.memory_space<smem>>
    %559 = arith.index_cast %558 : i32 to index
    %c0_110 = arith.constant 0 : index
    %560 = vector.load %arg2[%559, %c0_110] : memref<1000x96xf32, #tpu.memory_space<vmem>>, vector<1x96xf32>
    %c112_i32 = arith.constant 112 : i32
    %561 = arith.addi %0, %c112_i32 : i32
    %562 = arith.index_cast %561 : i32 to index
    %563 = memref.load %arg1[%562] : memref<768xi32, #tpu.memory_space<smem>>
    %564 = arith.index_cast %563 : i32 to index
    %c0_111 = arith.constant 0 : index
    %565 = vector.load %arg2[%564, %c0_111] : memref<1000x96xf32, #tpu.memory_space<vmem>>, vector<1x96xf32>
    %c113_i32 = arith.constant 113 : i32
    %566 = arith.addi %0, %c113_i32 : i32
    %567 = arith.index_cast %566 : i32 to index
    %568 = memref.load %arg1[%567] : memref<768xi32, #tpu.memory_space<smem>>
    %569 = arith.index_cast %568 : i32 to index
    %c0_112 = arith.constant 0 : index
    %570 = vector.load %arg2[%569, %c0_112] : memref<1000x96xf32, #tpu.memory_space<vmem>>, vector<1x96xf32>
    %c114_i32 = arith.constant 114 : i32
    %571 = arith.addi %0, %c114_i32 : i32
    %572 = arith.index_cast %571 : i32 to index
    %573 = memref.load %arg1[%572] : memref<768xi32, #tpu.memory_space<smem>>
    %574 = arith.index_cast %573 : i32 to index
    %c0_113 = arith.constant 0 : index
    %575 = vector.load %arg2[%574, %c0_113] : memref<1000x96xf32, #tpu.memory_space<vmem>>, vector<1x96xf32>
    %c115_i32 = arith.constant 115 : i32
    %576 = arith.addi %0, %c115_i32 : i32
    %577 = arith.index_cast %576 : i32 to index
    %578 = memref.load %arg1[%577] : memref<768xi32, #tpu.memory_space<smem>>
    %579 = arith.index_cast %578 : i32 to index
    %c0_114 = arith.constant 0 : index
    %580 = vector.load %arg2[%579, %c0_114] : memref<1000x96xf32, #tpu.memory_space<vmem>>, vector<1x96xf32>
    %c116_i32 = arith.constant 116 : i32
    %581 = arith.addi %0, %c116_i32 : i32
    %582 = arith.index_cast %581 : i32 to index
    %583 = memref.load %arg1[%582] : memref<768xi32, #tpu.memory_space<smem>>
    %584 = arith.index_cast %583 : i32 to index
    %c0_115 = arith.constant 0 : index
    %585 = vector.load %arg2[%584, %c0_115] : memref<1000x96xf32, #tpu.memory_space<vmem>>, vector<1x96xf32>
    %c117_i32 = arith.constant 117 : i32
    %586 = arith.addi %0, %c117_i32 : i32
    %587 = arith.index_cast %586 : i32 to index
    %588 = memref.load %arg1[%587] : memref<768xi32, #tpu.memory_space<smem>>
    %589 = arith.index_cast %588 : i32 to index
    %c0_116 = arith.constant 0 : index
    %590 = vector.load %arg2[%589, %c0_116] : memref<1000x96xf32, #tpu.memory_space<vmem>>, vector<1x96xf32>
    %c118_i32 = arith.constant 118 : i32
    %591 = arith.addi %0, %c118_i32 : i32
    %592 = arith.index_cast %591 : i32 to index
    %593 = memref.load %arg1[%592] : memref<768xi32, #tpu.memory_space<smem>>
    %594 = arith.index_cast %593 : i32 to index
    %c0_117 = arith.constant 0 : index
    %595 = vector.load %arg2[%594, %c0_117] : memref<1000x96xf32, #tpu.memory_space<vmem>>, vector<1x96xf32>
    %c119_i32 = arith.constant 119 : i32
    %596 = arith.addi %0, %c119_i32 : i32
    %597 = arith.index_cast %596 : i32 to index
    %598 = memref.load %arg1[%597] : memref<768xi32, #tpu.memory_space<smem>>
    %599 = arith.index_cast %598 : i32 to index
    %c0_118 = arith.constant 0 : index
    %600 = vector.load %arg2[%599, %c0_118] : memref<1000x96xf32, #tpu.memory_space<vmem>>, vector<1x96xf32>
    %c120_i32 = arith.constant 120 : i32
    %601 = arith.addi %0, %c120_i32 : i32
    %602 = arith.index_cast %601 : i32 to index
    %603 = memref.load %arg1[%602] : memref<768xi32, #tpu.memory_space<smem>>
    %604 = arith.index_cast %603 : i32 to index
    %c0_119 = arith.constant 0 : index
    %605 = vector.load %arg2[%604, %c0_119] : memref<1000x96xf32, #tpu.memory_space<vmem>>, vector<1x96xf32>
    %c121_i32 = arith.constant 121 : i32
    %606 = arith.addi %0, %c121_i32 : i32
    %607 = arith.index_cast %606 : i32 to index
    %608 = memref.load %arg1[%607] : memref<768xi32, #tpu.memory_space<smem>>
    %609 = arith.index_cast %608 : i32 to index
    %c0_120 = arith.constant 0 : index
    %610 = vector.load %arg2[%609, %c0_120] : memref<1000x96xf32, #tpu.memory_space<vmem>>, vector<1x96xf32>
    %c122_i32 = arith.constant 122 : i32
    %611 = arith.addi %0, %c122_i32 : i32
    %612 = arith.index_cast %611 : i32 to index
    %613 = memref.load %arg1[%612] : memref<768xi32, #tpu.memory_space<smem>>
    %614 = arith.index_cast %613 : i32 to index
    %c0_121 = arith.constant 0 : index
    %615 = vector.load %arg2[%614, %c0_121] : memref<1000x96xf32, #tpu.memory_space<vmem>>, vector<1x96xf32>
    %c123_i32 = arith.constant 123 : i32
    %616 = arith.addi %0, %c123_i32 : i32
    %617 = arith.index_cast %616 : i32 to index
    %618 = memref.load %arg1[%617] : memref<768xi32, #tpu.memory_space<smem>>
    %619 = arith.index_cast %618 : i32 to index
    %c0_122 = arith.constant 0 : index
    %620 = vector.load %arg2[%619, %c0_122] : memref<1000x96xf32, #tpu.memory_space<vmem>>, vector<1x96xf32>
    %c124_i32 = arith.constant 124 : i32
    %621 = arith.addi %0, %c124_i32 : i32
    %622 = arith.index_cast %621 : i32 to index
    %623 = memref.load %arg1[%622] : memref<768xi32, #tpu.memory_space<smem>>
    %624 = arith.index_cast %623 : i32 to index
    %c0_123 = arith.constant 0 : index
    %625 = vector.load %arg2[%624, %c0_123] : memref<1000x96xf32, #tpu.memory_space<vmem>>, vector<1x96xf32>
    %c125_i32 = arith.constant 125 : i32
    %626 = arith.addi %0, %c125_i32 : i32
    %627 = arith.index_cast %626 : i32 to index
    %628 = memref.load %arg1[%627] : memref<768xi32, #tpu.memory_space<smem>>
    %629 = arith.index_cast %628 : i32 to index
    %c0_124 = arith.constant 0 : index
    %630 = vector.load %arg2[%629, %c0_124] : memref<1000x96xf32, #tpu.memory_space<vmem>>, vector<1x96xf32>
    %c126_i32 = arith.constant 126 : i32
    %631 = arith.addi %0, %c126_i32 : i32
    %632 = arith.index_cast %631 : i32 to index
    %633 = memref.load %arg1[%632] : memref<768xi32, #tpu.memory_space<smem>>
    %634 = arith.index_cast %633 : i32 to index
    %c0_125 = arith.constant 0 : index
    %635 = vector.load %arg2[%634, %c0_125] : memref<1000x96xf32, #tpu.memory_space<vmem>>, vector<1x96xf32>
    %c127_i32 = arith.constant 127 : i32
    %636 = arith.addi %0, %c127_i32 : i32
    %637 = arith.index_cast %636 : i32 to index
    %638 = memref.load %arg1[%637] : memref<768xi32, #tpu.memory_space<smem>>
    %639 = arith.index_cast %638 : i32 to index
    %c0_126 = arith.constant 0 : index
    %640 = vector.load %arg2[%639, %c0_126] : memref<1000x96xf32, #tpu.memory_space<vmem>>, vector<1x96xf32>
    %c128_i32 = arith.constant 128 : i32
    %641 = arith.addi %0, %c128_i32 : i32
    %642 = arith.index_cast %641 : i32 to index
    %643 = memref.load %arg1[%642] : memref<768xi32, #tpu.memory_space<smem>>
    %644 = arith.index_cast %643 : i32 to index
    %c0_127 = arith.constant 0 : index
    %645 = vector.load %arg2[%644, %c0_127] : memref<1000x96xf32, #tpu.memory_space<vmem>>, vector<1x96xf32>
    %c129_i32 = arith.constant 129 : i32
    %646 = arith.addi %0, %c129_i32 : i32
    %647 = arith.index_cast %646 : i32 to index
    %648 = memref.load %arg1[%647] : memref<768xi32, #tpu.memory_space<smem>>
    %649 = arith.index_cast %648 : i32 to index
    %c0_128 = arith.constant 0 : index
    %650 = vector.load %arg2[%649, %c0_128] : memref<1000x96xf32, #tpu.memory_space<vmem>>, vector<1x96xf32>
    %c130_i32 = arith.constant 130 : i32
    %651 = arith.addi %0, %c130_i32 : i32
    %652 = arith.index_cast %651 : i32 to index
    %653 = memref.load %arg1[%652] : memref<768xi32, #tpu.memory_space<smem>>
    %654 = arith.index_cast %653 : i32 to index
    %c0_129 = arith.constant 0 : index
    %655 = vector.load %arg2[%654, %c0_129] : memref<1000x96xf32, #tpu.memory_space<vmem>>, vector<1x96xf32>
    %c131_i32 = arith.constant 131 : i32
    %656 = arith.addi %0, %c131_i32 : i32
    %657 = arith.index_cast %656 : i32 to index
    %658 = memref.load %arg1[%657] : memref<768xi32, #tpu.memory_space<smem>>
    %659 = arith.index_cast %658 : i32 to index
    %c0_130 = arith.constant 0 : index
    %660 = vector.load %arg2[%659, %c0_130] : memref<1000x96xf32, #tpu.memory_space<vmem>>, vector<1x96xf32>
    %c132_i32 = arith.constant 132 : i32
    %661 = arith.addi %0, %c132_i32 : i32
    %662 = arith.index_cast %661 : i32 to index
    %663 = memref.load %arg1[%662] : memref<768xi32, #tpu.memory_space<smem>>
    %664 = arith.index_cast %663 : i32 to index
    %c0_131 = arith.constant 0 : index
    %665 = vector.load %arg2[%664, %c0_131] : memref<1000x96xf32, #tpu.memory_space<vmem>>, vector<1x96xf32>
    %c133_i32 = arith.constant 133 : i32
    %666 = arith.addi %0, %c133_i32 : i32
    %667 = arith.index_cast %666 : i32 to index
    %668 = memref.load %arg1[%667] : memref<768xi32, #tpu.memory_space<smem>>
    %669 = arith.index_cast %668 : i32 to index
    %c0_132 = arith.constant 0 : index
    %670 = vector.load %arg2[%669, %c0_132] : memref<1000x96xf32, #tpu.memory_space<vmem>>, vector<1x96xf32>
    %c134_i32 = arith.constant 134 : i32
    %671 = arith.addi %0, %c134_i32 : i32
    %672 = arith.index_cast %671 : i32 to index
    %673 = memref.load %arg1[%672] : memref<768xi32, #tpu.memory_space<smem>>
    %674 = arith.index_cast %673 : i32 to index
    %c0_133 = arith.constant 0 : index
    %675 = vector.load %arg2[%674, %c0_133] : memref<1000x96xf32, #tpu.memory_space<vmem>>, vector<1x96xf32>
    %c135_i32 = arith.constant 135 : i32
    %676 = arith.addi %0, %c135_i32 : i32
    %677 = arith.index_cast %676 : i32 to index
    %678 = memref.load %arg1[%677] : memref<768xi32, #tpu.memory_space<smem>>
    %679 = arith.index_cast %678 : i32 to index
    %c0_134 = arith.constant 0 : index
    %680 = vector.load %arg2[%679, %c0_134] : memref<1000x96xf32, #tpu.memory_space<vmem>>, vector<1x96xf32>
    %c136_i32 = arith.constant 136 : i32
    %681 = arith.addi %0, %c136_i32 : i32
    %682 = arith.index_cast %681 : i32 to index
    %683 = memref.load %arg1[%682] : memref<768xi32, #tpu.memory_space<smem>>
    %684 = arith.index_cast %683 : i32 to index
    %c0_135 = arith.constant 0 : index
    %685 = vector.load %arg2[%684, %c0_135] : memref<1000x96xf32, #tpu.memory_space<vmem>>, vector<1x96xf32>
    %c137_i32 = arith.constant 137 : i32
    %686 = arith.addi %0, %c137_i32 : i32
    %687 = arith.index_cast %686 : i32 to index
    %688 = memref.load %arg1[%687] : memref<768xi32, #tpu.memory_space<smem>>
    %689 = arith.index_cast %688 : i32 to index
    %c0_136 = arith.constant 0 : index
    %690 = vector.load %arg2[%689, %c0_136] : memref<1000x96xf32, #tpu.memory_space<vmem>>, vector<1x96xf32>
    %c138_i32 = arith.constant 138 : i32
    %691 = arith.addi %0, %c138_i32 : i32
    %692 = arith.index_cast %691 : i32 to index
    %693 = memref.load %arg1[%692] : memref<768xi32, #tpu.memory_space<smem>>
    %694 = arith.index_cast %693 : i32 to index
    %c0_137 = arith.constant 0 : index
    %695 = vector.load %arg2[%694, %c0_137] : memref<1000x96xf32, #tpu.memory_space<vmem>>, vector<1x96xf32>
    %c139_i32 = arith.constant 139 : i32
    %696 = arith.addi %0, %c139_i32 : i32
    %697 = arith.index_cast %696 : i32 to index
    %698 = memref.load %arg1[%697] : memref<768xi32, #tpu.memory_space<smem>>
    %699 = arith.index_cast %698 : i32 to index
    %c0_138 = arith.constant 0 : index
    %700 = vector.load %arg2[%699, %c0_138] : memref<1000x96xf32, #tpu.memory_space<vmem>>, vector<1x96xf32>
    %c140_i32 = arith.constant 140 : i32
    %701 = arith.addi %0, %c140_i32 : i32
    %702 = arith.index_cast %701 : i32 to index
    %703 = memref.load %arg1[%702] : memref<768xi32, #tpu.memory_space<smem>>
    %704 = arith.index_cast %703 : i32 to index
    %c0_139 = arith.constant 0 : index
    %705 = vector.load %arg2[%704, %c0_139] : memref<1000x96xf32, #tpu.memory_space<vmem>>, vector<1x96xf32>
    %c141_i32 = arith.constant 141 : i32
    %706 = arith.addi %0, %c141_i32 : i32
    %707 = arith.index_cast %706 : i32 to index
    %708 = memref.load %arg1[%707] : memref<768xi32, #tpu.memory_space<smem>>
    %709 = arith.index_cast %708 : i32 to index
    %c0_140 = arith.constant 0 : index
    %710 = vector.load %arg2[%709, %c0_140] : memref<1000x96xf32, #tpu.memory_space<vmem>>, vector<1x96xf32>
    %c142_i32 = arith.constant 142 : i32
    %711 = arith.addi %0, %c142_i32 : i32
    %712 = arith.index_cast %711 : i32 to index
    %713 = memref.load %arg1[%712] : memref<768xi32, #tpu.memory_space<smem>>
    %714 = arith.index_cast %713 : i32 to index
    %c0_141 = arith.constant 0 : index
    %715 = vector.load %arg2[%714, %c0_141] : memref<1000x96xf32, #tpu.memory_space<vmem>>, vector<1x96xf32>
    %c143_i32 = arith.constant 143 : i32
    %716 = arith.addi %0, %c143_i32 : i32
    %717 = arith.index_cast %716 : i32 to index
    %718 = memref.load %arg1[%717] : memref<768xi32, #tpu.memory_space<smem>>
    %719 = arith.index_cast %718 : i32 to index
    %c0_142 = arith.constant 0 : index
    %720 = vector.load %arg2[%719, %c0_142] : memref<1000x96xf32, #tpu.memory_space<vmem>>, vector<1x96xf32>
    %c144_i32 = arith.constant 144 : i32
    %721 = arith.addi %0, %c144_i32 : i32
    %722 = arith.index_cast %721 : i32 to index
    %723 = memref.load %arg1[%722] : memref<768xi32, #tpu.memory_space<smem>>
    %724 = arith.index_cast %723 : i32 to index
    %c0_143 = arith.constant 0 : index
    %725 = vector.load %arg2[%724, %c0_143] : memref<1000x96xf32, #tpu.memory_space<vmem>>, vector<1x96xf32>
    %c145_i32 = arith.constant 145 : i32
    %726 = arith.addi %0, %c145_i32 : i32
    %727 = arith.index_cast %726 : i32 to index
    %728 = memref.load %arg1[%727] : memref<768xi32, #tpu.memory_space<smem>>
    %729 = arith.index_cast %728 : i32 to index
    %c0_144 = arith.constant 0 : index
    %730 = vector.load %arg2[%729, %c0_144] : memref<1000x96xf32, #tpu.memory_space<vmem>>, vector<1x96xf32>
    %c146_i32 = arith.constant 146 : i32
    %731 = arith.addi %0, %c146_i32 : i32
    %732 = arith.index_cast %731 : i32 to index
    %733 = memref.load %arg1[%732] : memref<768xi32, #tpu.memory_space<smem>>
    %734 = arith.index_cast %733 : i32 to index
    %c0_145 = arith.constant 0 : index
    %735 = vector.load %arg2[%734, %c0_145] : memref<1000x96xf32, #tpu.memory_space<vmem>>, vector<1x96xf32>
    %c147_i32 = arith.constant 147 : i32
    %736 = arith.addi %0, %c147_i32 : i32
    %737 = arith.index_cast %736 : i32 to index
    %738 = memref.load %arg1[%737] : memref<768xi32, #tpu.memory_space<smem>>
    %739 = arith.index_cast %738 : i32 to index
    %c0_146 = arith.constant 0 : index
    %740 = vector.load %arg2[%739, %c0_146] : memref<1000x96xf32, #tpu.memory_space<vmem>>, vector<1x96xf32>
    %c148_i32 = arith.constant 148 : i32
    %741 = arith.addi %0, %c148_i32 : i32
    %742 = arith.index_cast %741 : i32 to index
    %743 = memref.load %arg1[%742] : memref<768xi32, #tpu.memory_space<smem>>
    %744 = arith.index_cast %743 : i32 to index
    %c0_147 = arith.constant 0 : index
    %745 = vector.load %arg2[%744, %c0_147] : memref<1000x96xf32, #tpu.memory_space<vmem>>, vector<1x96xf32>
    %c149_i32 = arith.constant 149 : i32
    %746 = arith.addi %0, %c149_i32 : i32
    %747 = arith.index_cast %746 : i32 to index
    %748 = memref.load %arg1[%747] : memref<768xi32, #tpu.memory_space<smem>>
    %749 = arith.index_cast %748 : i32 to index
    %c0_148 = arith.constant 0 : index
    %750 = vector.load %arg2[%749, %c0_148] : memref<1000x96xf32, #tpu.memory_space<vmem>>, vector<1x96xf32>
    %c150_i32 = arith.constant 150 : i32
    %751 = arith.addi %0, %c150_i32 : i32
    %752 = arith.index_cast %751 : i32 to index
    %753 = memref.load %arg1[%752] : memref<768xi32, #tpu.memory_space<smem>>
    %754 = arith.index_cast %753 : i32 to index
    %c0_149 = arith.constant 0 : index
    %755 = vector.load %arg2[%754, %c0_149] : memref<1000x96xf32, #tpu.memory_space<vmem>>, vector<1x96xf32>
    %c151_i32 = arith.constant 151 : i32
    %756 = arith.addi %0, %c151_i32 : i32
    %757 = arith.index_cast %756 : i32 to index
    %758 = memref.load %arg1[%757] : memref<768xi32, #tpu.memory_space<smem>>
    %759 = arith.index_cast %758 : i32 to index
    %c0_150 = arith.constant 0 : index
    %760 = vector.load %arg2[%759, %c0_150] : memref<1000x96xf32, #tpu.memory_space<vmem>>, vector<1x96xf32>
    %c152_i32 = arith.constant 152 : i32
    %761 = arith.addi %0, %c152_i32 : i32
    %762 = arith.index_cast %761 : i32 to index
    %763 = memref.load %arg1[%762] : memref<768xi32, #tpu.memory_space<smem>>
    %764 = arith.index_cast %763 : i32 to index
    %c0_151 = arith.constant 0 : index
    %765 = vector.load %arg2[%764, %c0_151] : memref<1000x96xf32, #tpu.memory_space<vmem>>, vector<1x96xf32>
    %c153_i32 = arith.constant 153 : i32
    %766 = arith.addi %0, %c153_i32 : i32
    %767 = arith.index_cast %766 : i32 to index
    %768 = memref.load %arg1[%767] : memref<768xi32, #tpu.memory_space<smem>>
    %769 = arith.index_cast %768 : i32 to index
    %c0_152 = arith.constant 0 : index
    %770 = vector.load %arg2[%769, %c0_152] : memref<1000x96xf32, #tpu.memory_space<vmem>>, vector<1x96xf32>
    %c154_i32 = arith.constant 154 : i32
    %771 = arith.addi %0, %c154_i32 : i32
    %772 = arith.index_cast %771 : i32 to index
    %773 = memref.load %arg1[%772] : memref<768xi32, #tpu.memory_space<smem>>
    %774 = arith.index_cast %773 : i32 to index
    %c0_153 = arith.constant 0 : index
    %775 = vector.load %arg2[%774, %c0_153] : memref<1000x96xf32, #tpu.memory_space<vmem>>, vector<1x96xf32>
    %c155_i32 = arith.constant 155 : i32
    %776 = arith.addi %0, %c155_i32 : i32
    %777 = arith.index_cast %776 : i32 to index
    %778 = memref.load %arg1[%777] : memref<768xi32, #tpu.memory_space<smem>>
    %779 = arith.index_cast %778 : i32 to index
    %c0_154 = arith.constant 0 : index
    %780 = vector.load %arg2[%779, %c0_154] : memref<1000x96xf32, #tpu.memory_space<vmem>>, vector<1x96xf32>
    %c156_i32 = arith.constant 156 : i32
    %781 = arith.addi %0, %c156_i32 : i32
    %782 = arith.index_cast %781 : i32 to index
    %783 = memref.load %arg1[%782] : memref<768xi32, #tpu.memory_space<smem>>
    %784 = arith.index_cast %783 : i32 to index
    %c0_155 = arith.constant 0 : index
    %785 = vector.load %arg2[%784, %c0_155] : memref<1000x96xf32, #tpu.memory_space<vmem>>, vector<1x96xf32>
    %c157_i32 = arith.constant 157 : i32
    %786 = arith.addi %0, %c157_i32 : i32
    %787 = arith.index_cast %786 : i32 to index
    %788 = memref.load %arg1[%787] : memref<768xi32, #tpu.memory_space<smem>>
    %789 = arith.index_cast %788 : i32 to index
    %c0_156 = arith.constant 0 : index
    %790 = vector.load %arg2[%789, %c0_156] : memref<1000x96xf32, #tpu.memory_space<vmem>>, vector<1x96xf32>
    %c158_i32 = arith.constant 158 : i32
    %791 = arith.addi %0, %c158_i32 : i32
    %792 = arith.index_cast %791 : i32 to index
    %793 = memref.load %arg1[%792] : memref<768xi32, #tpu.memory_space<smem>>
    %794 = arith.index_cast %793 : i32 to index
    %c0_157 = arith.constant 0 : index
    %795 = vector.load %arg2[%794, %c0_157] : memref<1000x96xf32, #tpu.memory_space<vmem>>, vector<1x96xf32>
    %c159_i32 = arith.constant 159 : i32
    %796 = arith.addi %0, %c159_i32 : i32
    %797 = arith.index_cast %796 : i32 to index
    %798 = memref.load %arg1[%797] : memref<768xi32, #tpu.memory_space<smem>>
    %799 = arith.index_cast %798 : i32 to index
    %c0_158 = arith.constant 0 : index
    %800 = vector.load %arg2[%799, %c0_158] : memref<1000x96xf32, #tpu.memory_space<vmem>>, vector<1x96xf32>
    %c160_i32 = arith.constant 160 : i32
    %801 = arith.addi %0, %c160_i32 : i32
    %802 = arith.index_cast %801 : i32 to index
    %803 = memref.load %arg1[%802] : memref<768xi32, #tpu.memory_space<smem>>
    %804 = arith.index_cast %803 : i32 to index
    %c0_159 = arith.constant 0 : index
    %805 = vector.load %arg2[%804, %c0_159] : memref<1000x96xf32, #tpu.memory_space<vmem>>, vector<1x96xf32>
    %c161_i32 = arith.constant 161 : i32
    %806 = arith.addi %0, %c161_i32 : i32
    %807 = arith.index_cast %806 : i32 to index
    %808 = memref.load %arg1[%807] : memref<768xi32, #tpu.memory_space<smem>>
    %809 = arith.index_cast %808 : i32 to index
    %c0_160 = arith.constant 0 : index
    %810 = vector.load %arg2[%809, %c0_160] : memref<1000x96xf32, #tpu.memory_space<vmem>>, vector<1x96xf32>
    %c162_i32 = arith.constant 162 : i32
    %811 = arith.addi %0, %c162_i32 : i32
    %812 = arith.index_cast %811 : i32 to index
    %813 = memref.load %arg1[%812] : memref<768xi32, #tpu.memory_space<smem>>
    %814 = arith.index_cast %813 : i32 to index
    %c0_161 = arith.constant 0 : index
    %815 = vector.load %arg2[%814, %c0_161] : memref<1000x96xf32, #tpu.memory_space<vmem>>, vector<1x96xf32>
    %c163_i32 = arith.constant 163 : i32
    %816 = arith.addi %0, %c163_i32 : i32
    %817 = arith.index_cast %816 : i32 to index
    %818 = memref.load %arg1[%817] : memref<768xi32, #tpu.memory_space<smem>>
    %819 = arith.index_cast %818 : i32 to index
    %c0_162 = arith.constant 0 : index
    %820 = vector.load %arg2[%819, %c0_162] : memref<1000x96xf32, #tpu.memory_space<vmem>>, vector<1x96xf32>
    %c164_i32 = arith.constant 164 : i32
    %821 = arith.addi %0, %c164_i32 : i32
    %822 = arith.index_cast %821 : i32 to index
    %823 = memref.load %arg1[%822] : memref<768xi32, #tpu.memory_space<smem>>
    %824 = arith.index_cast %823 : i32 to index
    %c0_163 = arith.constant 0 : index
    %825 = vector.load %arg2[%824, %c0_163] : memref<1000x96xf32, #tpu.memory_space<vmem>>, vector<1x96xf32>
    %c165_i32 = arith.constant 165 : i32
    %826 = arith.addi %0, %c165_i32 : i32
    %827 = arith.index_cast %826 : i32 to index
    %828 = memref.load %arg1[%827] : memref<768xi32, #tpu.memory_space<smem>>
    %829 = arith.index_cast %828 : i32 to index
    %c0_164 = arith.constant 0 : index
    %830 = vector.load %arg2[%829, %c0_164] : memref<1000x96xf32, #tpu.memory_space<vmem>>, vector<1x96xf32>
    %c166_i32 = arith.constant 166 : i32
    %831 = arith.addi %0, %c166_i32 : i32
    %832 = arith.index_cast %831 : i32 to index
    %833 = memref.load %arg1[%832] : memref<768xi32, #tpu.memory_space<smem>>
    %834 = arith.index_cast %833 : i32 to index
    %c0_165 = arith.constant 0 : index
    %835 = vector.load %arg2[%834, %c0_165] : memref<1000x96xf32, #tpu.memory_space<vmem>>, vector<1x96xf32>
    %c167_i32 = arith.constant 167 : i32
    %836 = arith.addi %0, %c167_i32 : i32
    %837 = arith.index_cast %836 : i32 to index
    %838 = memref.load %arg1[%837] : memref<768xi32, #tpu.memory_space<smem>>
    %839 = arith.index_cast %838 : i32 to index
    %c0_166 = arith.constant 0 : index
    %840 = vector.load %arg2[%839, %c0_166] : memref<1000x96xf32, #tpu.memory_space<vmem>>, vector<1x96xf32>
    %c168_i32 = arith.constant 168 : i32
    %841 = arith.addi %0, %c168_i32 : i32
    %842 = arith.index_cast %841 : i32 to index
    %843 = memref.load %arg1[%842] : memref<768xi32, #tpu.memory_space<smem>>
    %844 = arith.index_cast %843 : i32 to index
    %c0_167 = arith.constant 0 : index
    %845 = vector.load %arg2[%844, %c0_167] : memref<1000x96xf32, #tpu.memory_space<vmem>>, vector<1x96xf32>
    %c169_i32 = arith.constant 169 : i32
    %846 = arith.addi %0, %c169_i32 : i32
    %847 = arith.index_cast %846 : i32 to index
    %848 = memref.load %arg1[%847] : memref<768xi32, #tpu.memory_space<smem>>
    %849 = arith.index_cast %848 : i32 to index
    %c0_168 = arith.constant 0 : index
    %850 = vector.load %arg2[%849, %c0_168] : memref<1000x96xf32, #tpu.memory_space<vmem>>, vector<1x96xf32>
    %c170_i32 = arith.constant 170 : i32
    %851 = arith.addi %0, %c170_i32 : i32
    %852 = arith.index_cast %851 : i32 to index
    %853 = memref.load %arg1[%852] : memref<768xi32, #tpu.memory_space<smem>>
    %854 = arith.index_cast %853 : i32 to index
    %c0_169 = arith.constant 0 : index
    %855 = vector.load %arg2[%854, %c0_169] : memref<1000x96xf32, #tpu.memory_space<vmem>>, vector<1x96xf32>
    %c171_i32 = arith.constant 171 : i32
    %856 = arith.addi %0, %c171_i32 : i32
    %857 = arith.index_cast %856 : i32 to index
    %858 = memref.load %arg1[%857] : memref<768xi32, #tpu.memory_space<smem>>
    %859 = arith.index_cast %858 : i32 to index
    %c0_170 = arith.constant 0 : index
    %860 = vector.load %arg2[%859, %c0_170] : memref<1000x96xf32, #tpu.memory_space<vmem>>, vector<1x96xf32>
    %c172_i32 = arith.constant 172 : i32
    %861 = arith.addi %0, %c172_i32 : i32
    %862 = arith.index_cast %861 : i32 to index
    %863 = memref.load %arg1[%862] : memref<768xi32, #tpu.memory_space<smem>>
    %864 = arith.index_cast %863 : i32 to index
    %c0_171 = arith.constant 0 : index
    %865 = vector.load %arg2[%864, %c0_171] : memref<1000x96xf32, #tpu.memory_space<vmem>>, vector<1x96xf32>
    %c173_i32 = arith.constant 173 : i32
    %866 = arith.addi %0, %c173_i32 : i32
    %867 = arith.index_cast %866 : i32 to index
    %868 = memref.load %arg1[%867] : memref<768xi32, #tpu.memory_space<smem>>
    %869 = arith.index_cast %868 : i32 to index
    %c0_172 = arith.constant 0 : index
    %870 = vector.load %arg2[%869, %c0_172] : memref<1000x96xf32, #tpu.memory_space<vmem>>, vector<1x96xf32>
    %c174_i32 = arith.constant 174 : i32
    %871 = arith.addi %0, %c174_i32 : i32
    %872 = arith.index_cast %871 : i32 to index
    %873 = memref.load %arg1[%872] : memref<768xi32, #tpu.memory_space<smem>>
    %874 = arith.index_cast %873 : i32 to index
    %c0_173 = arith.constant 0 : index
    %875 = vector.load %arg2[%874, %c0_173] : memref<1000x96xf32, #tpu.memory_space<vmem>>, vector<1x96xf32>
    %c175_i32 = arith.constant 175 : i32
    %876 = arith.addi %0, %c175_i32 : i32
    %877 = arith.index_cast %876 : i32 to index
    %878 = memref.load %arg1[%877] : memref<768xi32, #tpu.memory_space<smem>>
    %879 = arith.index_cast %878 : i32 to index
    %c0_174 = arith.constant 0 : index
    %880 = vector.load %arg2[%879, %c0_174] : memref<1000x96xf32, #tpu.memory_space<vmem>>, vector<1x96xf32>
    %c176_i32 = arith.constant 176 : i32
    %881 = arith.addi %0, %c176_i32 : i32
    %882 = arith.index_cast %881 : i32 to index
    %883 = memref.load %arg1[%882] : memref<768xi32, #tpu.memory_space<smem>>
    %884 = arith.index_cast %883 : i32 to index
    %c0_175 = arith.constant 0 : index
    %885 = vector.load %arg2[%884, %c0_175] : memref<1000x96xf32, #tpu.memory_space<vmem>>, vector<1x96xf32>
    %c177_i32 = arith.constant 177 : i32
    %886 = arith.addi %0, %c177_i32 : i32
    %887 = arith.index_cast %886 : i32 to index
    %888 = memref.load %arg1[%887] : memref<768xi32, #tpu.memory_space<smem>>
    %889 = arith.index_cast %888 : i32 to index
    %c0_176 = arith.constant 0 : index
    %890 = vector.load %arg2[%889, %c0_176] : memref<1000x96xf32, #tpu.memory_space<vmem>>, vector<1x96xf32>
    %c178_i32 = arith.constant 178 : i32
    %891 = arith.addi %0, %c178_i32 : i32
    %892 = arith.index_cast %891 : i32 to index
    %893 = memref.load %arg1[%892] : memref<768xi32, #tpu.memory_space<smem>>
    %894 = arith.index_cast %893 : i32 to index
    %c0_177 = arith.constant 0 : index
    %895 = vector.load %arg2[%894, %c0_177] : memref<1000x96xf32, #tpu.memory_space<vmem>>, vector<1x96xf32>
    %c179_i32 = arith.constant 179 : i32
    %896 = arith.addi %0, %c179_i32 : i32
    %897 = arith.index_cast %896 : i32 to index
    %898 = memref.load %arg1[%897] : memref<768xi32, #tpu.memory_space<smem>>
    %899 = arith.index_cast %898 : i32 to index
    %c0_178 = arith.constant 0 : index
    %900 = vector.load %arg2[%899, %c0_178] : memref<1000x96xf32, #tpu.memory_space<vmem>>, vector<1x96xf32>
    %c180_i32 = arith.constant 180 : i32
    %901 = arith.addi %0, %c180_i32 : i32
    %902 = arith.index_cast %901 : i32 to index
    %903 = memref.load %arg1[%902] : memref<768xi32, #tpu.memory_space<smem>>
    %904 = arith.index_cast %903 : i32 to index
    %c0_179 = arith.constant 0 : index
    %905 = vector.load %arg2[%904, %c0_179] : memref<1000x96xf32, #tpu.memory_space<vmem>>, vector<1x96xf32>
    %c181_i32 = arith.constant 181 : i32
    %906 = arith.addi %0, %c181_i32 : i32
    %907 = arith.index_cast %906 : i32 to index
    %908 = memref.load %arg1[%907] : memref<768xi32, #tpu.memory_space<smem>>
    %909 = arith.index_cast %908 : i32 to index
    %c0_180 = arith.constant 0 : index
    %910 = vector.load %arg2[%909, %c0_180] : memref<1000x96xf32, #tpu.memory_space<vmem>>, vector<1x96xf32>
    %c182_i32 = arith.constant 182 : i32
    %911 = arith.addi %0, %c182_i32 : i32
    %912 = arith.index_cast %911 : i32 to index
    %913 = memref.load %arg1[%912] : memref<768xi32, #tpu.memory_space<smem>>
    %914 = arith.index_cast %913 : i32 to index
    %c0_181 = arith.constant 0 : index
    %915 = vector.load %arg2[%914, %c0_181] : memref<1000x96xf32, #tpu.memory_space<vmem>>, vector<1x96xf32>
    %c183_i32 = arith.constant 183 : i32
    %916 = arith.addi %0, %c183_i32 : i32
    %917 = arith.index_cast %916 : i32 to index
    %918 = memref.load %arg1[%917] : memref<768xi32, #tpu.memory_space<smem>>
    %919 = arith.index_cast %918 : i32 to index
    %c0_182 = arith.constant 0 : index
    %920 = vector.load %arg2[%919, %c0_182] : memref<1000x96xf32, #tpu.memory_space<vmem>>, vector<1x96xf32>
    %c184_i32 = arith.constant 184 : i32
    %921 = arith.addi %0, %c184_i32 : i32
    %922 = arith.index_cast %921 : i32 to index
    %923 = memref.load %arg1[%922] : memref<768xi32, #tpu.memory_space<smem>>
    %924 = arith.index_cast %923 : i32 to index
    %c0_183 = arith.constant 0 : index
    %925 = vector.load %arg2[%924, %c0_183] : memref<1000x96xf32, #tpu.memory_space<vmem>>, vector<1x96xf32>
    %c185_i32 = arith.constant 185 : i32
    %926 = arith.addi %0, %c185_i32 : i32
    %927 = arith.index_cast %926 : i32 to index
    %928 = memref.load %arg1[%927] : memref<768xi32, #tpu.memory_space<smem>>
    %929 = arith.index_cast %928 : i32 to index
    %c0_184 = arith.constant 0 : index
    %930 = vector.load %arg2[%929, %c0_184] : memref<1000x96xf32, #tpu.memory_space<vmem>>, vector<1x96xf32>
    %c186_i32 = arith.constant 186 : i32
    %931 = arith.addi %0, %c186_i32 : i32
    %932 = arith.index_cast %931 : i32 to index
    %933 = memref.load %arg1[%932] : memref<768xi32, #tpu.memory_space<smem>>
    %934 = arith.index_cast %933 : i32 to index
    %c0_185 = arith.constant 0 : index
    %935 = vector.load %arg2[%934, %c0_185] : memref<1000x96xf32, #tpu.memory_space<vmem>>, vector<1x96xf32>
    %c187_i32 = arith.constant 187 : i32
    %936 = arith.addi %0, %c187_i32 : i32
    %937 = arith.index_cast %936 : i32 to index
    %938 = memref.load %arg1[%937] : memref<768xi32, #tpu.memory_space<smem>>
    %939 = arith.index_cast %938 : i32 to index
    %c0_186 = arith.constant 0 : index
    %940 = vector.load %arg2[%939, %c0_186] : memref<1000x96xf32, #tpu.memory_space<vmem>>, vector<1x96xf32>
    %c188_i32 = arith.constant 188 : i32
    %941 = arith.addi %0, %c188_i32 : i32
    %942 = arith.index_cast %941 : i32 to index
    %943 = memref.load %arg1[%942] : memref<768xi32, #tpu.memory_space<smem>>
    %944 = arith.index_cast %943 : i32 to index
    %c0_187 = arith.constant 0 : index
    %945 = vector.load %arg2[%944, %c0_187] : memref<1000x96xf32, #tpu.memory_space<vmem>>, vector<1x96xf32>
    %c189_i32 = arith.constant 189 : i32
    %946 = arith.addi %0, %c189_i32 : i32
    %947 = arith.index_cast %946 : i32 to index
    %948 = memref.load %arg1[%947] : memref<768xi32, #tpu.memory_space<smem>>
    %949 = arith.index_cast %948 : i32 to index
    %c0_188 = arith.constant 0 : index
    %950 = vector.load %arg2[%949, %c0_188] : memref<1000x96xf32, #tpu.memory_space<vmem>>, vector<1x96xf32>
    %c190_i32 = arith.constant 190 : i32
    %951 = arith.addi %0, %c190_i32 : i32
    %952 = arith.index_cast %951 : i32 to index
    %953 = memref.load %arg1[%952] : memref<768xi32, #tpu.memory_space<smem>>
    %954 = arith.index_cast %953 : i32 to index
    %c0_189 = arith.constant 0 : index
    %955 = vector.load %arg2[%954, %c0_189] : memref<1000x96xf32, #tpu.memory_space<vmem>>, vector<1x96xf32>
    %c191_i32 = arith.constant 191 : i32
    %956 = arith.addi %0, %c191_i32 : i32
    %957 = arith.index_cast %956 : i32 to index
    %958 = memref.load %arg1[%957] : memref<768xi32, #tpu.memory_space<smem>>
    %959 = arith.index_cast %958 : i32 to index
    %c0_190 = arith.constant 0 : index
    %960 = vector.load %arg2[%959, %c0_190] : memref<1000x96xf32, #tpu.memory_space<vmem>>, vector<1x96xf32>
    %c192_i32 = arith.constant 192 : i32
    %961 = arith.addi %0, %c192_i32 : i32
    %962 = arith.index_cast %961 : i32 to index
    %963 = memref.load %arg1[%962] : memref<768xi32, #tpu.memory_space<smem>>
    %964 = arith.index_cast %963 : i32 to index
    %c0_191 = arith.constant 0 : index
    %965 = vector.load %arg2[%964, %c0_191] : memref<1000x96xf32, #tpu.memory_space<vmem>>, vector<1x96xf32>
    %c193_i32 = arith.constant 193 : i32
    %966 = arith.addi %0, %c193_i32 : i32
    %967 = arith.index_cast %966 : i32 to index
    %968 = memref.load %arg1[%967] : memref<768xi32, #tpu.memory_space<smem>>
    %969 = arith.index_cast %968 : i32 to index
    %c0_192 = arith.constant 0 : index
    %970 = vector.load %arg2[%969, %c0_192] : memref<1000x96xf32, #tpu.memory_space<vmem>>, vector<1x96xf32>
    %c194_i32 = arith.constant 194 : i32
    %971 = arith.addi %0, %c194_i32 : i32
    %972 = arith.index_cast %971 : i32 to index
    %973 = memref.load %arg1[%972] : memref<768xi32, #tpu.memory_space<smem>>
    %974 = arith.index_cast %973 : i32 to index
    %c0_193 = arith.constant 0 : index
    %975 = vector.load %arg2[%974, %c0_193] : memref<1000x96xf32, #tpu.memory_space<vmem>>, vector<1x96xf32>
    %c195_i32 = arith.constant 195 : i32
    %976 = arith.addi %0, %c195_i32 : i32
    %977 = arith.index_cast %976 : i32 to index
    %978 = memref.load %arg1[%977] : memref<768xi32, #tpu.memory_space<smem>>
    %979 = arith.index_cast %978 : i32 to index
    %c0_194 = arith.constant 0 : index
    %980 = vector.load %arg2[%979, %c0_194] : memref<1000x96xf32, #tpu.memory_space<vmem>>, vector<1x96xf32>
    %c196_i32 = arith.constant 196 : i32
    %981 = arith.addi %0, %c196_i32 : i32
    %982 = arith.index_cast %981 : i32 to index
    %983 = memref.load %arg1[%982] : memref<768xi32, #tpu.memory_space<smem>>
    %984 = arith.index_cast %983 : i32 to index
    %c0_195 = arith.constant 0 : index
    %985 = vector.load %arg2[%984, %c0_195] : memref<1000x96xf32, #tpu.memory_space<vmem>>, vector<1x96xf32>
    %c197_i32 = arith.constant 197 : i32
    %986 = arith.addi %0, %c197_i32 : i32
    %987 = arith.index_cast %986 : i32 to index
    %988 = memref.load %arg1[%987] : memref<768xi32, #tpu.memory_space<smem>>
    %989 = arith.index_cast %988 : i32 to index
    %c0_196 = arith.constant 0 : index
    %990 = vector.load %arg2[%989, %c0_196] : memref<1000x96xf32, #tpu.memory_space<vmem>>, vector<1x96xf32>
    %c198_i32 = arith.constant 198 : i32
    %991 = arith.addi %0, %c198_i32 : i32
    %992 = arith.index_cast %991 : i32 to index
    %993 = memref.load %arg1[%992] : memref<768xi32, #tpu.memory_space<smem>>
    %994 = arith.index_cast %993 : i32 to index
    %c0_197 = arith.constant 0 : index
    %995 = vector.load %arg2[%994, %c0_197] : memref<1000x96xf32, #tpu.memory_space<vmem>>, vector<1x96xf32>
    %c199_i32 = arith.constant 199 : i32
    %996 = arith.addi %0, %c199_i32 : i32
    %997 = arith.index_cast %996 : i32 to index
    %998 = memref.load %arg1[%997] : memref<768xi32, #tpu.memory_space<smem>>
    %999 = arith.index_cast %998 : i32 to index
    %c0_198 = arith.constant 0 : index
    %1000 = vector.load %arg2[%999, %c0_198] : memref<1000x96xf32, #tpu.memory_space<vmem>>, vector<1x96xf32>
    %c200_i32 = arith.constant 200 : i32
    %1001 = arith.addi %0, %c200_i32 : i32
    %1002 = arith.index_cast %1001 : i32 to index
    %1003 = memref.load %arg1[%1002] : memref<768xi32, #tpu.memory_space<smem>>
    %1004 = arith.index_cast %1003 : i32 to index
    %c0_199 = arith.constant 0 : index
    %1005 = vector.load %arg2[%1004, %c0_199] : memref<1000x96xf32, #tpu.memory_space<vmem>>, vector<1x96xf32>
    %c201_i32 = arith.constant 201 : i32
    %1006 = arith.addi %0, %c201_i32 : i32
    %1007 = arith.index_cast %1006 : i32 to index
    %1008 = memref.load %arg1[%1007] : memref<768xi32, #tpu.memory_space<smem>>
    %1009 = arith.index_cast %1008 : i32 to index
    %c0_200 = arith.constant 0 : index
    %1010 = vector.load %arg2[%1009, %c0_200] : memref<1000x96xf32, #tpu.memory_space<vmem>>, vector<1x96xf32>
    %c202_i32 = arith.constant 202 : i32
    %1011 = arith.addi %0, %c202_i32 : i32
    %1012 = arith.index_cast %1011 : i32 to index
    %1013 = memref.load %arg1[%1012] : memref<768xi32, #tpu.memory_space<smem>>
    %1014 = arith.index_cast %1013 : i32 to index
    %c0_201 = arith.constant 0 : index
    %1015 = vector.load %arg2[%1014, %c0_201] : memref<1000x96xf32, #tpu.memory_space<vmem>>, vector<1x96xf32>
    %c203_i32 = arith.constant 203 : i32
    %1016 = arith.addi %0, %c203_i32 : i32
    %1017 = arith.index_cast %1016 : i32 to index
    %1018 = memref.load %arg1[%1017] : memref<768xi32, #tpu.memory_space<smem>>
    %1019 = arith.index_cast %1018 : i32 to index
    %c0_202 = arith.constant 0 : index
    %1020 = vector.load %arg2[%1019, %c0_202] : memref<1000x96xf32, #tpu.memory_space<vmem>>, vector<1x96xf32>
    %c204_i32 = arith.constant 204 : i32
    %1021 = arith.addi %0, %c204_i32 : i32
    %1022 = arith.index_cast %1021 : i32 to index
    %1023 = memref.load %arg1[%1022] : memref<768xi32, #tpu.memory_space<smem>>
    %1024 = arith.index_cast %1023 : i32 to index
    %c0_203 = arith.constant 0 : index
    %1025 = vector.load %arg2[%1024, %c0_203] : memref<1000x96xf32, #tpu.memory_space<vmem>>, vector<1x96xf32>
    %c205_i32 = arith.constant 205 : i32
    %1026 = arith.addi %0, %c205_i32 : i32
    %1027 = arith.index_cast %1026 : i32 to index
    %1028 = memref.load %arg1[%1027] : memref<768xi32, #tpu.memory_space<smem>>
    %1029 = arith.index_cast %1028 : i32 to index
    %c0_204 = arith.constant 0 : index
    %1030 = vector.load %arg2[%1029, %c0_204] : memref<1000x96xf32, #tpu.memory_space<vmem>>, vector<1x96xf32>
    %c206_i32 = arith.constant 206 : i32
    %1031 = arith.addi %0, %c206_i32 : i32
    %1032 = arith.index_cast %1031 : i32 to index
    %1033 = memref.load %arg1[%1032] : memref<768xi32, #tpu.memory_space<smem>>
    %1034 = arith.index_cast %1033 : i32 to index
    %c0_205 = arith.constant 0 : index
    %1035 = vector.load %arg2[%1034, %c0_205] : memref<1000x96xf32, #tpu.memory_space<vmem>>, vector<1x96xf32>
    %c207_i32 = arith.constant 207 : i32
    %1036 = arith.addi %0, %c207_i32 : i32
    %1037 = arith.index_cast %1036 : i32 to index
    %1038 = memref.load %arg1[%1037] : memref<768xi32, #tpu.memory_space<smem>>
    %1039 = arith.index_cast %1038 : i32 to index
    %c0_206 = arith.constant 0 : index
    %1040 = vector.load %arg2[%1039, %c0_206] : memref<1000x96xf32, #tpu.memory_space<vmem>>, vector<1x96xf32>
    %c208_i32 = arith.constant 208 : i32
    %1041 = arith.addi %0, %c208_i32 : i32
    %1042 = arith.index_cast %1041 : i32 to index
    %1043 = memref.load %arg1[%1042] : memref<768xi32, #tpu.memory_space<smem>>
    %1044 = arith.index_cast %1043 : i32 to index
    %c0_207 = arith.constant 0 : index
    %1045 = vector.load %arg2[%1044, %c0_207] : memref<1000x96xf32, #tpu.memory_space<vmem>>, vector<1x96xf32>
    %c209_i32 = arith.constant 209 : i32
    %1046 = arith.addi %0, %c209_i32 : i32
    %1047 = arith.index_cast %1046 : i32 to index
    %1048 = memref.load %arg1[%1047] : memref<768xi32, #tpu.memory_space<smem>>
    %1049 = arith.index_cast %1048 : i32 to index
    %c0_208 = arith.constant 0 : index
    %1050 = vector.load %arg2[%1049, %c0_208] : memref<1000x96xf32, #tpu.memory_space<vmem>>, vector<1x96xf32>
    %c210_i32 = arith.constant 210 : i32
    %1051 = arith.addi %0, %c210_i32 : i32
    %1052 = arith.index_cast %1051 : i32 to index
    %1053 = memref.load %arg1[%1052] : memref<768xi32, #tpu.memory_space<smem>>
    %1054 = arith.index_cast %1053 : i32 to index
    %c0_209 = arith.constant 0 : index
    %1055 = vector.load %arg2[%1054, %c0_209] : memref<1000x96xf32, #tpu.memory_space<vmem>>, vector<1x96xf32>
    %c211_i32 = arith.constant 211 : i32
    %1056 = arith.addi %0, %c211_i32 : i32
    %1057 = arith.index_cast %1056 : i32 to index
    %1058 = memref.load %arg1[%1057] : memref<768xi32, #tpu.memory_space<smem>>
    %1059 = arith.index_cast %1058 : i32 to index
    %c0_210 = arith.constant 0 : index
    %1060 = vector.load %arg2[%1059, %c0_210] : memref<1000x96xf32, #tpu.memory_space<vmem>>, vector<1x96xf32>
    %c212_i32 = arith.constant 212 : i32
    %1061 = arith.addi %0, %c212_i32 : i32
    %1062 = arith.index_cast %1061 : i32 to index
    %1063 = memref.load %arg1[%1062] : memref<768xi32, #tpu.memory_space<smem>>
    %1064 = arith.index_cast %1063 : i32 to index
    %c0_211 = arith.constant 0 : index
    %1065 = vector.load %arg2[%1064, %c0_211] : memref<1000x96xf32, #tpu.memory_space<vmem>>, vector<1x96xf32>
    %c213_i32 = arith.constant 213 : i32
    %1066 = arith.addi %0, %c213_i32 : i32
    %1067 = arith.index_cast %1066 : i32 to index
    %1068 = memref.load %arg1[%1067] : memref<768xi32, #tpu.memory_space<smem>>
    %1069 = arith.index_cast %1068 : i32 to index
    %c0_212 = arith.constant 0 : index
    %1070 = vector.load %arg2[%1069, %c0_212] : memref<1000x96xf32, #tpu.memory_space<vmem>>, vector<1x96xf32>
    %c214_i32 = arith.constant 214 : i32
    %1071 = arith.addi %0, %c214_i32 : i32
    %1072 = arith.index_cast %1071 : i32 to index
    %1073 = memref.load %arg1[%1072] : memref<768xi32, #tpu.memory_space<smem>>
    %1074 = arith.index_cast %1073 : i32 to index
    %c0_213 = arith.constant 0 : index
    %1075 = vector.load %arg2[%1074, %c0_213] : memref<1000x96xf32, #tpu.memory_space<vmem>>, vector<1x96xf32>
    %c215_i32 = arith.constant 215 : i32
    %1076 = arith.addi %0, %c215_i32 : i32
    %1077 = arith.index_cast %1076 : i32 to index
    %1078 = memref.load %arg1[%1077] : memref<768xi32, #tpu.memory_space<smem>>
    %1079 = arith.index_cast %1078 : i32 to index
    %c0_214 = arith.constant 0 : index
    %1080 = vector.load %arg2[%1079, %c0_214] : memref<1000x96xf32, #tpu.memory_space<vmem>>, vector<1x96xf32>
    %c216_i32 = arith.constant 216 : i32
    %1081 = arith.addi %0, %c216_i32 : i32
    %1082 = arith.index_cast %1081 : i32 to index
    %1083 = memref.load %arg1[%1082] : memref<768xi32, #tpu.memory_space<smem>>
    %1084 = arith.index_cast %1083 : i32 to index
    %c0_215 = arith.constant 0 : index
    %1085 = vector.load %arg2[%1084, %c0_215] : memref<1000x96xf32, #tpu.memory_space<vmem>>, vector<1x96xf32>
    %c217_i32 = arith.constant 217 : i32
    %1086 = arith.addi %0, %c217_i32 : i32
    %1087 = arith.index_cast %1086 : i32 to index
    %1088 = memref.load %arg1[%1087] : memref<768xi32, #tpu.memory_space<smem>>
    %1089 = arith.index_cast %1088 : i32 to index
    %c0_216 = arith.constant 0 : index
    %1090 = vector.load %arg2[%1089, %c0_216] : memref<1000x96xf32, #tpu.memory_space<vmem>>, vector<1x96xf32>
    %c218_i32 = arith.constant 218 : i32
    %1091 = arith.addi %0, %c218_i32 : i32
    %1092 = arith.index_cast %1091 : i32 to index
    %1093 = memref.load %arg1[%1092] : memref<768xi32, #tpu.memory_space<smem>>
    %1094 = arith.index_cast %1093 : i32 to index
    %c0_217 = arith.constant 0 : index
    %1095 = vector.load %arg2[%1094, %c0_217] : memref<1000x96xf32, #tpu.memory_space<vmem>>, vector<1x96xf32>
    %c219_i32 = arith.constant 219 : i32
    %1096 = arith.addi %0, %c219_i32 : i32
    %1097 = arith.index_cast %1096 : i32 to index
    %1098 = memref.load %arg1[%1097] : memref<768xi32, #tpu.memory_space<smem>>
    %1099 = arith.index_cast %1098 : i32 to index
    %c0_218 = arith.constant 0 : index
    %1100 = vector.load %arg2[%1099, %c0_218] : memref<1000x96xf32, #tpu.memory_space<vmem>>, vector<1x96xf32>
    %c220_i32 = arith.constant 220 : i32
    %1101 = arith.addi %0, %c220_i32 : i32
    %1102 = arith.index_cast %1101 : i32 to index
    %1103 = memref.load %arg1[%1102] : memref<768xi32, #tpu.memory_space<smem>>
    %1104 = arith.index_cast %1103 : i32 to index
    %c0_219 = arith.constant 0 : index
    %1105 = vector.load %arg2[%1104, %c0_219] : memref<1000x96xf32, #tpu.memory_space<vmem>>, vector<1x96xf32>
    %c221_i32 = arith.constant 221 : i32
    %1106 = arith.addi %0, %c221_i32 : i32
    %1107 = arith.index_cast %1106 : i32 to index
    %1108 = memref.load %arg1[%1107] : memref<768xi32, #tpu.memory_space<smem>>
    %1109 = arith.index_cast %1108 : i32 to index
    %c0_220 = arith.constant 0 : index
    %1110 = vector.load %arg2[%1109, %c0_220] : memref<1000x96xf32, #tpu.memory_space<vmem>>, vector<1x96xf32>
    %c222_i32 = arith.constant 222 : i32
    %1111 = arith.addi %0, %c222_i32 : i32
    %1112 = arith.index_cast %1111 : i32 to index
    %1113 = memref.load %arg1[%1112] : memref<768xi32, #tpu.memory_space<smem>>
    %1114 = arith.index_cast %1113 : i32 to index
    %c0_221 = arith.constant 0 : index
    %1115 = vector.load %arg2[%1114, %c0_221] : memref<1000x96xf32, #tpu.memory_space<vmem>>, vector<1x96xf32>
    %c223_i32 = arith.constant 223 : i32
    %1116 = arith.addi %0, %c223_i32 : i32
    %1117 = arith.index_cast %1116 : i32 to index
    %1118 = memref.load %arg1[%1117] : memref<768xi32, #tpu.memory_space<smem>>
    %1119 = arith.index_cast %1118 : i32 to index
    %c0_222 = arith.constant 0 : index
    %1120 = vector.load %arg2[%1119, %c0_222] : memref<1000x96xf32, #tpu.memory_space<vmem>>, vector<1x96xf32>
    %c224_i32 = arith.constant 224 : i32
    %1121 = arith.addi %0, %c224_i32 : i32
    %1122 = arith.index_cast %1121 : i32 to index
    %1123 = memref.load %arg1[%1122] : memref<768xi32, #tpu.memory_space<smem>>
    %1124 = arith.index_cast %1123 : i32 to index
    %c0_223 = arith.constant 0 : index
    %1125 = vector.load %arg2[%1124, %c0_223] : memref<1000x96xf32, #tpu.memory_space<vmem>>, vector<1x96xf32>
    %c225_i32 = arith.constant 225 : i32
    %1126 = arith.addi %0, %c225_i32 : i32
    %1127 = arith.index_cast %1126 : i32 to index
    %1128 = memref.load %arg1[%1127] : memref<768xi32, #tpu.memory_space<smem>>
    %1129 = arith.index_cast %1128 : i32 to index
    %c0_224 = arith.constant 0 : index
    %1130 = vector.load %arg2[%1129, %c0_224] : memref<1000x96xf32, #tpu.memory_space<vmem>>, vector<1x96xf32>
    %c226_i32 = arith.constant 226 : i32
    %1131 = arith.addi %0, %c226_i32 : i32
    %1132 = arith.index_cast %1131 : i32 to index
    %1133 = memref.load %arg1[%1132] : memref<768xi32, #tpu.memory_space<smem>>
    %1134 = arith.index_cast %1133 : i32 to index
    %c0_225 = arith.constant 0 : index
    %1135 = vector.load %arg2[%1134, %c0_225] : memref<1000x96xf32, #tpu.memory_space<vmem>>, vector<1x96xf32>
    %c227_i32 = arith.constant 227 : i32
    %1136 = arith.addi %0, %c227_i32 : i32
    %1137 = arith.index_cast %1136 : i32 to index
    %1138 = memref.load %arg1[%1137] : memref<768xi32, #tpu.memory_space<smem>>
    %1139 = arith.index_cast %1138 : i32 to index
    %c0_226 = arith.constant 0 : index
    %1140 = vector.load %arg2[%1139, %c0_226] : memref<1000x96xf32, #tpu.memory_space<vmem>>, vector<1x96xf32>
    %c228_i32 = arith.constant 228 : i32
    %1141 = arith.addi %0, %c228_i32 : i32
    %1142 = arith.index_cast %1141 : i32 to index
    %1143 = memref.load %arg1[%1142] : memref<768xi32, #tpu.memory_space<smem>>
    %1144 = arith.index_cast %1143 : i32 to index
    %c0_227 = arith.constant 0 : index
    %1145 = vector.load %arg2[%1144, %c0_227] : memref<1000x96xf32, #tpu.memory_space<vmem>>, vector<1x96xf32>
    %c229_i32 = arith.constant 229 : i32
    %1146 = arith.addi %0, %c229_i32 : i32
    %1147 = arith.index_cast %1146 : i32 to index
    %1148 = memref.load %arg1[%1147] : memref<768xi32, #tpu.memory_space<smem>>
    %1149 = arith.index_cast %1148 : i32 to index
    %c0_228 = arith.constant 0 : index
    %1150 = vector.load %arg2[%1149, %c0_228] : memref<1000x96xf32, #tpu.memory_space<vmem>>, vector<1x96xf32>
    %c230_i32 = arith.constant 230 : i32
    %1151 = arith.addi %0, %c230_i32 : i32
    %1152 = arith.index_cast %1151 : i32 to index
    %1153 = memref.load %arg1[%1152] : memref<768xi32, #tpu.memory_space<smem>>
    %1154 = arith.index_cast %1153 : i32 to index
    %c0_229 = arith.constant 0 : index
    %1155 = vector.load %arg2[%1154, %c0_229] : memref<1000x96xf32, #tpu.memory_space<vmem>>, vector<1x96xf32>
    %c231_i32 = arith.constant 231 : i32
    %1156 = arith.addi %0, %c231_i32 : i32
    %1157 = arith.index_cast %1156 : i32 to index
    %1158 = memref.load %arg1[%1157] : memref<768xi32, #tpu.memory_space<smem>>
    %1159 = arith.index_cast %1158 : i32 to index
    %c0_230 = arith.constant 0 : index
    %1160 = vector.load %arg2[%1159, %c0_230] : memref<1000x96xf32, #tpu.memory_space<vmem>>, vector<1x96xf32>
    %c232_i32 = arith.constant 232 : i32
    %1161 = arith.addi %0, %c232_i32 : i32
    %1162 = arith.index_cast %1161 : i32 to index
    %1163 = memref.load %arg1[%1162] : memref<768xi32, #tpu.memory_space<smem>>
    %1164 = arith.index_cast %1163 : i32 to index
    %c0_231 = arith.constant 0 : index
    %1165 = vector.load %arg2[%1164, %c0_231] : memref<1000x96xf32, #tpu.memory_space<vmem>>, vector<1x96xf32>
    %c233_i32 = arith.constant 233 : i32
    %1166 = arith.addi %0, %c233_i32 : i32
    %1167 = arith.index_cast %1166 : i32 to index
    %1168 = memref.load %arg1[%1167] : memref<768xi32, #tpu.memory_space<smem>>
    %1169 = arith.index_cast %1168 : i32 to index
    %c0_232 = arith.constant 0 : index
    %1170 = vector.load %arg2[%1169, %c0_232] : memref<1000x96xf32, #tpu.memory_space<vmem>>, vector<1x96xf32>
    %c234_i32 = arith.constant 234 : i32
    %1171 = arith.addi %0, %c234_i32 : i32
    %1172 = arith.index_cast %1171 : i32 to index
    %1173 = memref.load %arg1[%1172] : memref<768xi32, #tpu.memory_space<smem>>
    %1174 = arith.index_cast %1173 : i32 to index
    %c0_233 = arith.constant 0 : index
    %1175 = vector.load %arg2[%1174, %c0_233] : memref<1000x96xf32, #tpu.memory_space<vmem>>, vector<1x96xf32>
    %c235_i32 = arith.constant 235 : i32
    %1176 = arith.addi %0, %c235_i32 : i32
    %1177 = arith.index_cast %1176 : i32 to index
    %1178 = memref.load %arg1[%1177] : memref<768xi32, #tpu.memory_space<smem>>
    %1179 = arith.index_cast %1178 : i32 to index
    %c0_234 = arith.constant 0 : index
    %1180 = vector.load %arg2[%1179, %c0_234] : memref<1000x96xf32, #tpu.memory_space<vmem>>, vector<1x96xf32>
    %c236_i32 = arith.constant 236 : i32
    %1181 = arith.addi %0, %c236_i32 : i32
    %1182 = arith.index_cast %1181 : i32 to index
    %1183 = memref.load %arg1[%1182] : memref<768xi32, #tpu.memory_space<smem>>
    %1184 = arith.index_cast %1183 : i32 to index
    %c0_235 = arith.constant 0 : index
    %1185 = vector.load %arg2[%1184, %c0_235] : memref<1000x96xf32, #tpu.memory_space<vmem>>, vector<1x96xf32>
    %c237_i32 = arith.constant 237 : i32
    %1186 = arith.addi %0, %c237_i32 : i32
    %1187 = arith.index_cast %1186 : i32 to index
    %1188 = memref.load %arg1[%1187] : memref<768xi32, #tpu.memory_space<smem>>
    %1189 = arith.index_cast %1188 : i32 to index
    %c0_236 = arith.constant 0 : index
    %1190 = vector.load %arg2[%1189, %c0_236] : memref<1000x96xf32, #tpu.memory_space<vmem>>, vector<1x96xf32>
    %c238_i32 = arith.constant 238 : i32
    %1191 = arith.addi %0, %c238_i32 : i32
    %1192 = arith.index_cast %1191 : i32 to index
    %1193 = memref.load %arg1[%1192] : memref<768xi32, #tpu.memory_space<smem>>
    %1194 = arith.index_cast %1193 : i32 to index
    %c0_237 = arith.constant 0 : index
    %1195 = vector.load %arg2[%1194, %c0_237] : memref<1000x96xf32, #tpu.memory_space<vmem>>, vector<1x96xf32>
    %c239_i32 = arith.constant 239 : i32
    %1196 = arith.addi %0, %c239_i32 : i32
    %1197 = arith.index_cast %1196 : i32 to index
    %1198 = memref.load %arg1[%1197] : memref<768xi32, #tpu.memory_space<smem>>
    %1199 = arith.index_cast %1198 : i32 to index
    %c0_238 = arith.constant 0 : index
    %1200 = vector.load %arg2[%1199, %c0_238] : memref<1000x96xf32, #tpu.memory_space<vmem>>, vector<1x96xf32>
    %c240_i32 = arith.constant 240 : i32
    %1201 = arith.addi %0, %c240_i32 : i32
    %1202 = arith.index_cast %1201 : i32 to index
    %1203 = memref.load %arg1[%1202] : memref<768xi32, #tpu.memory_space<smem>>
    %1204 = arith.index_cast %1203 : i32 to index
    %c0_239 = arith.constant 0 : index
    %1205 = vector.load %arg2[%1204, %c0_239] : memref<1000x96xf32, #tpu.memory_space<vmem>>, vector<1x96xf32>
    %c241_i32 = arith.constant 241 : i32
    %1206 = arith.addi %0, %c241_i32 : i32
    %1207 = arith.index_cast %1206 : i32 to index
    %1208 = memref.load %arg1[%1207] : memref<768xi32, #tpu.memory_space<smem>>
    %1209 = arith.index_cast %1208 : i32 to index
    %c0_240 = arith.constant 0 : index
    %1210 = vector.load %arg2[%1209, %c0_240] : memref<1000x96xf32, #tpu.memory_space<vmem>>, vector<1x96xf32>
    %c242_i32 = arith.constant 242 : i32
    %1211 = arith.addi %0, %c242_i32 : i32
    %1212 = arith.index_cast %1211 : i32 to index
    %1213 = memref.load %arg1[%1212] : memref<768xi32, #tpu.memory_space<smem>>
    %1214 = arith.index_cast %1213 : i32 to index
    %c0_241 = arith.constant 0 : index
    %1215 = vector.load %arg2[%1214, %c0_241] : memref<1000x96xf32, #tpu.memory_space<vmem>>, vector<1x96xf32>
    %c243_i32 = arith.constant 243 : i32
    %1216 = arith.addi %0, %c243_i32 : i32
    %1217 = arith.index_cast %1216 : i32 to index
    %1218 = memref.load %arg1[%1217] : memref<768xi32, #tpu.memory_space<smem>>
    %1219 = arith.index_cast %1218 : i32 to index
    %c0_242 = arith.constant 0 : index
    %1220 = vector.load %arg2[%1219, %c0_242] : memref<1000x96xf32, #tpu.memory_space<vmem>>, vector<1x96xf32>
    %c244_i32 = arith.constant 244 : i32
    %1221 = arith.addi %0, %c244_i32 : i32
    %1222 = arith.index_cast %1221 : i32 to index
    %1223 = memref.load %arg1[%1222] : memref<768xi32, #tpu.memory_space<smem>>
    %1224 = arith.index_cast %1223 : i32 to index
    %c0_243 = arith.constant 0 : index
    %1225 = vector.load %arg2[%1224, %c0_243] : memref<1000x96xf32, #tpu.memory_space<vmem>>, vector<1x96xf32>
    %c245_i32 = arith.constant 245 : i32
    %1226 = arith.addi %0, %c245_i32 : i32
    %1227 = arith.index_cast %1226 : i32 to index
    %1228 = memref.load %arg1[%1227] : memref<768xi32, #tpu.memory_space<smem>>
    %1229 = arith.index_cast %1228 : i32 to index
    %c0_244 = arith.constant 0 : index
    %1230 = vector.load %arg2[%1229, %c0_244] : memref<1000x96xf32, #tpu.memory_space<vmem>>, vector<1x96xf32>
    %c246_i32 = arith.constant 246 : i32
    %1231 = arith.addi %0, %c246_i32 : i32
    %1232 = arith.index_cast %1231 : i32 to index
    %1233 = memref.load %arg1[%1232] : memref<768xi32, #tpu.memory_space<smem>>
    %1234 = arith.index_cast %1233 : i32 to index
    %c0_245 = arith.constant 0 : index
    %1235 = vector.load %arg2[%1234, %c0_245] : memref<1000x96xf32, #tpu.memory_space<vmem>>, vector<1x96xf32>
    %c247_i32 = arith.constant 247 : i32
    %1236 = arith.addi %0, %c247_i32 : i32
    %1237 = arith.index_cast %1236 : i32 to index
    %1238 = memref.load %arg1[%1237] : memref<768xi32, #tpu.memory_space<smem>>
    %1239 = arith.index_cast %1238 : i32 to index
    %c0_246 = arith.constant 0 : index
    %1240 = vector.load %arg2[%1239, %c0_246] : memref<1000x96xf32, #tpu.memory_space<vmem>>, vector<1x96xf32>
    %c248_i32 = arith.constant 248 : i32
    %1241 = arith.addi %0, %c248_i32 : i32
    %1242 = arith.index_cast %1241 : i32 to index
    %1243 = memref.load %arg1[%1242] : memref<768xi32, #tpu.memory_space<smem>>
    %1244 = arith.index_cast %1243 : i32 to index
    %c0_247 = arith.constant 0 : index
    %1245 = vector.load %arg2[%1244, %c0_247] : memref<1000x96xf32, #tpu.memory_space<vmem>>, vector<1x96xf32>
    %c249_i32 = arith.constant 249 : i32
    %1246 = arith.addi %0, %c249_i32 : i32
    %1247 = arith.index_cast %1246 : i32 to index
    %1248 = memref.load %arg1[%1247] : memref<768xi32, #tpu.memory_space<smem>>
    %1249 = arith.index_cast %1248 : i32 to index
    %c0_248 = arith.constant 0 : index
    %1250 = vector.load %arg2[%1249, %c0_248] : memref<1000x96xf32, #tpu.memory_space<vmem>>, vector<1x96xf32>
    %c250_i32 = arith.constant 250 : i32
    %1251 = arith.addi %0, %c250_i32 : i32
    %1252 = arith.index_cast %1251 : i32 to index
    %1253 = memref.load %arg1[%1252] : memref<768xi32, #tpu.memory_space<smem>>
    %1254 = arith.index_cast %1253 : i32 to index
    %c0_249 = arith.constant 0 : index
    %1255 = vector.load %arg2[%1254, %c0_249] : memref<1000x96xf32, #tpu.memory_space<vmem>>, vector<1x96xf32>
    %c251_i32 = arith.constant 251 : i32
    %1256 = arith.addi %0, %c251_i32 : i32
    %1257 = arith.index_cast %1256 : i32 to index
    %1258 = memref.load %arg1[%1257] : memref<768xi32, #tpu.memory_space<smem>>
    %1259 = arith.index_cast %1258 : i32 to index
    %c0_250 = arith.constant 0 : index
    %1260 = vector.load %arg2[%1259, %c0_250] : memref<1000x96xf32, #tpu.memory_space<vmem>>, vector<1x96xf32>
    %c252_i32 = arith.constant 252 : i32
    %1261 = arith.addi %0, %c252_i32 : i32
    %1262 = arith.index_cast %1261 : i32 to index
    %1263 = memref.load %arg1[%1262] : memref<768xi32, #tpu.memory_space<smem>>
    %1264 = arith.index_cast %1263 : i32 to index
    %c0_251 = arith.constant 0 : index
    %1265 = vector.load %arg2[%1264, %c0_251] : memref<1000x96xf32, #tpu.memory_space<vmem>>, vector<1x96xf32>
    %c253_i32 = arith.constant 253 : i32
    %1266 = arith.addi %0, %c253_i32 : i32
    %1267 = arith.index_cast %1266 : i32 to index
    %1268 = memref.load %arg1[%1267] : memref<768xi32, #tpu.memory_space<smem>>
    %1269 = arith.index_cast %1268 : i32 to index
    %c0_252 = arith.constant 0 : index
    %1270 = vector.load %arg2[%1269, %c0_252] : memref<1000x96xf32, #tpu.memory_space<vmem>>, vector<1x96xf32>
    %c254_i32 = arith.constant 254 : i32
    %1271 = arith.addi %0, %c254_i32 : i32
    %1272 = arith.index_cast %1271 : i32 to index
    %1273 = memref.load %arg1[%1272] : memref<768xi32, #tpu.memory_space<smem>>
    %1274 = arith.index_cast %1273 : i32 to index
    %c0_253 = arith.constant 0 : index
    %1275 = vector.load %arg2[%1274, %c0_253] : memref<1000x96xf32, #tpu.memory_space<vmem>>, vector<1x96xf32>
    %c255_i32 = arith.constant 255 : i32
    %1276 = arith.addi %0, %c255_i32 : i32
    %1277 = arith.index_cast %1276 : i32 to index
    %1278 = memref.load %arg1[%1277] : memref<768xi32, #tpu.memory_space<smem>>
    %1279 = arith.index_cast %1278 : i32 to index
    %c0_254 = arith.constant 0 : index
    %1280 = vector.load %arg2[%1279, %c0_254] : memref<1000x96xf32, #tpu.memory_space<vmem>>, vector<1x96xf32>
    %1281 = tpu.concatenate %5, %10, %15, %20, %25, %30, %35, %40, %45, %50, %55, %60, %65, %70, %75, %80 in 0 : vector<1x96xf32>, vector<1x96xf32>, vector<1x96xf32>, vector<1x96xf32>, vector<1x96xf32>, vector<1x96xf32>, vector<1x96xf32>, vector<1x96xf32>, vector<1x96xf32>, vector<1x96xf32>, vector<1x96xf32>, vector<1x96xf32>, vector<1x96xf32>, vector<1x96xf32>, vector<1x96xf32>, vector<1x96xf32> -> vector<16x96xf32>
    %1282 = tpu.concatenate %85, %90, %95, %100, %105, %110, %115, %120, %125, %130, %135, %140, %145, %150, %155, %160 in 0 : vector<1x96xf32>, vector<1x96xf32>, vector<1x96xf32>, vector<1x96xf32>, vector<1x96xf32>, vector<1x96xf32>, vector<1x96xf32>, vector<1x96xf32>, vector<1x96xf32>, vector<1x96xf32>, vector<1x96xf32>, vector<1x96xf32>, vector<1x96xf32>, vector<1x96xf32>, vector<1x96xf32>, vector<1x96xf32> -> vector<16x96xf32>
    %1283 = tpu.concatenate %165, %170, %175, %180, %185, %190, %195, %200, %205, %210, %215, %220, %225, %230, %235, %240 in 0 : vector<1x96xf32>, vector<1x96xf32>, vector<1x96xf32>, vector<1x96xf32>, vector<1x96xf32>, vector<1x96xf32>, vector<1x96xf32>, vector<1x96xf32>, vector<1x96xf32>, vector<1x96xf32>, vector<1x96xf32>, vector<1x96xf32>, vector<1x96xf32>, vector<1x96xf32>, vector<1x96xf32>, vector<1x96xf32> -> vector<16x96xf32>
    %1284 = tpu.concatenate %245, %250, %255, %260, %265, %270, %275, %280, %285, %290, %295, %300, %305, %310, %315, %320 in 0 : vector<1x96xf32>, vector<1x96xf32>, vector<1x96xf32>, vector<1x96xf32>, vector<1x96xf32>, vector<1x96xf32>, vector<1x96xf32>, vector<1x96xf32>, vector<1x96xf32>, vector<1x96xf32>, vector<1x96xf32>, vector<1x96xf32>, vector<1x96xf32>, vector<1x96xf32>, vector<1x96xf32>, vector<1x96xf32> -> vector<16x96xf32>
    %1285 = tpu.concatenate %325, %330, %335, %340, %345, %350, %355, %360, %365, %370, %375, %380, %385, %390, %395, %400 in 0 : vector<1x96xf32>, vector<1x96xf32>, vector<1x96xf32>, vector<1x96xf32>, vector<1x96xf32>, vector<1x96xf32>, vector<1x96xf32>, vector<1x96xf32>, vector<1x96xf32>, vector<1x96xf32>, vector<1x96xf32>, vector<1x96xf32>, vector<1x96xf32>, vector<1x96xf32>, vector<1x96xf32>, vector<1x96xf32> -> vector<16x96xf32>
    %1286 = tpu.concatenate %405, %410, %415, %420, %425, %430, %435, %440, %445, %450, %455, %460, %465, %470, %475, %480 in 0 : vector<1x96xf32>, vector<1x96xf32>, vector<1x96xf32>, vector<1x96xf32>, vector<1x96xf32>, vector<1x96xf32>, vector<1x96xf32>, vector<1x96xf32>, vector<1x96xf32>, vector<1x96xf32>, vector<1x96xf32>, vector<1x96xf32>, vector<1x96xf32>, vector<1x96xf32>, vector<1x96xf32>, vector<1x96xf32> -> vector<16x96xf32>
    %1287 = tpu.concatenate %485, %490, %495, %500, %505, %510, %515, %520, %525, %530, %535, %540, %545, %550, %555, %560 in 0 : vector<1x96xf32>, vector<1x96xf32>, vector<1x96xf32>, vector<1x96xf32>, vector<1x96xf32>, vector<1x96xf32>, vector<1x96xf32>, vector<1x96xf32>, vector<1x96xf32>, vector<1x96xf32>, vector<1x96xf32>, vector<1x96xf32>, vector<1x96xf32>, vector<1x96xf32>, vector<1x96xf32>, vector<1x96xf32> -> vector<16x96xf32>
    %1288 = tpu.concatenate %565, %570, %575, %580, %585, %590, %595, %600, %605, %610, %615, %620, %625, %630, %635, %640 in 0 : vector<1x96xf32>, vector<1x96xf32>, vector<1x96xf32>, vector<1x96xf32>, vector<1x96xf32>, vector<1x96xf32>, vector<1x96xf32>, vector<1x96xf32>, vector<1x96xf32>, vector<1x96xf32>, vector<1x96xf32>, vector<1x96xf32>, vector<1x96xf32>, vector<1x96xf32>, vector<1x96xf32>, vector<1x96xf32> -> vector<16x96xf32>
    %1289 = tpu.concatenate %645, %650, %655, %660, %665, %670, %675, %680, %685, %690, %695, %700, %705, %710, %715, %720 in 0 : vector<1x96xf32>, vector<1x96xf32>, vector<1x96xf32>, vector<1x96xf32>, vector<1x96xf32>, vector<1x96xf32>, vector<1x96xf32>, vector<1x96xf32>, vector<1x96xf32>, vector<1x96xf32>, vector<1x96xf32>, vector<1x96xf32>, vector<1x96xf32>, vector<1x96xf32>, vector<1x96xf32>, vector<1x96xf32> -> vector<16x96xf32>
    %1290 = tpu.concatenate %725, %730, %735, %740, %745, %750, %755, %760, %765, %770, %775, %780, %785, %790, %795, %800 in 0 : vector<1x96xf32>, vector<1x96xf32>, vector<1x96xf32>, vector<1x96xf32>, vector<1x96xf32>, vector<1x96xf32>, vector<1x96xf32>, vector<1x96xf32>, vector<1x96xf32>, vector<1x96xf32>, vector<1x96xf32>, vector<1x96xf32>, vector<1x96xf32>, vector<1x96xf32>, vector<1x96xf32>, vector<1x96xf32> -> vector<16x96xf32>
    %1291 = tpu.concatenate %805, %810, %815, %820, %825, %830, %835, %840, %845, %850, %855, %860, %865, %870, %875, %880 in 0 : vector<1x96xf32>, vector<1x96xf32>, vector<1x96xf32>, vector<1x96xf32>, vector<1x96xf32>, vector<1x96xf32>, vector<1x96xf32>, vector<1x96xf32>, vector<1x96xf32>, vector<1x96xf32>, vector<1x96xf32>, vector<1x96xf32>, vector<1x96xf32>, vector<1x96xf32>, vector<1x96xf32>, vector<1x96xf32> -> vector<16x96xf32>
    %1292 = tpu.concatenate %885, %890, %895, %900, %905, %910, %915, %920, %925, %930, %935, %940, %945, %950, %955, %960 in 0 : vector<1x96xf32>, vector<1x96xf32>, vector<1x96xf32>, vector<1x96xf32>, vector<1x96xf32>, vector<1x96xf32>, vector<1x96xf32>, vector<1x96xf32>, vector<1x96xf32>, vector<1x96xf32>, vector<1x96xf32>, vector<1x96xf32>, vector<1x96xf32>, vector<1x96xf32>, vector<1x96xf32>, vector<1x96xf32> -> vector<16x96xf32>
    %1293 = tpu.concatenate %965, %970, %975, %980, %985, %990, %995, %1000, %1005, %1010, %1015, %1020, %1025, %1030, %1035, %1040 in 0 : vector<1x96xf32>, vector<1x96xf32>, vector<1x96xf32>, vector<1x96xf32>, vector<1x96xf32>, vector<1x96xf32>, vector<1x96xf32>, vector<1x96xf32>, vector<1x96xf32>, vector<1x96xf32>, vector<1x96xf32>, vector<1x96xf32>, vector<1x96xf32>, vector<1x96xf32>, vector<1x96xf32>, vector<1x96xf32> -> vector<16x96xf32>
    %1294 = tpu.concatenate %1045, %1050, %1055, %1060, %1065, %1070, %1075, %1080, %1085, %1090, %1095, %1100, %1105, %1110, %1115, %1120 in 0 : vector<1x96xf32>, vector<1x96xf32>, vector<1x96xf32>, vector<1x96xf32>, vector<1x96xf32>, vector<1x96xf32>, vector<1x96xf32>, vector<1x96xf32>, vector<1x96xf32>, vector<1x96xf32>, vector<1x96xf32>, vector<1x96xf32>, vector<1x96xf32>, vector<1x96xf32>, vector<1x96xf32>, vector<1x96xf32> -> vector<16x96xf32>
    %1295 = tpu.concatenate %1125, %1130, %1135, %1140, %1145, %1150, %1155, %1160, %1165, %1170, %1175, %1180, %1185, %1190, %1195, %1200 in 0 : vector<1x96xf32>, vector<1x96xf32>, vector<1x96xf32>, vector<1x96xf32>, vector<1x96xf32>, vector<1x96xf32>, vector<1x96xf32>, vector<1x96xf32>, vector<1x96xf32>, vector<1x96xf32>, vector<1x96xf32>, vector<1x96xf32>, vector<1x96xf32>, vector<1x96xf32>, vector<1x96xf32>, vector<1x96xf32> -> vector<16x96xf32>
    %1296 = tpu.concatenate %1205, %1210, %1215, %1220, %1225, %1230, %1235, %1240, %1245, %1250, %1255, %1260, %1265, %1270, %1275, %1280 in 0 : vector<1x96xf32>, vector<1x96xf32>, vector<1x96xf32>, vector<1x96xf32>, vector<1x96xf32>, vector<1x96xf32>, vector<1x96xf32>, vector<1x96xf32>, vector<1x96xf32>, vector<1x96xf32>, vector<1x96xf32>, vector<1x96xf32>, vector<1x96xf32>, vector<1x96xf32>, vector<1x96xf32>, vector<1x96xf32> -> vector<16x96xf32>
    %1297 = tpu.concatenate %1281, %1282, %1283, %1284, %1285, %1286, %1287, %1288, %1289, %1290, %1291, %1292, %1293, %1294, %1295, %1296 in 0 : vector<16x96xf32>, vector<16x96xf32>, vector<16x96xf32>, vector<16x96xf32>, vector<16x96xf32>, vector<16x96xf32>, vector<16x96xf32>, vector<16x96xf32>, vector<16x96xf32>, vector<16x96xf32>, vector<16x96xf32>, vector<16x96xf32>, vector<16x96xf32>, vector<16x96xf32>, vector<16x96xf32>, vector<16x96xf32> -> vector<256x96xf32>
    %c0_255 = arith.constant 0 : index
    %c0_256 = arith.constant 0 : index
    %1298 = vector.load %arg3[%c0_255, %c0_256] : memref<256x96xf32, #tpu.memory_space<vmem>>, vector<256x96xf32>
    tpu.vector_store %arg3[%c0_255, %c0_256], %1297 {strides = array<i32>} : memref<256x96xf32, #tpu.memory_space<vmem>>, vector<256x96xf32>,
    return
  }
  func.func @transform_0(%arg0: i32, %arg1: memref<768xi32, #tpu.memory_space<smem>>) -> (i32, i32) {
    %c0_i32 = arith.constant 0 : i32
    %c0_i32_0 = arith.constant 0 : i32
    %c0_i32_1 = arith.constant 0 : i32
    return %c0_i32, %c0_i32_0 : i32, i32
  }
  func.func @transform_1(%arg0: i32, %arg1: memref<768xi32, #tpu.memory_space<smem>>) -> (i32, i32) {
    %c0_i32 = arith.constant 0 : i32
    %c0_i32_0 = arith.constant 0 : i32
    return %arg0, %c0_i32 : i32, i32
  }
}

</mosaic_0001>

<bundles_post_ra>
// kernel: meta_brain_input_embedding.1
= control target key start
LH: loop header
LB: loop body
LE: loop exit
PB: predicated region body
PF: predicated region fallthrough
CT: control target
= control target key end

     0   :  { %s4468_s0 = inlined_call_operand.vmem [shape: s32[768], index: 0, kind: input, shape index: {}]   ;;  %s4469_s1 = inlined_call_operand.vmem [shape: f32[1000,96], index: 1, kind: input, shape index: {}]   ;;  %s4470_s2 = inlined_call_operand.vmem [shape: f32[600,96], index: 2, kind: output, shape index: {}]  }
   0x1   :  { %s7_s11 = sshll.u32 %s4468_s0, 4  ;;  %s8_s11 = int_to_ptr.vmem [resolvable:$true] %s7_s11 }
   0x2   :  { %s2760_s12 = scalar_lea.vmem %s8_s11, 96  ;;  %s2764_s13 = scalar_lea.vmem %s8_s11, 128 }
   0x3   :  { %p2761_p0 = scmp.ne.s32.totalorder %s8_s11, %s2760_s12  ;;  %p2765_p1 = scmp.lt.s32.totalorder %s8_s11, %s8_s11 }
   0x4   :  { %p2766_p2 = scmp.lt.s32.totalorder %s2764_s13, %s2760_s12 }
   0x6   :  { %p2767_p3 = por %p2766_p2, %p2765_p1 }
   0x8   :  { %p2768_p4 = pnand %p2767_p3, %p2761_p0 }
   0xa   :  { %2771 = shalt.err (!%p2768_p4)  }
   0xb   :  { %s2862_s14 = smov [#allocation3]  }
   0xc   :  { %10 = dma.vmem_to_smem %s8_s11, 96, %s2862_s14, [#allocation2] }
   0xd   :  { %2816 = dma.done.wait [#allocation2], 96 }
   0xe   :  { %2817 = vsyncadd [#allocation2], 4294967200 }
   0xf   :  { %12 = sfence }
  0x10   :  { %s2881_s15 = smov 0   ;;  %s2883_s16 = smov 0  }
  0x11   :  { %s2885_s17 = smov 0  }
  0x12 LB: > { %s2892_s0 = sadd.s32 4294967295, %s2828_s17   ;;  %s2894_s18 = sadd.s32 1, %s2828_s17   ;;  %s2828_s17 = sphi %s2885_s17, %s4479_s17   ;;  %s2824_s16 = sphi %s2883_s16, %s4478_s16   ;;  %s2820_s15 = sphi %s2881_s15, %s4477_s15  }
  0x13   : > { %s43_s19 = ssub.s32 %s2828_s17, %s2894_s18  ;;  %s46_s20 = sadd.s32 1, %s2824_s16 }
  0x14   : > { %p44_p5 = scmp.eq.s32.totalorder %s43_s19, 0  ;;  %p56_p6 = scmp.ne.s32.totalorder %s2824_s16, %s2820_s15 }
  0x15   : > { %p57_p7 = scmp.eq.s32.totalorder %s2892_s0, 2  ;;  %p2648_p8 = scmp.ge.s32.totalorder %s2828_s17, 1 }
  0x16   : > { %s2901_s21 = scalar_select %p44_p5, %s2824_s16, %s46_s20  }
  0x17   : > { %p2903_p9 = por %p57_p7, %p56_p6  ;;  %p84_p10 = scmp.lt.s32.totalorder %s2828_s17, 4 }
  0x19   : > { %p85_p11 = pnand %p2648_p8, %p84_p10 }
  0x1a   : > { %s95_s23 = sand.u32 (!%p85_p11), 1, %s2820_s15   ;;  %s2908_s24 = sshll.u32 (!%p85_p11), %s2892_s0, 8  ;;  %vm1169_vm0 = vcmask (!%p85_p11), 1040384   ;;  %vm1171_vm1 = vcmask (!%p85_p11), 1041408   ;;  %vm1173_vm2 = vcmask (!%p85_p11), 1042432   ;;  %vm1175_vm3 = vcmask (!%p85_p11), 1043456  }
  0x1b   : > { %88 = sbr.rel (%p85_p11) target bundleno = 477 (0x1dd), region = 24  ;;  %s2910_s25 = sshll.u32 (!%p85_p11), %s95_s23, 8  ;;  %vm1177_vm4 = vcmask (!%p85_p11), 1044480   ;;  %vm1179_vm5 = vcmask (!%p85_p11), 1045504   ;;  %vm1181_vm6 = vcmask (!%p85_p11), 1046528   ;;  %vm2030_vm7 = vcmask (!%p85_p11), 785408  }
  0x1c   : > { %s104_s26 = sld [smem:[#allocation3 + %s2908_s24]] (!%p85_p11)  ;;  %s107_s27 = sadd.s32 (!%p85_p11), 1, %s2908_s24 }
  0x1d   : > { %s108_s28 = sld [smem:[#allocation3 + %s107_s27]] (!%p85_p11)  ;;  %s111_s29 = sadd.s32 (!%p85_p11), 2, %s2908_s24 }
  0x1e   : > { %s112_s30 = sld [smem:[#allocation3 + %s111_s29]] (!%p85_p11)  ;;  %s115_s3 = sadd.s32 (!%p85_p11), 3, %s2908_s24 }
  0x1f   : > { %s116_s4 = sld [smem:[#allocation3 + %s115_s3]] (!%p85_p11)  ;;  %s119_s5 = sadd.s32 (!%p85_p11), 4, %s2908_s24 }
  0x20   : > { %s120_s6 = sld [smem:[#allocation3 + %s119_s5]] (!%p85_p11)  ;;  %s123_s7 = sadd.s32 (!%p85_p11), 5, %s2908_s24 }
  0x21   : > { %s124_s11 = sld [smem:[#allocation3 + %s123_s7]] (!%p85_p11)  ;;  %s127_s12 = sadd.s32 (!%p85_p11), 6, %s2908_s24 }
  0x22   : > { %s105_s10 = scalar_lea.vmem %s4469_s1, %s104_s26  ;;  %s131_s13 = sadd.s32 7, %s2908_s24 }
  0x23   : > { %s109_s17 = scalar_lea.vmem %s4469_s1, %s108_s28  ;;  %s2926_s19 = sld [smem:[#allocation3 + %s127_s12]]  ;;  %v106_v0 = vld [vmem:[%s105_s10] sm:$0x1] }
  0x24   : > { %v110_v1 = vld [vmem:[%s109_s17] sm:$0x1]  ;;  %s113_s27 = scalar_lea.vmem %s4469_s1, %s112_s30  ;;  %s2931_s29 = sld [smem:[#allocation3 + %s131_s13]] }
  0x25   : > { %v114_v2 = vld [vmem:[%s113_s27] sm:$0x1]  ;;  %s117_s5 = scalar_lea.vmem %s4469_s1, %s116_s4  ;;  %v1128_v3 = vrot.slane %v110_v1, 7  ;;  %s135_s28 = sadd.s32 8, %s2908_s24 }
  0x26   : > { %v118_v4 = vld [vmem:[%s117_s5] sm:$0x1]  ;;  %s121_s9 = scalar_lea.vmem %s4469_s1, %s120_s6  ;;  %v1131_v5 = vrot.slane %v114_v2, 6  ;;  %s2940_s30 = sld [smem:[#allocation3 + %s135_s28]] }
  0x27   : > { %v122_v6 = vld [vmem:[%s121_s9] sm:$0x1]  ;;  %s125_s13 = scalar_lea.vmem %s4469_s1, %s124_s11  ;;  %v1134_v7 = vrot.slane %v118_v4, 5  ;;  %v1170_v8 = vsel %vm1169_vm0, %v106_v0, %v1128_v3  ;;  %s139_s4 = sadd.s32 9, %s2908_s24 }
  0x28   : > { %v126_v9 = vld [vmem:[%s125_s13] sm:$0x1]  ;;  %v1137_v10 = vrot.slane %v122_v6, 4  ;;  %v1172_v11 = vsel %vm1171_vm1, %v1170_v8, %v1131_v5  ;;  %s2948_s6 = sld [smem:[#allocation3 + %s139_s4]]  ;;  %s143_s14 = sadd.s32 10, %s2908_s24 }
  0x29   : > { %s129_s11 = scalar_lea.vmem %s4469_s1, %s2926_s19  ;;  %v1140_v12 = vrot.slane %v126_v9, 3  ;;  %v1174_v13 = vsel %vm1173_vm2, %v1172_v11, %v1134_v7  ;;  %s144_s20 = sld [smem:[#allocation3 + %s143_s14]] }
  0x2a   : > { %v130_v14 = vld [vmem:[%s129_s11] sm:$0x1]  ;;  %s133_s26 = scalar_lea.vmem %s4469_s1, %s2931_s29  ;;  %v1176_v15 = vsel %vm1175_vm3, %v1174_v13, %v1137_v10  ;;  %s147_s3 = sadd.s32 11, %s2908_s24 }
  0x2b   : > { %v134_v16 = vld [vmem:[%s133_s26] sm:$0x1]  ;;  %v1143_v17 = vrot.slane %v130_v14, 2  ;;  %v1178_v18 = vsel %vm1177_vm4, %v1176_v15, %v1140_v12  ;;  %s148_s19 = sld [smem:[#allocation3 + %s147_s3]]  ;;  %s151_s5 = sadd.s32 12, %s2908_s24 }
  0x2c   : > { %v1146_v19 = vrot.slane %v134_v16, 1  ;;  %s137_s29 = scalar_lea.vmem %s4469_s1, %s2940_s30  ;;  %s152_s8 = sld [smem:[#allocation3 + %s151_s5]] }
  0x2d   : > { %v1180_v20 = vsel %vm1179_vm5, %v1178_v18, %v1143_v17  ;;  %s155_s9 = sadd.s32 13, %s2908_s24  ;;  %s159_s10 = sadd.s32 14, %s2908_s24  ;;  %v138_v22 = vld [vmem:[%s137_s29] sm:$0x1] }
  0x2e   : > { %v1182_v21 = vsel %vm1181_vm6, %v1180_v20, %v1146_v19  ;;  %s141_s4 = scalar_lea.vmem %s4469_s1, %s2948_s6  ;;  %s156_s14 = sld [smem:[#allocation3 + %s155_s9]] }
  0x2f   : > { %s2977_s15 = scalar_lea.vmem [#allocation4], %s2910_s25   ;;  %v142_v23 = vld [vmem:[%s141_s4] sm:$0x1]  ;;  %s145_s11 = scalar_lea.vmem %s4469_s1, %s144_s20 }
  0x30   : > { %2031 = vst.msk [vmem:[%s2977_s15] sm:$0xff] %vm2030_vm7, %v1182_v21  ;;  %s160_s23 = sld [smem:[#allocation3 + %s159_s10]]  ;;  %v146_v24 = vld [vmem:[%s145_s11] sm:$0x1]  ;;  %s163_s27 = sadd.s32 15, %s2908_s24  ;;  %v1149_v25 = vrot.slane %v142_v23, 7 }
  0x31   : > { %s167_s26 = sadd.s32 16, %s2908_s24  ;;  %s149_s25 = scalar_lea.vmem %s4469_s1, %s148_s19  ;;  %v1152_v26 = vrot.slane %v146_v24, 6 }
  0x32   : > { %s164_s5 = sld [smem:[#allocation3 + %s163_s27]]  ;;  %v150_v27 = vld [vmem:[%s149_s25] sm:$0x1]  ;;  %s153_s29 = scalar_lea.vmem %s4469_s1, %s152_s8  ;;  %v1183_v28 = vsel %vm1169_vm0, %v138_v22, %v1149_v25 }
  0x33   : > { %s2993_s20 = sld [smem:[#allocation3 + %s167_s26]]  ;;  %v154_v29 = vld [vmem:[%s153_s29] sm:$0x1]  ;;  %v1155_v30 = vrot.slane %v150_v27, 5  ;;  %v1184_v31 = vsel %vm1171_vm1, %v1183_v28, %v1152_v26  ;;  %s171_s9 = sadd.s32 17, %s2908_s24 }
  0x34   : > { %s175_s10 = sadd.s32 18, %s2908_s24  ;;  %s157_s13 = scalar_lea.vmem %s4469_s1, %s156_s14  ;;  %v1158_v32 = vrot.slane %v154_v29, 4 }
  0x35   : > { %s172_s4 = sld [smem:[#allocation3 + %s171_s9]]  ;;  %v158_v33 = vld [vmem:[%s157_s13] sm:$0x1]  ;;  %v1185_v34 = vsel %vm1173_vm2, %v1184_v31, %v1155_v30  ;;  %s179_s27 = sadd.s32 19, %s2908_s24 }
  0x36   : > { %s161_s17 = scalar_lea.vmem %s4469_s1, %s160_s23  ;;  %s176_s11 = sld [smem:[#allocation3 + %s175_s10]]  ;;  %v1161_v36 = vrot.slane %v158_v33, 3  ;;  %v1186_v37 = vsel %vm1175_vm3, %v1185_v34, %v1158_v32 }
  0x37   : > { %v162_v35 = vld [vmem:[%s161_s17] sm:$0x1]  ;;  %s183_s26 = sadd.s32 20, %s2908_s24  ;;  %s180_s25 = sld [smem:[#allocation3 + %s179_s27]] }
  0x38   : > { %s165_s3 = scalar_lea.vmem %s4469_s1, %s164_s5  ;;  %v1164_v38 = vrot.slane %v162_v35, 2  ;;  %v1187_v40 = vsel %vm1177_vm4, %v1186_v37, %v1161_v36  ;;  %s184_s29 = sld [smem:[#allocation3 + %s183_s26]] }
  0x39   : > { %v166_v39 = vld [vmem:[%s165_s3] sm:$0x1]  ;;  %s169_s7 = scalar_lea.vmem %s4469_s1, %s2993_s20  ;;  %s187_s9 = sadd.s32 21, %s2908_s24 }
  0x3a   : > { %v1167_v41 = vrot.slane %v166_v39, 1  ;;  %v1188_v42 = vsel %vm1179_vm5, %v1187_v40, %v1164_v38  ;;  %s191_s10 = sadd.s32 22, %s2908_s24  ;;  %s188_s13 = sld [smem:[#allocation3 + %s187_s9]]  ;;  %v170_v44 = vld [vmem:[%s169_s7] sm:$0x1] }
  0x3b   : > { %s173_s12 = scalar_lea.vmem %s4469_s1, %s172_s4  ;;  %s192_s17 = sld [smem:[#allocation3 + %s191_s10]] }
  0x3c   : > { %v1189_v43 = vsel %vm1181_vm6, %v1188_v42, %v1167_v41  ;;  %v174_v45 = vld [vmem:[%s173_s12] sm:$0x1]  ;;  %s177_s20 = scalar_lea.vmem %s4469_s1, %s176_s11  ;;  %s195_s27 = sadd.s32 23, %s2908_s24 }
  0x3d   : > { %2032 = vst.msk [vmem:[%s2977_s15 + $0x8] sm:$0xff] %vm2030_vm7, %v1189_v43  ;;  %v178_v46 = vld [vmem:[%s177_s20] sm:$0x1]  ;;  %v1191_v47 = vrot.slane %v174_v45, 7  ;;  %s199_s26 = sadd.s32 24, %s2908_s24  ;;  %s181_s6 = scalar_lea.vmem %s4469_s1, %s180_s25 }
  0x3e   : > { %s196_s3 = sld [smem:[#allocation3 + %s195_s27]]  ;;  %v1194_v48 = vrot.slane %v178_v46, 6  ;;  %v182_v49 = vld [vmem:[%s181_s6] sm:$0x1]  ;;  %s185_s11 = scalar_lea.vmem %s4469_s1, %s184_s29 }
  0x3f   : > { %v1232_v50 = vsel %vm1169_vm0, %v170_v44, %v1191_v47  ;;  %s3037_s7 = sld [smem:[#allocation3 + %s199_s26]]  ;;  %v186_v51 = vld [vmem:[%s185_s11] sm:$0x1]  ;;  %v1197_v52 = vrot.slane %v182_v49, 5  ;;  %s203_s9 = sadd.s32 25, %s2908_s24 }
  0x40   : > { %v1233_v53 = vsel %vm1171_vm1, %v1232_v50, %v1194_v48  ;;  %s207_s10 = sadd.s32 26, %s2908_s24  ;;  %s189_s5 = scalar_lea.vmem %s4469_s1, %s188_s13  ;;  %v1200_v54 = vrot.slane %v186_v51, 4 }
  0x41   : > { %s204_s12 = sld [smem:[#allocation3 + %s203_s9]]  ;;  %v190_v55 = vld [vmem:[%s189_s5] sm:$0x1]  ;;  %s193_s30 = scalar_lea.vmem %s4469_s1, %s192_s17  ;;  %v1234_v56 = vsel %vm1173_vm2, %v1233_v53, %v1197_v52 }
  0x42   : > { %s208_s20 = sld [smem:[#allocation3 + %s207_s10]]  ;;  %v194_v57 = vld [vmem:[%s193_s30] sm:$0x1]  ;;  %v1203_v58 = vrot.slane %v190_v55, 3  ;;  %v1235_v59 = vsel %vm1175_vm3, %v1234_v56, %v1200_v54  ;;  %s211_s27 = sadd.s32 27, %s2908_s24 }
  0x43   : > { %s215_s26 = sadd.s32 28, %s2908_s24  ;;  %v1206_v60 = vrot.slane %v194_v57, 2  ;;  %s212_s6 = sld [smem:[#allocation3 + %s211_s27]] }
  0x44   : > { %s197_s4 = scalar_lea.vmem %s4469_s1, %s196_s3  ;;  %v1236_v62 = vsel %vm1177_vm4, %v1235_v59, %v1203_v58  ;;  %s216_s11 = sld [smem:[#allocation3 + %s215_s26]] }
  0x45   : > { %v198_v61 = vld [vmem:[%s197_s4] sm:$0x1]  ;;  %s201_s28 = scalar_lea.vmem %s4469_s1, %s3037_s7  ;;  %v1237_v0 = vsel %vm1179_vm5, %v1236_v62, %v1206_v60  ;;  %s219_s9 = sadd.s32 29, %s2908_s24 }
  0x46   : > { %v1209_v63 = vrot.slane %v198_v61, 1  ;;  %s223_s10 = sadd.s32 30, %s2908_s24  ;;  %s220_s5 = sld [smem:[#allocation3 + %s219_s9]]  ;;  %v202_v2 = vld [vmem:[%s201_s28] sm:$0x1] }
  0x47   : > { %s205_s19 = scalar_lea.vmem %s4469_s1, %s204_s12  ;;  %s224_s30 = sld [smem:[#allocation3 + %s223_s10]] }
  0x48   : > { %v1238_v1 = vsel %vm1181_vm6, %v1237_v0, %v1209_v63  ;;  %v206_v3 = vld [vmem:[%s205_s19] sm:$0x1]  ;;  %s209_s7 = scalar_lea.vmem %s4469_s1, %s208_s20  ;;  %s227_s27 = sadd.s32 31, %s2908_s24 }
  0x49   : > { %2033 = vst.msk [vmem:[%s2977_s15 + $0x10] sm:$0xff] %vm2030_vm7, %v1238_v1  ;;  %v210_v4 = vld [vmem:[%s209_s7] sm:$0x1]  ;;  %v1212_v5 = vrot.slane %v206_v3, 7  ;;  %s231_s26 = sadd.s32 32, %s2908_s24  ;;  %s213_s14 = scalar_lea.vmem %s4469_s1, %s212_s6 }
  0x4a   : > { %s228_s4 = sld [smem:[#allocation3 + %s227_s27]]  ;;  %v1215_v6 = vrot.slane %v210_v4, 6  ;;  %v214_v7 = vld [vmem:[%s213_s14] sm:$0x1]  ;;  %s217_s20 = scalar_lea.vmem %s4469_s1, %s216_s11 }
  0x4b   : > { %v1239_v8 = vsel %vm1169_vm0, %v202_v2, %v1212_v5  ;;  %s3081_s28 = sld [smem:[#allocation3 + %s231_s26]]  ;;  %v218_v9 = vld [vmem:[%s217_s20] sm:$0x1]  ;;  %v1218_v10 = vrot.slane %v214_v7, 5  ;;  %s235_s9 = sadd.s32 33, %s2908_s24 }
  0x4c   : > { %v1240_v11 = vsel %vm1171_vm1, %v1239_v8, %v1215_v6  ;;  %s239_s10 = sadd.s32 34, %s2908_s24  ;;  %s221_s3 = scalar_lea.vmem %s4469_s1, %s220_s5  ;;  %v1221_v12 = vrot.slane %v218_v9, 4 }
  0x4d   : > { %s236_s19 = sld [smem:[#allocation3 + %s235_s9]]  ;;  %v222_v13 = vld [vmem:[%s221_s3] sm:$0x1]  ;;  %s225_s8 = scalar_lea.vmem %s4469_s1, %s224_s30  ;;  %v1241_v14 = vsel %vm1173_vm2, %v1240_v11, %v1218_v10 }
  0x4e   : > { %s240_s7 = sld [smem:[#allocation3 + %s239_s10]]  ;;  %v226_v15 = vld [vmem:[%s225_s8] sm:$0x1]  ;;  %v1224_v16 = vrot.slane %v222_v13, 3  ;;  %v1242_v17 = vsel %vm1175_vm3, %v1241_v14, %v1221_v12  ;;  %s243_s27 = sadd.s32 35, %s2908_s24 }
  0x4f   : > { %s247_s26 = sadd.s32 36, %s2908_s24  ;;  %v1227_v18 = vrot.slane %v226_v15, 2  ;;  %s244_s14 = sld [smem:[#allocation3 + %s243_s27]] }
  0x50   : > { %s229_s12 = scalar_lea.vmem %s4469_s1, %s228_s4  ;;  %v1243_v20 = vsel %vm1177_vm4, %v1242_v17, %v1224_v16  ;;  %s248_s20 = sld [smem:[#allocation3 + %s247_s26]] }
  0x51   : > { %v230_v19 = vld [vmem:[%s229_s12] sm:$0x1]  ;;  %s233_s23 = scalar_lea.vmem %s4469_s1, %s3081_s28  ;;  %v1244_v22 = vsel %vm1179_vm5, %v1243_v20, %v1227_v18  ;;  %s251_s9 = sadd.s32 37, %s2908_s24 }
  0x52   : > { %v1230_v21 = vrot.slane %v230_v19, 1  ;;  %s255_s10 = sadd.s32 38, %s2908_s24  ;;  %s252_s3 = sld [smem:[#allocation3 + %s251_s9]]  ;;  %v234_v24 = vld [vmem:[%s233_s23] sm:$0x1] }
  0x53   : > { %s237_s25 = scalar_lea.vmem %s4469_s1, %s236_s19  ;;  %s256_s8 = sld [smem:[#allocation3 + %s255_s10]] }
  0x54   : > { %v1245_v23 = vsel %vm1181_vm6, %v1244_v22, %v1230_v21  ;;  %v238_v25 = vld [vmem:[%s237_s25] sm:$0x1]  ;;  %s241_s28 = scalar_lea.vmem %s4469_s1, %s240_s7  ;;  %s259_s27 = sadd.s32 39, %s2908_s24 }
  0x55   : > { %2034 = vst.msk [vmem:[%s2977_s15 + $0x18] sm:$0xff] %vm2030_vm7, %v1245_v23  ;;  %v242_v26 = vld [vmem:[%s241_s28] sm:$0x1]  ;;  %v1247_v27 = vrot.slane %v238_v25, 7  ;;  %s263_s26 = sadd.s32 40, %s2908_s24  ;;  %s245_s13 = scalar_lea.vmem %s4469_s1, %s244_s14 }
  0x56   : > { %s260_s12 = sld [smem:[#allocation3 + %s259_s27]]  ;;  %v1250_v28 = vrot.slane %v242_v26, 6  ;;  %v246_v29 = vld [vmem:[%s245_s13] sm:$0x1]  ;;  %s249_s7 = scalar_lea.vmem %s4469_s1, %s248_s20 }
  0x57   : > { %v1288_v30 = vsel %vm1169_vm0, %v234_v24, %v1247_v27  ;;  %s3125_s23 = sld [smem:[#allocation3 + %s263_s26]]  ;;  %v250_v31 = vld [vmem:[%s249_s7] sm:$0x1]  ;;  %v1253_v32 = vrot.slane %v246_v29, 5  ;;  %s267_s9 = sadd.s32 41, %s2908_s24 }
  0x58   : > { %v1289_v33 = vsel %vm1171_vm1, %v1288_v30, %v1250_v28  ;;  %s271_s10 = sadd.s32 42, %s2908_s24  ;;  %s253_s4 = scalar_lea.vmem %s4469_s1, %s252_s3  ;;  %v1256_v34 = vrot.slane %v250_v31, 4 }
  0x59   : > { %s268_s25 = sld [smem:[#allocation3 + %s267_s9]]  ;;  %v254_v35 = vld [vmem:[%s253_s4] sm:$0x1]  ;;  %s257_s29 = scalar_lea.vmem %s4469_s1, %s256_s8  ;;  %v1290_v36 = vsel %vm1173_vm2, %v1289_v33, %v1253_v32 }
  0x5a   : > { %s272_s28 = sld [smem:[#allocation3 + %s271_s10]]  ;;  %v258_v37 = vld [vmem:[%s257_s29] sm:$0x1]  ;;  %v1259_v38 = vrot.slane %v254_v35, 3  ;;  %v1291_v39 = vsel %vm1175_vm3, %v1290_v36, %v1256_v34  ;;  %s275_s27 = sadd.s32 43, %s2908_s24 }
  0x5b   : > { %s279_s26 = sadd.s32 44, %s2908_s24  ;;  %v1262_v40 = vrot.slane %v258_v37, 2  ;;  %s276_s13 = sld [smem:[#allocation3 + %s275_s27]] }
  0x5c   : > { %s261_s19 = scalar_lea.vmem %s4469_s1, %s260_s12  ;;  %v1292_v42 = vsel %vm1177_vm4, %v1291_v39, %v1259_v38  ;;  %s280_s7 = sld [smem:[#allocation3 + %s279_s26]] }
  0x5d   : > { %v262_v41 = vld [vmem:[%s261_s19] sm:$0x1]  ;;  %s265_s17 = scalar_lea.vmem %s4469_s1, %s3125_s23  ;;  %v1293_v44 = vsel %vm1179_vm5, %v1292_v42, %v1262_v40  ;;  %s283_s9 = sadd.s32 45, %s2908_s24 }
  0x5e   : > { %v1265_v43 = vrot.slane %v262_v41, 1  ;;  %s287_s10 = sadd.s32 46, %s2908_s24  ;;  %s284_s4 = sld [smem:[#allocation3 + %s283_s9]]  ;;  %v266_v46 = vld [vmem:[%s265_s17] sm:$0x1] }
  0x5f   : > { %s269_s6 = scalar_lea.vmem %s4469_s1, %s268_s25  ;;  %s288_s29 = sld [smem:[#allocation3 + %s287_s10]] }
  0x60   : > { %v1294_v45 = vsel %vm1181_vm6, %v1293_v44, %v1265_v43  ;;  %v270_v47 = vld [vmem:[%s269_s6] sm:$0x1]  ;;  %s273_s23 = scalar_lea.vmem %s4469_s1, %s272_s28  ;;  %s291_s27 = sadd.s32 47, %s2908_s24 }
  0x61   : > { %2035 = vst.msk [vmem:[%s2977_s15 + $0x20] sm:$0xff] %vm2030_vm7, %v1294_v45  ;;  %v274_v48 = vld [vmem:[%s273_s23] sm:$0x1]  ;;  %v1268_v49 = vrot.slane %v270_v47, 7  ;;  %s295_s26 = sadd.s32 48, %s2908_s24  ;;  %s277_s5 = scalar_lea.vmem %s4469_s1, %s276_s13 }
  0x62   : > { %s292_s19 = sld [smem:[#allocation3 + %s291_s27]]  ;;  %v1271_v50 = vrot.slane %v274_v48, 6  ;;  %v278_v51 = vld [vmem:[%s277_s5] sm:$0x1]  ;;  %s281_s28 = scalar_lea.vmem %s4469_s1, %s280_s7 }
  0x63   : > { %v1295_v52 = vsel %vm1169_vm0, %v266_v46, %v1268_v49  ;;  %s3169_s17 = sld [smem:[#allocation3 + %s295_s26]]  ;;  %v282_v53 = vld [vmem:[%s281_s28] sm:$0x1]  ;;  %v1274_v54 = vrot.slane %v278_v51, 5  ;;  %s299_s9 = sadd.s32 49, %s2908_s24 }
  0x64   : > { %v1296_v55 = vsel %vm1171_vm1, %v1295_v52, %v1271_v50  ;;  %s303_s10 = sadd.s32 50, %s2908_s24  ;;  %s285_s12 = scalar_lea.vmem %s4469_s1, %s284_s4  ;;  %v1277_v56 = vrot.slane %v282_v53, 4 }
  0x65   : > { %s300_s6 = sld [smem:[#allocation3 + %s299_s9]]  ;;  %v286_v57 = vld [vmem:[%s285_s12] sm:$0x1]  ;;  %s289_s11 = scalar_lea.vmem %s4469_s1, %s288_s29  ;;  %v1297_v58 = vsel %vm1173_vm2, %v1296_v55, %v1274_v54 }
  0x66   : > { %s304_s23 = sld [smem:[#allocation3 + %s303_s10]]  ;;  %v290_v59 = vld [vmem:[%s289_s11] sm:$0x1]  ;;  %v1280_v60 = vrot.slane %v286_v57, 3  ;;  %v1298_v61 = vsel %vm1175_vm3, %v1297_v58, %v1277_v56  ;;  %s307_s27 = sadd.s32 51, %s2908_s24 }
  0x67   : > { %s311_s26 = sadd.s32 52, %s2908_s24  ;;  %v1283_v62 = vrot.slane %v290_v59, 2  ;;  %s308_s5 = sld [smem:[#allocation3 + %s307_s27]] }
  0x68   : > { %s293_s25 = scalar_lea.vmem %s4469_s1, %s292_s19  ;;  %v1299_v0 = vsel %vm1177_vm4, %v1298_v61, %v1280_v60  ;;  %s312_s28 = sld [smem:[#allocation3 + %s311_s26]] }
  0x69   : > { %v294_v63 = vld [vmem:[%s293_s25] sm:$0x1]  ;;  %s297_s30 = scalar_lea.vmem %s4469_s1, %s3169_s17  ;;  %v1300_v2 = vsel %vm1179_vm5, %v1299_v0, %v1283_v62  ;;  %s315_s9 = sadd.s32 53, %s2908_s24 }
  0x6a   : > { %v1286_v1 = vrot.slane %v294_v63, 1  ;;  %s319_s10 = sadd.s32 54, %s2908_s24  ;;  %s316_s12 = sld [smem:[#allocation3 + %s315_s9]]  ;;  %v298_v4 = vld [vmem:[%s297_s30] sm:$0x1] }
  0x6b   : > { %s301_s14 = scalar_lea.vmem %s4469_s1, %s300_s6  ;;  %s320_s11 = sld [smem:[#allocation3 + %s319_s10]] }
  0x6c   : > { %v1301_v3 = vsel %vm1181_vm6, %v1300_v2, %v1286_v1  ;;  %v302_v5 = vld [vmem:[%s301_s14] sm:$0x1]  ;;  %s305_s17 = scalar_lea.vmem %s4469_s1, %s304_s23  ;;  %s323_s27 = sadd.s32 55, %s2908_s24 }
  0x6d   : > { %2036 = vst.msk [vmem:[%s2977_s15 + $0x28] sm:$0xff] %vm2030_vm7, %v1301_v3  ;;  %v306_v6 = vld [vmem:[%s305_s17] sm:$0x1]  ;;  %v1303_v7 = vrot.slane %v302_v5, 7  ;;  %s327_s26 = sadd.s32 56, %s2908_s24  ;;  %s309_s3 = scalar_lea.vmem %s4469_s1, %s308_s5 }
  0x6e   : > { %s324_s25 = sld [smem:[#allocation3 + %s323_s27]]  ;;  %v1306_v8 = vrot.slane %v306_v6, 6  ;;  %v310_v9 = vld [vmem:[%s309_s3] sm:$0x1]  ;;  %s313_s23 = scalar_lea.vmem %s4469_s1, %s312_s28 }
  0x6f   : > { %v1344_v10 = vsel %vm1169_vm0, %v298_v4, %v1303_v7  ;;  %s3213_s30 = sld [smem:[#allocation3 + %s327_s26]]  ;;  %v314_v11 = vld [vmem:[%s313_s23] sm:$0x1]  ;;  %v1309_v12 = vrot.slane %v310_v9, 5  ;;  %s331_s9 = sadd.s32 57, %s2908_s24 }
  0x70   : > { %v1345_v13 = vsel %vm1171_vm1, %v1344_v10, %v1306_v8  ;;  %s335_s10 = sadd.s32 58, %s2908_s24  ;;  %s317_s19 = scalar_lea.vmem %s4469_s1, %s316_s12  ;;  %v1312_v14 = vrot.slane %v314_v11, 4 }
  0x71   : > { %s332_s14 = sld [smem:[#allocation3 + %s331_s9]]  ;;  %v318_v15 = vld [vmem:[%s317_s19] sm:$0x1]  ;;  %s321_s20 = scalar_lea.vmem %s4469_s1, %s320_s11  ;;  %v1346_v16 = vsel %vm1173_vm2, %v1345_v13, %v1309_v12 }
  0x72   : > { %s336_s17 = sld [smem:[#allocation3 + %s335_s10]]  ;;  %v322_v17 = vld [vmem:[%s321_s20] sm:$0x1]  ;;  %v1315_v18 = vrot.slane %v318_v15, 3  ;;  %v1347_v19 = vsel %vm1175_vm3, %v1346_v16, %v1312_v14  ;;  %s339_s27 = sadd.s32 59, %s2908_s24 }
  0x73   : > { %s343_s26 = sadd.s32 60, %s2908_s24  ;;  %v1318_v20 = vrot.slane %v322_v17, 2  ;;  %s340_s3 = sld [smem:[#allocation3 + %s339_s27]] }
  0x74   : > { %s325_s6 = scalar_lea.vmem %s4469_s1, %s324_s25  ;;  %v1348_v22 = vsel %vm1177_vm4, %v1347_v19, %v1315_v18  ;;  %s344_s23 = sld [smem:[#allocation3 + %s343_s26]] }
  0x75   : > { %v326_v21 = vld [vmem:[%s325_s6] sm:$0x1]  ;;  %s329_s8 = scalar_lea.vmem %s4469_s1, %s3213_s30  ;;  %v1349_v24 = vsel %vm1179_vm5, %v1348_v22, %v1318_v20  ;;  %s347_s9 = sadd.s32 61, %s2908_s24 }
  0x76   : > { %v1321_v23 = vrot.slane %v326_v21, 1  ;;  %s351_s10 = sadd.s32 62, %s2908_s24  ;;  %s348_s19 = sld [smem:[#allocation3 + %s347_s9]]  ;;  %v330_v26 = vld [vmem:[%s329_s8] sm:$0x1] }
  0x77   : > { %s333_s13 = scalar_lea.vmem %s4469_s1, %s332_s14  ;;  %s352_s20 = sld [smem:[#allocation3 + %s351_s10]] }
  0x78   : > { %v1350_v25 = vsel %vm1181_vm6, %v1349_v24, %v1321_v23  ;;  %v334_v27 = vld [vmem:[%s333_s13] sm:$0x1]  ;;  %s337_s30 = scalar_lea.vmem %s4469_s1, %s336_s17  ;;  %s355_s27 = sadd.s32 63, %s2908_s24 }
  0x79   : > { %2037 = vst.msk [vmem:[%s2977_s15 + $0x30] sm:$0xff] %vm2030_vm7, %v1350_v25  ;;  %v338_v28 = vld [vmem:[%s337_s30] sm:$0x1]  ;;  %v1324_v29 = vrot.slane %v334_v27, 7  ;;  %s359_s26 = sadd.s32 64, %s2908_s24  ;;  %s341_s4 = scalar_lea.vmem %s4469_s1, %s340_s3 }
  0x7a   : > { %s356_s6 = sld [smem:[#allocation3 + %s355_s27]]  ;;  %v1327_v30 = vrot.slane %v338_v28, 6  ;;  %v342_v31 = vld [vmem:[%s341_s4] sm:$0x1]  ;;  %s345_s17 = scalar_lea.vmem %s4469_s1, %s344_s23 }
  0x7b   : > { %v1351_v32 = vsel %vm1169_vm0, %v330_v26, %v1324_v29  ;;  %s3257_s8 = sld [smem:[#allocation3 + %s359_s26]]  ;;  %v346_v33 = vld [vmem:[%s345_s17] sm:$0x1]  ;;  %v1330_v34 = vrot.slane %v342_v31, 5  ;;  %s363_s9 = sadd.s32 65, %s2908_s24 }
  0x7c   : > { %v1352_v35 = vsel %vm1171_vm1, %v1351_v32, %v1327_v30  ;;  %s367_s10 = sadd.s32 66, %s2908_s24  ;;  %s349_s25 = scalar_lea.vmem %s4469_s1, %s348_s19  ;;  %v1333_v36 = vrot.slane %v346_v33, 4 }
  0x7d   : > { %s364_s13 = sld [smem:[#allocation3 + %s363_s9]]  ;;  %v350_v37 = vld [vmem:[%s349_s25] sm:$0x1]  ;;  %s353_s7 = scalar_lea.vmem %s4469_s1, %s352_s20  ;;  %v1353_v38 = vsel %vm1173_vm2, %v1352_v35, %v1330_v34 }
  0x7e   : > { %s368_s30 = sld [smem:[#allocation3 + %s367_s10]]  ;;  %v354_v39 = vld [vmem:[%s353_s7] sm:$0x1]  ;;  %v1336_v40 = vrot.slane %v350_v37, 3  ;;  %v1354_v41 = vsel %vm1175_vm3, %v1353_v38, %v1333_v36  ;;  %s371_s27 = sadd.s32 67, %s2908_s24 }
  0x7f   : > { %s375_s26 = sadd.s32 68, %s2908_s24  ;;  %v1339_v42 = vrot.slane %v354_v39, 2  ;;  %s372_s4 = sld [smem:[#allocation3 + %s371_s27]] }
  0x80   : > { %s357_s14 = scalar_lea.vmem %s4469_s1, %s356_s6  ;;  %v1355_v44 = vsel %vm1177_vm4, %v1354_v41, %v1336_v40  ;;  %s376_s17 = sld [smem:[#allocation3 + %s375_s26]] }
  0x81   : > { %v358_v43 = vld [vmem:[%s357_s14] sm:$0x1]  ;;  %s361_s29 = scalar_lea.vmem %s4469_s1, %s3257_s8  ;;  %v1356_v46 = vsel %vm1179_vm5, %v1355_v44, %v1339_v42  ;;  %s379_s9 = sadd.s32 69, %s2908_s24 }
  0x82   : > { %v1342_v45 = vrot.slane %v358_v43, 1  ;;  %s383_s10 = sadd.s32 70, %s2908_s24  ;;  %s380_s25 = sld [smem:[#allocation3 + %s379_s9]]  ;;  %v362_v48 = vld [vmem:[%s361_s29] sm:$0x1] }
  0x83   : > { %s365_s5 = scalar_lea.vmem %s4469_s1, %s364_s13  ;;  %s384_s7 = sld [smem:[#allocation3 + %s383_s10]] }
  0x84   : > { %v1357_v47 = vsel %vm1181_vm6, %v1356_v46, %v1342_v45  ;;  %v366_v49 = vld [vmem:[%s365_s5] sm:$0x1]  ;;  %s369_s8 = scalar_lea.vmem %s4469_s1, %s368_s30  ;;  %s387_s27 = sadd.s32 71, %s2908_s24 }
  0x85   : > { %2038 = vst.msk [vmem:[%s2977_s15 + $0x38] sm:$0xff] %vm2030_vm7, %v1357_v47  ;;  %v370_v50 = vld [vmem:[%s369_s8] sm:$0x1]  ;;  %v1359_v51 = vrot.slane %v366_v49, 7  ;;  %s391_s26 = sadd.s32 72, %s2908_s24  ;;  %s373_s12 = scalar_lea.vmem %s4469_s1, %s372_s4 }
  0x86   : > { %s388_s14 = sld [smem:[#allocation3 + %s387_s27]]  ;;  %v1362_v52 = vrot.slane %v370_v50, 6  ;;  %v374_v53 = vld [vmem:[%s373_s12] sm:$0x1]  ;;  %s377_s30 = scalar_lea.vmem %s4469_s1, %s376_s17 }
  0x87   : > { %v1400_v54 = vsel %vm1169_vm0, %v362_v48, %v1359_v51  ;;  %s3301_s29 = sld [smem:[#allocation3 + %s391_s26]]  ;;  %v378_v55 = vld [vmem:[%s377_s30] sm:$0x1]  ;;  %v1365_v56 = vrot.slane %v374_v53, 5  ;;  %s395_s9 = sadd.s32 73, %s2908_s24 }
  0x88   : > { %v1401_v57 = vsel %vm1171_vm1, %v1400_v54, %v1362_v52  ;;  %s399_s10 = sadd.s32 74, %s2908_s24  ;;  %s381_s6 = scalar_lea.vmem %s4469_s1, %s380_s25  ;;  %v1368_v58 = vrot.slane %v378_v55, 4 }
  0x89   : > { %s396_s5 = sld [smem:[#allocation3 + %s395_s9]]  ;;  %v382_v59 = vld [vmem:[%s381_s6] sm:$0x1]  ;;  %s385_s28 = scalar_lea.vmem %s4469_s1, %s384_s7  ;;  %v1402_v60 = vsel %vm1173_vm2, %v1401_v57, %v1365_v56 }
  0x8a   : > { %s400_s8 = sld [smem:[#allocation3 + %s399_s10]]  ;;  %v386_v61 = vld [vmem:[%s385_s28] sm:$0x1]  ;;  %v1371_v62 = vrot.slane %v382_v59, 3  ;;  %v1403_v63 = vsel %vm1175_vm3, %v1402_v60, %v1368_v58  ;;  %s403_s27 = sadd.s32 75, %s2908_s24 }
  0x8b   : > { %s407_s26 = sadd.s32 76, %s2908_s24  ;;  %v1374_v0 = vrot.slane %v386_v61, 2  ;;  %s404_s12 = sld [smem:[#allocation3 + %s403_s27]] }
  0x8c   : > { %s389_s13 = scalar_lea.vmem %s4469_s1, %s388_s14  ;;  %v1404_v2 = vsel %vm1177_vm4, %v1403_v63, %v1371_v62  ;;  %s408_s30 = sld [smem:[#allocation3 + %s407_s26]] }
  0x8d   : > { %v390_v1 = vld [vmem:[%s389_s13] sm:$0x1]  ;;  %s393_s11 = scalar_lea.vmem %s4469_s1, %s3301_s29  ;;  %v1405_v4 = vsel %vm1179_vm5, %v1404_v2, %v1374_v0  ;;  %s411_s9 = sadd.s32 77, %s2908_s24 }
  0x8e   : > { %v1377_v3 = vrot.slane %v390_v1, 1  ;;  %s415_s10 = sadd.s32 78, %s2908_s24  ;;  %s412_s6 = sld [smem:[#allocation3 + %s411_s9]]  ;;  %v394_v6 = vld [vmem:[%s393_s11] sm:$0x1] }
  0x8f   : > { %s397_s3 = scalar_lea.vmem %s4469_s1, %s396_s5  ;;  %s416_s28 = sld [smem:[#allocation3 + %s415_s10]] }
  0x90   : > { %v1406_v5 = vsel %vm1181_vm6, %v1405_v4, %v1377_v3  ;;  %v398_v7 = vld [vmem:[%s397_s3] sm:$0x1]  ;;  %s401_s29 = scalar_lea.vmem %s4469_s1, %s400_s8  ;;  %s419_s27 = sadd.s32 79, %s2908_s24 }
  0x91   : > { %2039 = vst.msk [vmem:[%s2977_s15 + $0x40] sm:$0xff] %vm2030_vm7, %v1406_v5  ;;  %v402_v8 = vld [vmem:[%s401_s29] sm:$0x1]  ;;  %v1380_v9 = vrot.slane %v398_v7, 7  ;;  %s423_s26 = sadd.s32 80, %s2908_s24  ;;  %s405_s19 = scalar_lea.vmem %s4469_s1, %s404_s12 }
  0x92   : > { %s420_s13 = sld [smem:[#allocation3 + %s419_s27]]  ;;  %v1383_v10 = vrot.slane %v402_v8, 6  ;;  %v406_v11 = vld [vmem:[%s405_s19] sm:$0x1]  ;;  %s409_s8 = scalar_lea.vmem %s4469_s1, %s408_s30 }
  0x93   : > { %v1407_v12 = vsel %vm1169_vm0, %v394_v6, %v1380_v9  ;;  %s3345_s11 = sld [smem:[#allocation3 + %s423_s26]]  ;;  %v410_v13 = vld [vmem:[%s409_s8] sm:$0x1]  ;;  %v1386_v14 = vrot.slane %v406_v11, 5  ;;  %s427_s9 = sadd.s32 81, %s2908_s24 }
  0x94   : > { %v1408_v15 = vsel %vm1171_vm1, %v1407_v12, %v1383_v10  ;;  %s431_s10 = sadd.s32 82, %s2908_s24  ;;  %s413_s14 = scalar_lea.vmem %s4469_s1, %s412_s6  ;;  %v1389_v16 = vrot.slane %v410_v13, 4 }
  0x95   : > { %s428_s3 = sld [smem:[#allocation3 + %s427_s9]]  ;;  %v414_v17 = vld [vmem:[%s413_s14] sm:$0x1]  ;;  %s417_s23 = scalar_lea.vmem %s4469_s1, %s416_s28  ;;  %v1409_v18 = vsel %vm1173_vm2, %v1408_v15, %v1386_v14 }
  0x96   : > { %s432_s29 = sld [smem:[#allocation3 + %s431_s10]]  ;;  %v418_v19 = vld [vmem:[%s417_s23] sm:$0x1]  ;;  %v1392_v20 = vrot.slane %v414_v17, 3  ;;  %v1410_v21 = vsel %vm1175_vm3, %v1409_v18, %v1389_v16  ;;  %s435_s27 = sadd.s32 83, %s2908_s24 }
  0x97   : > { %s439_s26 = sadd.s32 84, %s2908_s24  ;;  %v1395_v22 = vrot.slane %v418_v19, 2  ;;  %s436_s19 = sld [smem:[#allocation3 + %s435_s27]] }
  0x98   : > { %s421_s5 = scalar_lea.vmem %s4469_s1, %s420_s13  ;;  %v1411_v24 = vsel %vm1177_vm4, %v1410_v21, %v1392_v20  ;;  %s440_s8 = sld [smem:[#allocation3 + %s439_s26]] }
  0x99   : > { %v422_v23 = vld [vmem:[%s421_s5] sm:$0x1]  ;;  %s425_s20 = scalar_lea.vmem %s4469_s1, %s3345_s11  ;;  %v1412_v26 = vsel %vm1179_vm5, %v1411_v24, %v1395_v22  ;;  %s443_s9 = sadd.s32 85, %s2908_s24 }
  0x9a   : > { %v1398_v25 = vrot.slane %v422_v23, 1  ;;  %s447_s10 = sadd.s32 86, %s2908_s24  ;;  %s444_s14 = sld [smem:[#allocation3 + %s443_s9]]  ;;  %v426_v28 = vld [vmem:[%s425_s20] sm:$0x1] }
  0x9b   : > { %s429_s4 = scalar_lea.vmem %s4469_s1, %s428_s3  ;;  %s448_s23 = sld [smem:[#allocation3 + %s447_s10]] }
  0x9c   : > { %v1413_v27 = vsel %vm1181_vm6, %v1412_v26, %v1398_v25  ;;  %v430_v29 = vld [vmem:[%s429_s4] sm:$0x1]  ;;  %s433_s11 = scalar_lea.vmem %s4469_s1, %s432_s29  ;;  %s451_s27 = sadd.s32 87, %s2908_s24 }
  0x9d   : > { %2040 = vst.msk [vmem:[%s2977_s15 + $0x48] sm:$0xff] %vm2030_vm7, %v1413_v27  ;;  %v434_v30 = vld [vmem:[%s433_s11] sm:$0x1]  ;;  %v1415_v31 = vrot.slane %v430_v29, 7  ;;  %s455_s26 = sadd.s32 88, %s2908_s24  ;;  %s437_s25 = scalar_lea.vmem %s4469_s1, %s436_s19 }
  0x9e   : > { %s452_s5 = sld [smem:[#allocation3 + %s451_s27]]  ;;  %v1418_v32 = vrot.slane %v434_v30, 6  ;;  %v438_v33 = vld [vmem:[%s437_s25] sm:$0x1]  ;;  %s441_s29 = scalar_lea.vmem %s4469_s1, %s440_s8 }
  0x9f   : > { %v1456_v34 = vsel %vm1169_vm0, %v426_v28, %v1415_v31  ;;  %s3389_s20 = sld [smem:[#allocation3 + %s455_s26]]  ;;  %v442_v35 = vld [vmem:[%s441_s29] sm:$0x1]  ;;  %v1421_v36 = vrot.slane %v438_v33, 5  ;;  %s459_s9 = sadd.s32 89, %s2908_s24 }
  0xa0   : > { %v1457_v37 = vsel %vm1171_vm1, %v1456_v34, %v1418_v32  ;;  %s463_s10 = sadd.s32 90, %s2908_s24  ;;  %s445_s13 = scalar_lea.vmem %s4469_s1, %s444_s14  ;;  %v1424_v38 = vrot.slane %v442_v35, 4 }
  0xa1   : > { %s460_s4 = sld [smem:[#allocation3 + %s459_s9]]  ;;  %v446_v39 = vld [vmem:[%s445_s13] sm:$0x1]  ;;  %s449_s17 = scalar_lea.vmem %s4469_s1, %s448_s23  ;;  %v1458_v40 = vsel %vm1173_vm2, %v1457_v37, %v1421_v36 }
  0xa2   : > { %s464_s11 = sld [smem:[#allocation3 + %s463_s10]]  ;;  %v450_v41 = vld [vmem:[%s449_s17] sm:$0x1]  ;;  %v1427_v42 = vrot.slane %v446_v39, 3  ;;  %v1459_v43 = vsel %vm1175_vm3, %v1458_v40, %v1424_v38  ;;  %s467_s27 = sadd.s32 91, %s2908_s24 }
  0xa3   : > { %s471_s26 = sadd.s32 92, %s2908_s24  ;;  %v1430_v44 = vrot.slane %v450_v41, 2  ;;  %s468_s25 = sld [smem:[#allocation3 + %s467_s27]] }
  0xa4   : > { %s453_s3 = scalar_lea.vmem %s4469_s1, %s452_s5  ;;  %v1460_v46 = vsel %vm1177_vm4, %v1459_v43, %v1427_v42  ;;  %s472_s29 = sld [smem:[#allocation3 + %s471_s26]] }
  0xa5   : > { %v454_v45 = vld [vmem:[%s453_s3] sm:$0x1]  ;;  %s457_s7 = scalar_lea.vmem %s4469_s1, %s3389_s20  ;;  %v1461_v48 = vsel %vm1179_vm5, %v1460_v46, %v1430_v44  ;;  %s475_s9 = sadd.s32 93, %s2908_s24 }
  0xa6   : > { %v1433_v47 = vrot.slane %v454_v45, 1  ;;  %s479_s10 = sadd.s32 94, %s2908_s24  ;;  %s476_s13 = sld [smem:[#allocation3 + %s475_s9]]  ;;  %v458_v50 = vld [vmem:[%s457_s7] sm:$0x1] }
  0xa7   : > { %s461_s12 = scalar_lea.vmem %s4469_s1, %s460_s4  ;;  %s480_s17 = sld [smem:[#allocation3 + %s479_s10]] }
  0xa8   : > { %v1462_v49 = vsel %vm1181_vm6, %v1461_v48, %v1433_v47  ;;  %v462_v51 = vld [vmem:[%s461_s12] sm:$0x1]  ;;  %s465_s20 = scalar_lea.vmem %s4469_s1, %s464_s11  ;;  %s483_s27 = sadd.s32 95, %s2908_s24 }
  0xa9   : > { %2041 = vst.msk [vmem:[%s2977_s15 + $0x50] sm:$0xff] %vm2030_vm7, %v1462_v49  ;;  %v466_v52 = vld [vmem:[%s465_s20] sm:$0x1]  ;;  %v1436_v53 = vrot.slane %v462_v51, 7  ;;  %s487_s26 = sadd.s32 96, %s2908_s24  ;;  %s469_s6 = scalar_lea.vmem %s4469_s1, %s468_s25 }
  0xaa   : > { %s484_s3 = sld [smem:[#allocation3 + %s483_s27]]  ;;  %v1439_v54 = vrot.slane %v466_v52, 6  ;;  %v470_v55 = vld [vmem:[%s469_s6] sm:$0x1]  ;;  %s473_s11 = scalar_lea.vmem %s4469_s1, %s472_s29 }
  0xab   : > { %v1463_v56 = vsel %vm1169_vm0, %v458_v50, %v1436_v53  ;;  %s3433_s7 = sld [smem:[#allocation3 + %s487_s26]]  ;;  %v474_v57 = vld [vmem:[%s473_s11] sm:$0x1]  ;;  %v1442_v58 = vrot.slane %v470_v55, 5  ;;  %s491_s9 = sadd.s32 97, %s2908_s24 }
  0xac   : > { %v1464_v59 = vsel %vm1171_vm1, %v1463_v56, %v1439_v54  ;;  %s495_s10 = sadd.s32 98, %s2908_s24  ;;  %s477_s5 = scalar_lea.vmem %s4469_s1, %s476_s13  ;;  %v1445_v60 = vrot.slane %v474_v57, 4 }
  0xad   : > { %s492_s12 = sld [smem:[#allocation3 + %s491_s9]]  ;;  %v478_v61 = vld [vmem:[%s477_s5] sm:$0x1]  ;;  %s481_s30 = scalar_lea.vmem %s4469_s1, %s480_s17  ;;  %v1465_v62 = vsel %vm1173_vm2, %v1464_v59, %v1442_v58 }
  0xae   : > { %s496_s20 = sld [smem:[#allocation3 + %s495_s10]]  ;;  %v482_v63 = vld [vmem:[%s481_s30] sm:$0x1]  ;;  %v1448_v0 = vrot.slane %v478_v61, 3  ;;  %v1466_v1 = vsel %vm1175_vm3, %v1465_v62, %v1445_v60  ;;  %s499_s27 = sadd.s32 99, %s2908_s24 }
  0xaf   : > { %s503_s26 = sadd.s32 100, %s2908_s24  ;;  %v1451_v2 = vrot.slane %v482_v63, 2  ;;  %s500_s6 = sld [smem:[#allocation3 + %s499_s27]] }
  0xb0   : > { %s485_s4 = scalar_lea.vmem %s4469_s1, %s484_s3  ;;  %v1467_v4 = vsel %vm1177_vm4, %v1466_v1, %v1448_v0  ;;  %s504_s11 = sld [smem:[#allocation3 + %s503_s26]] }
  0xb1   : > { %v486_v3 = vld [vmem:[%s485_s4] sm:$0x1]  ;;  %s489_s28 = scalar_lea.vmem %s4469_s1, %s3433_s7  ;;  %v1468_v6 = vsel %vm1179_vm5, %v1467_v4, %v1451_v2  ;;  %s507_s9 = sadd.s32 101, %s2908_s24 }
  0xb2   : > { %v1454_v5 = vrot.slane %v486_v3, 1  ;;  %s511_s10 = sadd.s32 102, %s2908_s24  ;;  %s508_s5 = sld [smem:[#allocation3 + %s507_s9]]  ;;  %v490_v8 = vld [vmem:[%s489_s28] sm:$0x1] }
  0xb3   : > { %s493_s19 = scalar_lea.vmem %s4469_s1, %s492_s12  ;;  %s512_s30 = sld [smem:[#allocation3 + %s511_s10]] }
  0xb4   : > { %v1469_v7 = vsel %vm1181_vm6, %v1468_v6, %v1454_v5  ;;  %v494_v9 = vld [vmem:[%s493_s19] sm:$0x1]  ;;  %s497_s7 = scalar_lea.vmem %s4469_s1, %s496_s20  ;;  %s515_s27 = sadd.s32 103, %s2908_s24 }
  0xb5   : > { %2042 = vst.msk [vmem:[%s2977_s15 + $0x58] sm:$0xff] %vm2030_vm7, %v1469_v7  ;;  %v498_v10 = vld [vmem:[%s497_s7] sm:$0x1]  ;;  %v1471_v11 = vrot.slane %v494_v9, 7  ;;  %s519_s26 = sadd.s32 104, %s2908_s24  ;;  %s501_s14 = scalar_lea.vmem %s4469_s1, %s500_s6 }
  0xb6   : > { %s516_s4 = sld [smem:[#allocation3 + %s515_s27]]  ;;  %v1474_v12 = vrot.slane %v498_v10, 6  ;;  %v502_v13 = vld [vmem:[%s501_s14] sm:$0x1]  ;;  %s505_s20 = scalar_lea.vmem %s4469_s1, %s504_s11 }
  0xb7   : > { %v1512_v14 = vsel %vm1169_vm0, %v490_v8, %v1471_v11  ;;  %s3477_s28 = sld [smem:[#allocation3 + %s519_s26]]  ;;  %v506_v15 = vld [vmem:[%s505_s20] sm:$0x1]  ;;  %v1477_v16 = vrot.slane %v502_v13, 5  ;;  %s523_s9 = sadd.s32 105, %s2908_s24 }
  0xb8   : > { %v1513_v17 = vsel %vm1171_vm1, %v1512_v14, %v1474_v12  ;;  %s527_s10 = sadd.s32 106, %s2908_s24  ;;  %s509_s3 = scalar_lea.vmem %s4469_s1, %s508_s5  ;;  %v1480_v18 = vrot.slane %v506_v15, 4 }
  0xb9   : > { %s524_s19 = sld [smem:[#allocation3 + %s523_s9]]  ;;  %v510_v19 = vld [vmem:[%s509_s3] sm:$0x1]  ;;  %s513_s8 = scalar_lea.vmem %s4469_s1, %s512_s30  ;;  %v1514_v20 = vsel %vm1173_vm2, %v1513_v17, %v1477_v16 }
  0xba   : > { %s528_s7 = sld [smem:[#allocation3 + %s527_s10]]  ;;  %v514_v21 = vld [vmem:[%s513_s8] sm:$0x1]  ;;  %v1483_v22 = vrot.slane %v510_v19, 3  ;;  %v1515_v23 = vsel %vm1175_vm3, %v1514_v20, %v1480_v18  ;;  %s531_s27 = sadd.s32 107, %s2908_s24 }
  0xbb   : > { %s535_s26 = sadd.s32 108, %s2908_s24  ;;  %v1486_v24 = vrot.slane %v514_v21, 2  ;;  %s532_s14 = sld [smem:[#allocation3 + %s531_s27]] }
  0xbc   : > { %s517_s12 = scalar_lea.vmem %s4469_s1, %s516_s4  ;;  %v1516_v26 = vsel %vm1177_vm4, %v1515_v23, %v1483_v22  ;;  %s536_s20 = sld [smem:[#allocation3 + %s535_s26]] }
  0xbd   : > { %v518_v25 = vld [vmem:[%s517_s12] sm:$0x1]  ;;  %s521_s23 = scalar_lea.vmem %s4469_s1, %s3477_s28  ;;  %v1517_v28 = vsel %vm1179_vm5, %v1516_v26, %v1486_v24  ;;  %s539_s9 = sadd.s32 109, %s2908_s24 }
  0xbe   : > { %v1489_v27 = vrot.slane %v518_v25, 1  ;;  %s543_s10 = sadd.s32 110, %s2908_s24  ;;  %s540_s3 = sld [smem:[#allocation3 + %s539_s9]]  ;;  %v522_v30 = vld [vmem:[%s521_s23] sm:$0x1] }
  0xbf   : > { %s525_s25 = scalar_lea.vmem %s4469_s1, %s524_s19  ;;  %s544_s8 = sld [smem:[#allocation3 + %s543_s10]] }
  0xc0   : > { %v1518_v29 = vsel %vm1181_vm6, %v1517_v28, %v1489_v27  ;;  %v526_v31 = vld [vmem:[%s525_s25] sm:$0x1]  ;;  %s529_s28 = scalar_lea.vmem %s4469_s1, %s528_s7  ;;  %s547_s27 = sadd.s32 111, %s2908_s24 }
  0xc1   : > { %2043 = vst.msk [vmem:[%s2977_s15 + $0x60] sm:$0xff] %vm2030_vm7, %v1518_v29  ;;  %v530_v32 = vld [vmem:[%s529_s28] sm:$0x1]  ;;  %v1492_v33 = vrot.slane %v526_v31, 7  ;;  %s551_s26 = sadd.s32 112, %s2908_s24  ;;  %s533_s13 = scalar_lea.vmem %s4469_s1, %s532_s14 }
  0xc2   : > { %s548_s12 = sld [smem:[#allocation3 + %s547_s27]]  ;;  %v1495_v34 = vrot.slane %v530_v32, 6  ;;  %v534_v35 = vld [vmem:[%s533_s13] sm:$0x1]  ;;  %s537_s7 = scalar_lea.vmem %s4469_s1, %s536_s20 }
  0xc3   : > { %v1519_v36 = vsel %vm1169_vm0, %v522_v30, %v1492_v33  ;;  %s3521_s23 = sld [smem:[#allocation3 + %s551_s26]]  ;;  %v538_v37 = vld [vmem:[%s537_s7] sm:$0x1]  ;;  %v1498_v38 = vrot.slane %v534_v35, 5  ;;  %s555_s9 = sadd.s32 113, %s2908_s24 }
  0xc4   : > { %v1520_v39 = vsel %vm1171_vm1, %v1519_v36, %v1495_v34  ;;  %s559_s10 = sadd.s32 114, %s2908_s24  ;;  %s541_s4 = scalar_lea.vmem %s4469_s1, %s540_s3  ;;  %v1501_v40 = vrot.slane %v538_v37, 4 }
  0xc5   : > { %s556_s25 = sld [smem:[#allocation3 + %s555_s9]]  ;;  %v542_v41 = vld [vmem:[%s541_s4] sm:$0x1]  ;;  %s545_s29 = scalar_lea.vmem %s4469_s1, %s544_s8  ;;  %v1521_v42 = vsel %vm1173_vm2, %v1520_v39, %v1498_v38 }
  0xc6   : > { %s560_s28 = sld [smem:[#allocation3 + %s559_s10]]  ;;  %v546_v43 = vld [vmem:[%s545_s29] sm:$0x1]  ;;  %v1504_v44 = vrot.slane %v542_v41, 3  ;;  %v1522_v45 = vsel %vm1175_vm3, %v1521_v42, %v1501_v40  ;;  %s563_s27 = sadd.s32 115, %s2908_s24 }
  0xc7   : > { %s567_s26 = sadd.s32 116, %s2908_s24  ;;  %v1507_v46 = vrot.slane %v546_v43, 2  ;;  %s564_s13 = sld [smem:[#allocation3 + %s563_s27]] }
  0xc8   : > { %s549_s19 = scalar_lea.vmem %s4469_s1, %s548_s12  ;;  %v1523_v48 = vsel %vm1177_vm4, %v1522_v45, %v1504_v44  ;;  %s568_s7 = sld [smem:[#allocation3 + %s567_s26]] }
  0xc9   : > { %v550_v47 = vld [vmem:[%s549_s19] sm:$0x1]  ;;  %s553_s17 = scalar_lea.vmem %s4469_s1, %s3521_s23  ;;  %v1524_v50 = vsel %vm1179_vm5, %v1523_v48, %v1507_v46  ;;  %s571_s9 = sadd.s32 117, %s2908_s24 }
  0xca   : > { %v1510_v49 = vrot.slane %v550_v47, 1  ;;  %s575_s10 = sadd.s32 118, %s2908_s24  ;;  %s572_s4 = sld [smem:[#allocation3 + %s571_s9]]  ;;  %v554_v52 = vld [vmem:[%s553_s17] sm:$0x1] }
  0xcb   : > { %s557_s6 = scalar_lea.vmem %s4469_s1, %s556_s25  ;;  %s576_s29 = sld [smem:[#allocation3 + %s575_s10]] }
  0xcc   : > { %v1525_v51 = vsel %vm1181_vm6, %v1524_v50, %v1510_v49  ;;  %v558_v53 = vld [vmem:[%s557_s6] sm:$0x1]  ;;  %s561_s23 = scalar_lea.vmem %s4469_s1, %s560_s28  ;;  %s579_s27 = sadd.s32 119, %s2908_s24 }
  0xcd   : > { %2044 = vst.msk [vmem:[%s2977_s15 + $0x68] sm:$0xff] %vm2030_vm7, %v1525_v51  ;;  %v562_v54 = vld [vmem:[%s561_s23] sm:$0x1]  ;;  %v1527_v55 = vrot.slane %v558_v53, 7  ;;  %s583_s26 = sadd.s32 120, %s2908_s24  ;;  %s565_s5 = scalar_lea.vmem %s4469_s1, %s564_s13 }
  0xce   : > { %s580_s19 = sld [smem:[#allocation3 + %s579_s27]]  ;;  %v1530_v56 = vrot.slane %v562_v54, 6  ;;  %v566_v57 = vld [vmem:[%s565_s5] sm:$0x1]  ;;  %s569_s28 = scalar_lea.vmem %s4469_s1, %s568_s7 }
  0xcf   : > { %v1568_v58 = vsel %vm1169_vm0, %v554_v52, %v1527_v55  ;;  %s3565_s17 = sld [smem:[#allocation3 + %s583_s26]]  ;;  %v570_v59 = vld [vmem:[%s569_s28] sm:$0x1]  ;;  %v1533_v60 = vrot.slane %v566_v57, 5  ;;  %s587_s9 = sadd.s32 121, %s2908_s24 }
  0xd0   : > { %v1569_v61 = vsel %vm1171_vm1, %v1568_v58, %v1530_v56  ;;  %s591_s10 = sadd.s32 122, %s2908_s24  ;;  %s573_s12 = scalar_lea.vmem %s4469_s1, %s572_s4  ;;  %v1536_v62 = vrot.slane %v570_v59, 4 }
  0xd1   : > { %s588_s6 = sld [smem:[#allocation3 + %s587_s9]]  ;;  %v574_v63 = vld [vmem:[%s573_s12] sm:$0x1]  ;;  %s577_s11 = scalar_lea.vmem %s4469_s1, %s576_s29  ;;  %v1570_v0 = vsel %vm1173_vm2, %v1569_v61, %v1533_v60 }
  0xd2   : > { %s592_s23 = sld [smem:[#allocation3 + %s591_s10]]  ;;  %v578_v1 = vld [vmem:[%s577_s11] sm:$0x1]  ;;  %v1539_v2 = vrot.slane %v574_v63, 3  ;;  %v1571_v3 = vsel %vm1175_vm3, %v1570_v0, %v1536_v62  ;;  %s595_s27 = sadd.s32 123, %s2908_s24 }
  0xd3   : > { %s599_s26 = sadd.s32 124, %s2908_s24  ;;  %v1542_v4 = vrot.slane %v578_v1, 2  ;;  %s596_s5 = sld [smem:[#allocation3 + %s595_s27]] }
  0xd4   : > { %s581_s25 = scalar_lea.vmem %s4469_s1, %s580_s19  ;;  %v1572_v6 = vsel %vm1177_vm4, %v1571_v3, %v1539_v2  ;;  %s600_s28 = sld [smem:[#allocation3 + %s599_s26]] }
  0xd5   : > { %v582_v5 = vld [vmem:[%s581_s25] sm:$0x1]  ;;  %s585_s30 = scalar_lea.vmem %s4469_s1, %s3565_s17  ;;  %v1573_v8 = vsel %vm1179_vm5, %v1572_v6, %v1542_v4  ;;  %s603_s9 = sadd.s32 125, %s2908_s24 }
  0xd6   : > { %v1545_v7 = vrot.slane %v582_v5, 1  ;;  %s607_s10 = sadd.s32 126, %s2908_s24  ;;  %s604_s12 = sld [smem:[#allocation3 + %s603_s9]]  ;;  %v586_v10 = vld [vmem:[%s585_s30] sm:$0x1] }
  0xd7   : > { %s589_s14 = scalar_lea.vmem %s4469_s1, %s588_s6  ;;  %s608_s11 = sld [smem:[#allocation3 + %s607_s10]] }
  0xd8   : > { %v1574_v9 = vsel %vm1181_vm6, %v1573_v8, %v1545_v7  ;;  %v590_v11 = vld [vmem:[%s589_s14] sm:$0x1]  ;;  %s593_s17 = scalar_lea.vmem %s4469_s1, %s592_s23  ;;  %s611_s27 = sadd.s32 127, %s2908_s24 }
  0xd9   : > { %2045 = vst.msk [vmem:[%s2977_s15 + $0x70] sm:$0xff] %vm2030_vm7, %v1574_v9  ;;  %v594_v12 = vld [vmem:[%s593_s17] sm:$0x1]  ;;  %v1548_v13 = vrot.slane %v590_v11, 7  ;;  %s615_s26 = sadd.s32 128, %s2908_s24  ;;  %s597_s3 = scalar_lea.vmem %s4469_s1, %s596_s5 }
  0xda   : > { %s612_s25 = sld [smem:[#allocation3 + %s611_s27]]  ;;  %v1551_v14 = vrot.slane %v594_v12, 6  ;;  %v598_v15 = vld [vmem:[%s597_s3] sm:$0x1]  ;;  %s601_s23 = scalar_lea.vmem %s4469_s1, %s600_s28 }
  0xdb   : > { %v1575_v16 = vsel %vm1169_vm0, %v586_v10, %v1548_v13  ;;  %s3609_s30 = sld [smem:[#allocation3 + %s615_s26]]  ;;  %v602_v17 = vld [vmem:[%s601_s23] sm:$0x1]  ;;  %v1554_v18 = vrot.slane %v598_v15, 5  ;;  %s619_s9 = sadd.s32 129, %s2908_s24 }
  0xdc   : > { %v1576_v19 = vsel %vm1171_vm1, %v1575_v16, %v1551_v14  ;;  %s623_s10 = sadd.s32 130, %s2908_s24  ;;  %s605_s19 = scalar_lea.vmem %s4469_s1, %s604_s12  ;;  %v1557_v20 = vrot.slane %v602_v17, 4 }
  0xdd   : > { %s620_s14 = sld [smem:[#allocation3 + %s619_s9]]  ;;  %v606_v21 = vld [vmem:[%s605_s19] sm:$0x1]  ;;  %s609_s20 = scalar_lea.vmem %s4469_s1, %s608_s11  ;;  %v1577_v22 = vsel %vm1173_vm2, %v1576_v19, %v1554_v18 }
  0xde   : > { %s624_s17 = sld [smem:[#allocation3 + %s623_s10]]  ;;  %v610_v23 = vld [vmem:[%s609_s20] sm:$0x1]  ;;  %v1560_v24 = vrot.slane %v606_v21, 3  ;;  %v1578_v25 = vsel %vm1175_vm3, %v1577_v22, %v1557_v20  ;;  %s627_s27 = sadd.s32 131, %s2908_s24 }
  0xdf   : > { %s631_s26 = sadd.s32 132, %s2908_s24  ;;  %v1563_v26 = vrot.slane %v610_v23, 2  ;;  %s628_s3 = sld [smem:[#allocation3 + %s627_s27]] }
  0xe0   : > { %s613_s6 = scalar_lea.vmem %s4469_s1, %s612_s25  ;;  %v1579_v28 = vsel %vm1177_vm4, %v1578_v25, %v1560_v24  ;;  %s632_s23 = sld [smem:[#allocation3 + %s631_s26]] }
  0xe1   : > { %v614_v27 = vld [vmem:[%s613_s6] sm:$0x1]  ;;  %s617_s8 = scalar_lea.vmem %s4469_s1, %s3609_s30  ;;  %v1580_v30 = vsel %vm1179_vm5, %v1579_v28, %v1563_v26  ;;  %s635_s9 = sadd.s32 133, %s2908_s24 }
  0xe2   : > { %v1566_v29 = vrot.slane %v614_v27, 1  ;;  %s639_s10 = sadd.s32 134, %s2908_s24  ;;  %s636_s19 = sld [smem:[#allocation3 + %s635_s9]]  ;;  %v618_v32 = vld [vmem:[%s617_s8] sm:$0x1] }
  0xe3   : > { %s621_s13 = scalar_lea.vmem %s4469_s1, %s620_s14  ;;  %s640_s20 = sld [smem:[#allocation3 + %s639_s10]] }
  0xe4   : > { %v1581_v31 = vsel %vm1181_vm6, %v1580_v30, %v1566_v29  ;;  %v622_v33 = vld [vmem:[%s621_s13] sm:$0x1]  ;;  %s625_s30 = scalar_lea.vmem %s4469_s1, %s624_s17  ;;  %s643_s27 = sadd.s32 135, %s2908_s24 }
  0xe5   : > { %2046 = vst.msk [vmem:[%s2977_s15 + $0x78] sm:$0xff] %vm2030_vm7, %v1581_v31  ;;  %v626_v34 = vld [vmem:[%s625_s30] sm:$0x1]  ;;  %v1583_v35 = vrot.slane %v622_v33, 7  ;;  %s647_s26 = sadd.s32 136, %s2908_s24  ;;  %s629_s4 = scalar_lea.vmem %s4469_s1, %s628_s3 }
  0xe6   : > { %s644_s6 = sld [smem:[#allocation3 + %s643_s27]]  ;;  %v1586_v36 = vrot.slane %v626_v34, 6  ;;  %v630_v37 = vld [vmem:[%s629_s4] sm:$0x1]  ;;  %s633_s17 = scalar_lea.vmem %s4469_s1, %s632_s23 }
  0xe7   : > { %v1624_v38 = vsel %vm1169_vm0, %v618_v32, %v1583_v35  ;;  %s3653_s8 = sld [smem:[#allocation3 + %s647_s26]]  ;;  %v634_v39 = vld [vmem:[%s633_s17] sm:$0x1]  ;;  %v1589_v40 = vrot.slane %v630_v37, 5  ;;  %s651_s9 = sadd.s32 137, %s2908_s24 }
  0xe8   : > { %v1625_v41 = vsel %vm1171_vm1, %v1624_v38, %v1586_v36  ;;  %s655_s10 = sadd.s32 138, %s2908_s24  ;;  %s637_s25 = scalar_lea.vmem %s4469_s1, %s636_s19  ;;  %v1592_v42 = vrot.slane %v634_v39, 4 }
  0xe9   : > { %s652_s13 = sld [smem:[#allocation3 + %s651_s9]]  ;;  %v638_v43 = vld [vmem:[%s637_s25] sm:$0x1]  ;;  %s641_s7 = scalar_lea.vmem %s4469_s1, %s640_s20  ;;  %v1626_v44 = vsel %vm1173_vm2, %v1625_v41, %v1589_v40 }
  0xea   : > { %s656_s30 = sld [smem:[#allocation3 + %s655_s10]]  ;;  %v642_v45 = vld [vmem:[%s641_s7] sm:$0x1]  ;;  %v1595_v46 = vrot.slane %v638_v43, 3  ;;  %v1627_v47 = vsel %vm1175_vm3, %v1626_v44, %v1592_v42  ;;  %s659_s27 = sadd.s32 139, %s2908_s24 }
  0xeb   : > { %s663_s26 = sadd.s32 140, %s2908_s24  ;;  %v1598_v48 = vrot.slane %v642_v45, 2  ;;  %s660_s4 = sld [smem:[#allocation3 + %s659_s27]] }
  0xec   : > { %s645_s14 = scalar_lea.vmem %s4469_s1, %s644_s6  ;;  %v1628_v50 = vsel %vm1177_vm4, %v1627_v47, %v1595_v46  ;;  %s664_s17 = sld [smem:[#allocation3 + %s663_s26]] }
  0xed   : > { %v646_v49 = vld [vmem:[%s645_s14] sm:$0x1]  ;;  %s649_s29 = scalar_lea.vmem %s4469_s1, %s3653_s8  ;;  %v1629_v52 = vsel %vm1179_vm5, %v1628_v50, %v1598_v48  ;;  %s667_s9 = sadd.s32 141, %s2908_s24 }
  0xee   : > { %v1601_v51 = vrot.slane %v646_v49, 1  ;;  %s671_s10 = sadd.s32 142, %s2908_s24  ;;  %s668_s25 = sld [smem:[#allocation3 + %s667_s9]]  ;;  %v650_v54 = vld [vmem:[%s649_s29] sm:$0x1] }
  0xef   : > { %s653_s5 = scalar_lea.vmem %s4469_s1, %s652_s13  ;;  %s672_s7 = sld [smem:[#allocation3 + %s671_s10]] }
  0xf0   : > { %v1630_v53 = vsel %vm1181_vm6, %v1629_v52, %v1601_v51  ;;  %v654_v55 = vld [vmem:[%s653_s5] sm:$0x1]  ;;  %s657_s8 = scalar_lea.vmem %s4469_s1, %s656_s30  ;;  %s675_s27 = sadd.s32 143, %s2908_s24 }
  0xf1   : > { %2047 = vst.msk [vmem:[%s2977_s15 + $0x80] sm:$0xff] %vm2030_vm7, %v1630_v53  ;;  %v658_v56 = vld [vmem:[%s657_s8] sm:$0x1]  ;;  %v1604_v57 = vrot.slane %v654_v55, 7  ;;  %s679_s26 = sadd.s32 144, %s2908_s24  ;;  %s661_s12 = scalar_lea.vmem %s4469_s1, %s660_s4 }
  0xf2   : > { %s676_s14 = sld [smem:[#allocation3 + %s675_s27]]  ;;  %v1607_v58 = vrot.slane %v658_v56, 6  ;;  %v662_v59 = vld [vmem:[%s661_s12] sm:$0x1]  ;;  %s665_s30 = scalar_lea.vmem %s4469_s1, %s664_s17 }
  0xf3   : > { %v1631_v60 = vsel %vm1169_vm0, %v650_v54, %v1604_v57  ;;  %s3697_s29 = sld [smem:[#allocation3 + %s679_s26]]  ;;  %v666_v61 = vld [vmem:[%s665_s30] sm:$0x1]  ;;  %v1610_v62 = vrot.slane %v662_v59, 5  ;;  %s683_s9 = sadd.s32 145, %s2908_s24 }
  0xf4   : > { %v1632_v63 = vsel %vm1171_vm1, %v1631_v60, %v1607_v58  ;;  %s687_s10 = sadd.s32 146, %s2908_s24  ;;  %s669_s6 = scalar_lea.vmem %s4469_s1, %s668_s25  ;;  %v1613_v0 = vrot.slane %v666_v61, 4 }
  0xf5   : > { %s684_s5 = sld [smem:[#allocation3 + %s683_s9]]  ;;  %v670_v1 = vld [vmem:[%s669_s6] sm:$0x1]  ;;  %s673_s28 = scalar_lea.vmem %s4469_s1, %s672_s7  ;;  %v1633_v2 = vsel %vm1173_vm2, %v1632_v63, %v1610_v62 }
  0xf6   : > { %s688_s8 = sld [smem:[#allocation3 + %s687_s10]]  ;;  %v674_v3 = vld [vmem:[%s673_s28] sm:$0x1]  ;;  %v1616_v4 = vrot.slane %v670_v1, 3  ;;  %v1634_v5 = vsel %vm1175_vm3, %v1633_v2, %v1613_v0  ;;  %s691_s27 = sadd.s32 147, %s2908_s24 }
  0xf7   : > { %s695_s26 = sadd.s32 148, %s2908_s24  ;;  %v1619_v6 = vrot.slane %v674_v3, 2  ;;  %s692_s12 = sld [smem:[#allocation3 + %s691_s27]] }
  0xf8   : > { %s677_s13 = scalar_lea.vmem %s4469_s1, %s676_s14  ;;  %v1635_v8 = vsel %vm1177_vm4, %v1634_v5, %v1616_v4  ;;  %s696_s30 = sld [smem:[#allocation3 + %s695_s26]] }
  0xf9   : > { %v678_v7 = vld [vmem:[%s677_s13] sm:$0x1]  ;;  %s681_s11 = scalar_lea.vmem %s4469_s1, %s3697_s29  ;;  %v1636_v10 = vsel %vm1179_vm5, %v1635_v8, %v1619_v6  ;;  %s699_s9 = sadd.s32 149, %s2908_s24 }
  0xfa   : > { %v1622_v9 = vrot.slane %v678_v7, 1  ;;  %s703_s10 = sadd.s32 150, %s2908_s24  ;;  %s700_s6 = sld [smem:[#allocation3 + %s699_s9]]  ;;  %v682_v12 = vld [vmem:[%s681_s11] sm:$0x1] }
  0xfb   : > { %s685_s3 = scalar_lea.vmem %s4469_s1, %s684_s5  ;;  %s704_s28 = sld [smem:[#allocation3 + %s703_s10]] }
  0xfc   : > { %v1637_v11 = vsel %vm1181_vm6, %v1636_v10, %v1622_v9  ;;  %v686_v13 = vld [vmem:[%s685_s3] sm:$0x1]  ;;  %s689_s29 = scalar_lea.vmem %s4469_s1, %s688_s8  ;;  %s707_s27 = sadd.s32 151, %s2908_s24 }
  0xfd   : > { %2048 = vst.msk [vmem:[%s2977_s15 + $0x88] sm:$0xff] %vm2030_vm7, %v1637_v11  ;;  %v690_v14 = vld [vmem:[%s689_s29] sm:$0x1]  ;;  %v1639_v15 = vrot.slane %v686_v13, 7  ;;  %s711_s26 = sadd.s32 152, %s2908_s24  ;;  %s693_s19 = scalar_lea.vmem %s4469_s1, %s692_s12 }
  0xfe   : > { %s708_s13 = sld [smem:[#allocation3 + %s707_s27]]  ;;  %v1642_v16 = vrot.slane %v690_v14, 6  ;;  %v694_v17 = vld [vmem:[%s693_s19] sm:$0x1]  ;;  %s697_s8 = scalar_lea.vmem %s4469_s1, %s696_s30 }
  0xff   : > { %v1680_v18 = vsel %vm1169_vm0, %v682_v12, %v1639_v15  ;;  %s3741_s11 = sld [smem:[#allocation3 + %s711_s26]]  ;;  %v698_v19 = vld [vmem:[%s697_s8] sm:$0x1]  ;;  %v1645_v20 = vrot.slane %v694_v17, 5  ;;  %s715_s9 = sadd.s32 153, %s2908_s24 }
 0x100   : > { %v1681_v21 = vsel %vm1171_vm1, %v1680_v18, %v1642_v16  ;;  %s719_s10 = sadd.s32 154, %s2908_s24  ;;  %s701_s14 = scalar_lea.vmem %s4469_s1, %s700_s6  ;;  %v1648_v22 = vrot.slane %v698_v19, 4 }
 0x101   : > { %s716_s3 = sld [smem:[#allocation3 + %s715_s9]]  ;;  %v702_v23 = vld [vmem:[%s701_s14] sm:$0x1]  ;;  %s705_s23 = scalar_lea.vmem %s4469_s1, %s704_s28  ;;  %v1682_v24 = vsel %vm1173_vm2, %v1681_v21, %v1645_v20 }
 0x102   : > { %s720_s29 = sld [smem:[#allocation3 + %s719_s10]]  ;;  %v706_v25 = vld [vmem:[%s705_s23] sm:$0x1]  ;;  %v1651_v26 = vrot.slane %v702_v23, 3  ;;  %v1683_v27 = vsel %vm1175_vm3, %v1682_v24, %v1648_v22  ;;  %s723_s27 = sadd.s32 155, %s2908_s24 }
 0x103   : > { %s727_s26 = sadd.s32 156, %s2908_s24  ;;  %v1654_v28 = vrot.slane %v706_v25, 2  ;;  %s724_s19 = sld [smem:[#allocation3 + %s723_s27]] }
 0x104   : > { %s709_s5 = scalar_lea.vmem %s4469_s1, %s708_s13  ;;  %v1684_v30 = vsel %vm1177_vm4, %v1683_v27, %v1651_v26  ;;  %s728_s8 = sld [smem:[#allocation3 + %s727_s26]] }
 0x105   : > { %v710_v29 = vld [vmem:[%s709_s5] sm:$0x1]  ;;  %s713_s20 = scalar_lea.vmem %s4469_s1, %s3741_s11  ;;  %v1685_v32 = vsel %vm1179_vm5, %v1684_v30, %v1654_v28  ;;  %s731_s9 = sadd.s32 157, %s2908_s24 }
 0x106   : > { %v1657_v31 = vrot.slane %v710_v29, 1  ;;  %s735_s10 = sadd.s32 158, %s2908_s24  ;;  %s732_s14 = sld [smem:[#allocation3 + %s731_s9]]  ;;  %v714_v34 = vld [vmem:[%s713_s20] sm:$0x1] }
 0x107   : > { %s717_s4 = scalar_lea.vmem %s4469_s1, %s716_s3  ;;  %s736_s23 = sld [smem:[#allocation3 + %s735_s10]] }
 0x108   : > { %v1686_v33 = vsel %vm1181_vm6, %v1685_v32, %v1657_v31  ;;  %v718_v35 = vld [vmem:[%s717_s4] sm:$0x1]  ;;  %s721_s11 = scalar_lea.vmem %s4469_s1, %s720_s29  ;;  %s739_s27 = sadd.s32 159, %s2908_s24 }
 0x109   : > { %2049 = vst.msk [vmem:[%s2977_s15 + $0x90] sm:$0xff] %vm2030_vm7, %v1686_v33  ;;  %v722_v36 = vld [vmem:[%s721_s11] sm:$0x1]  ;;  %v1660_v37 = vrot.slane %v718_v35, 7  ;;  %s743_s26 = sadd.s32 160, %s2908_s24  ;;  %s725_s25 = scalar_lea.vmem %s4469_s1, %s724_s19 }
 0x10a   : > { %s740_s5 = sld [smem:[#allocation3 + %s739_s27]]  ;;  %v1663_v38 = vrot.slane %v722_v36, 6  ;;  %v726_v39 = vld [vmem:[%s725_s25] sm:$0x1]  ;;  %s729_s29 = scalar_lea.vmem %s4469_s1, %s728_s8 }
 0x10b   : > { %v1687_v40 = vsel %vm1169_vm0, %v714_v34, %v1660_v37  ;;  %s3785_s20 = sld [smem:[#allocation3 + %s743_s26]]  ;;  %v730_v41 = vld [vmem:[%s729_s29] sm:$0x1]  ;;  %v1666_v42 = vrot.slane %v726_v39, 5  ;;  %s747_s9 = sadd.s32 161, %s2908_s24 }
 0x10c   : > { %v1688_v43 = vsel %vm1171_vm1, %v1687_v40, %v1663_v38  ;;  %s751_s10 = sadd.s32 162, %s2908_s24  ;;  %s733_s13 = scalar_lea.vmem %s4469_s1, %s732_s14  ;;  %v1669_v44 = vrot.slane %v730_v41, 4 }
 0x10d   : > { %s748_s4 = sld [smem:[#allocation3 + %s747_s9]]  ;;  %v734_v45 = vld [vmem:[%s733_s13] sm:$0x1]  ;;  %s737_s17 = scalar_lea.vmem %s4469_s1, %s736_s23  ;;  %v1689_v46 = vsel %vm1173_vm2, %v1688_v43, %v1666_v42 }
 0x10e   : > { %s752_s11 = sld [smem:[#allocation3 + %s751_s10]]  ;;  %v738_v47 = vld [vmem:[%s737_s17] sm:$0x1]  ;;  %v1672_v48 = vrot.slane %v734_v45, 3  ;;  %v1690_v49 = vsel %vm1175_vm3, %v1689_v46, %v1669_v44  ;;  %s755_s27 = sadd.s32 163, %s2908_s24 }
 0x10f   : > { %s759_s26 = sadd.s32 164, %s2908_s24  ;;  %v1675_v50 = vrot.slane %v738_v47, 2  ;;  %s756_s25 = sld [smem:[#allocation3 + %s755_s27]] }
 0x110   : > { %s741_s3 = scalar_lea.vmem %s4469_s1, %s740_s5  ;;  %v1691_v52 = vsel %vm1177_vm4, %v1690_v49, %v1672_v48  ;;  %s760_s29 = sld [smem:[#allocation3 + %s759_s26]] }
 0x111   : > { %v742_v51 = vld [vmem:[%s741_s3] sm:$0x1]  ;;  %s745_s7 = scalar_lea.vmem %s4469_s1, %s3785_s20  ;;  %v1692_v54 = vsel %vm1179_vm5, %v1691_v52, %v1675_v50  ;;  %s763_s9 = sadd.s32 165, %s2908_s24 }
 0x112   : > { %v1678_v53 = vrot.slane %v742_v51, 1  ;;  %s767_s10 = sadd.s32 166, %s2908_s24  ;;  %s764_s13 = sld [smem:[#allocation3 + %s763_s9]]  ;;  %v746_v56 = vld [vmem:[%s745_s7] sm:$0x1] }
 0x113   : > { %s749_s12 = scalar_lea.vmem %s4469_s1, %s748_s4  ;;  %s768_s17 = sld [smem:[#allocation3 + %s767_s10]] }
 0x114   : > { %v1693_v55 = vsel %vm1181_vm6, %v1692_v54, %v1678_v53  ;;  %v750_v57 = vld [vmem:[%s749_s12] sm:$0x1]  ;;  %s753_s20 = scalar_lea.vmem %s4469_s1, %s752_s11  ;;  %s771_s27 = sadd.s32 167, %s2908_s24 }
 0x115   : > { %2050 = vst.msk [vmem:[%s2977_s15 + $0x98] sm:$0xff] %vm2030_vm7, %v1693_v55  ;;  %v754_v58 = vld [vmem:[%s753_s20] sm:$0x1]  ;;  %v1695_v59 = vrot.slane %v750_v57, 7  ;;  %s775_s26 = sadd.s32 168, %s2908_s24  ;;  %s757_s6 = scalar_lea.vmem %s4469_s1, %s756_s25 }
 0x116   : > { %s772_s3 = sld [smem:[#allocation3 + %s771_s27]]  ;;  %v1698_v60 = vrot.slane %v754_v58, 6  ;;  %v758_v61 = vld [vmem:[%s757_s6] sm:$0x1]  ;;  %s761_s11 = scalar_lea.vmem %s4469_s1, %s760_s29 }
 0x117   : > { %v1736_v62 = vsel %vm1169_vm0, %v746_v56, %v1695_v59  ;;  %s3829_s7 = sld [smem:[#allocation3 + %s775_s26]]  ;;  %v762_v63 = vld [vmem:[%s761_s11] sm:$0x1]  ;;  %v1701_v0 = vrot.slane %v758_v61, 5  ;;  %s779_s9 = sadd.s32 169, %s2908_s24 }
 0x118   : > { %v1737_v1 = vsel %vm1171_vm1, %v1736_v62, %v1698_v60  ;;  %s783_s10 = sadd.s32 170, %s2908_s24  ;;  %s765_s5 = scalar_lea.vmem %s4469_s1, %s764_s13  ;;  %v1704_v2 = vrot.slane %v762_v63, 4 }
 0x119   : > { %s780_s12 = sld [smem:[#allocation3 + %s779_s9]]  ;;  %v766_v3 = vld [vmem:[%s765_s5] sm:$0x1]  ;;  %s769_s30 = scalar_lea.vmem %s4469_s1, %s768_s17  ;;  %v1738_v4 = vsel %vm1173_vm2, %v1737_v1, %v1701_v0 }
 0x11a   : > { %s784_s20 = sld [smem:[#allocation3 + %s783_s10]]  ;;  %v770_v5 = vld [vmem:[%s769_s30] sm:$0x1]  ;;  %v1707_v6 = vrot.slane %v766_v3, 3  ;;  %v1739_v7 = vsel %vm1175_vm3, %v1738_v4, %v1704_v2  ;;  %s787_s27 = sadd.s32 171, %s2908_s24 }
 0x11b   : > { %s791_s26 = sadd.s32 172, %s2908_s24  ;;  %v1710_v8 = vrot.slane %v770_v5, 2  ;;  %s788_s6 = sld [smem:[#allocation3 + %s787_s27]] }
 0x11c   : > { %s773_s4 = scalar_lea.vmem %s4469_s1, %s772_s3  ;;  %v1740_v10 = vsel %vm1177_vm4, %v1739_v7, %v1707_v6  ;;  %s792_s11 = sld [smem:[#allocation3 + %s791_s26]] }
 0x11d   : > { %v774_v9 = vld [vmem:[%s773_s4] sm:$0x1]  ;;  %s777_s28 = scalar_lea.vmem %s4469_s1, %s3829_s7  ;;  %v1741_v12 = vsel %vm1179_vm5, %v1740_v10, %v1710_v8  ;;  %s795_s9 = sadd.s32 173, %s2908_s24 }
 0x11e   : > { %v1713_v11 = vrot.slane %v774_v9, 1  ;;  %s799_s10 = sadd.s32 174, %s2908_s24  ;;  %s796_s5 = sld [smem:[#allocation3 + %s795_s9]]  ;;  %v778_v14 = vld [vmem:[%s777_s28] sm:$0x1] }
 0x11f   : > { %s781_s19 = scalar_lea.vmem %s4469_s1, %s780_s12  ;;  %s800_s30 = sld [smem:[#allocation3 + %s799_s10]] }
 0x120   : > { %v1742_v13 = vsel %vm1181_vm6, %v1741_v12, %v1713_v11  ;;  %v782_v15 = vld [vmem:[%s781_s19] sm:$0x1]  ;;  %s785_s7 = scalar_lea.vmem %s4469_s1, %s784_s20  ;;  %s803_s27 = sadd.s32 175, %s2908_s24 }
 0x121   : > { %2051 = vst.msk [vmem:[%s2977_s15 + $0xa0] sm:$0xff] %vm2030_vm7, %v1742_v13  ;;  %v786_v16 = vld [vmem:[%s785_s7] sm:$0x1]  ;;  %v1716_v17 = vrot.slane %v782_v15, 7  ;;  %s807_s26 = sadd.s32 176, %s2908_s24  ;;  %s789_s14 = scalar_lea.vmem %s4469_s1, %s788_s6 }
 0x122   : > { %s804_s4 = sld [smem:[#allocation3 + %s803_s27]]  ;;  %v1719_v18 = vrot.slane %v786_v16, 6  ;;  %v790_v19 = vld [vmem:[%s789_s14] sm:$0x1]  ;;  %s793_s20 = scalar_lea.vmem %s4469_s1, %s792_s11 }
 0x123   : > { %v1743_v20 = vsel %vm1169_vm0, %v778_v14, %v1716_v17  ;;  %s3873_s28 = sld [smem:[#allocation3 + %s807_s26]]  ;;  %v794_v21 = vld [vmem:[%s793_s20] sm:$0x1]  ;;  %v1722_v22 = vrot.slane %v790_v19, 5  ;;  %s811_s9 = sadd.s32 177, %s2908_s24 }
 0x124   : > { %v1744_v23 = vsel %vm1171_vm1, %v1743_v20, %v1719_v18  ;;  %s815_s10 = sadd.s32 178, %s2908_s24  ;;  %s797_s3 = scalar_lea.vmem %s4469_s1, %s796_s5  ;;  %v1725_v24 = vrot.slane %v794_v21, 4 }
 0x125   : > { %s812_s19 = sld [smem:[#allocation3 + %s811_s9]]  ;;  %v798_v25 = vld [vmem:[%s797_s3] sm:$0x1]  ;;  %s801_s8 = scalar_lea.vmem %s4469_s1, %s800_s30  ;;  %v1745_v26 = vsel %vm1173_vm2, %v1744_v23, %v1722_v22 }
 0x126   : > { %s816_s7 = sld [smem:[#allocation3 + %s815_s10]]  ;;  %v802_v27 = vld [vmem:[%s801_s8] sm:$0x1]  ;;  %v1728_v28 = vrot.slane %v798_v25, 3  ;;  %v1746_v29 = vsel %vm1175_vm3, %v1745_v26, %v1725_v24  ;;  %s819_s27 = sadd.s32 179, %s2908_s24 }
 0x127   : > { %s823_s26 = sadd.s32 180, %s2908_s24  ;;  %v1731_v30 = vrot.slane %v802_v27, 2  ;;  %s820_s14 = sld [smem:[#allocation3 + %s819_s27]] }
 0x128   : > { %s805_s12 = scalar_lea.vmem %s4469_s1, %s804_s4  ;;  %v1747_v32 = vsel %vm1177_vm4, %v1746_v29, %v1728_v28  ;;  %s824_s20 = sld [smem:[#allocation3 + %s823_s26]] }
 0x129   : > { %v806_v31 = vld [vmem:[%s805_s12] sm:$0x1]  ;;  %s809_s23 = scalar_lea.vmem %s4469_s1, %s3873_s28  ;;  %v1748_v34 = vsel %vm1179_vm5, %v1747_v32, %v1731_v30  ;;  %s827_s9 = sadd.s32 181, %s2908_s24 }
 0x12a   : > { %v1734_v33 = vrot.slane %v806_v31, 1  ;;  %s831_s10 = sadd.s32 182, %s2908_s24  ;;  %s828_s3 = sld [smem:[#allocation3 + %s827_s9]]  ;;  %v810_v36 = vld [vmem:[%s809_s23] sm:$0x1] }
 0x12b   : > { %s813_s25 = scalar_lea.vmem %s4469_s1, %s812_s19  ;;  %s832_s8 = sld [smem:[#allocation3 + %s831_s10]] }
 0x12c   : > { %v1749_v35 = vsel %vm1181_vm6, %v1748_v34, %v1734_v33  ;;  %v814_v37 = vld [vmem:[%s813_s25] sm:$0x1]  ;;  %s817_s28 = scalar_lea.vmem %s4469_s1, %s816_s7  ;;  %s835_s27 = sadd.s32 183, %s2908_s24 }
 0x12d   : > { %2052 = vst.msk [vmem:[%s2977_s15 + $0xa8] sm:$0xff] %vm2030_vm7, %v1749_v35  ;;  %v818_v38 = vld [vmem:[%s817_s28] sm:$0x1]  ;;  %v1751_v39 = vrot.slane %v814_v37, 7  ;;  %s839_s26 = sadd.s32 184, %s2908_s24  ;;  %s821_s13 = scalar_lea.vmem %s4469_s1, %s820_s14 }
 0x12e   : > { %s836_s12 = sld [smem:[#allocation3 + %s835_s27]]  ;;  %v1754_v40 = vrot.slane %v818_v38, 6  ;;  %v822_v41 = vld [vmem:[%s821_s13] sm:$0x1]  ;;  %s825_s7 = scalar_lea.vmem %s4469_s1, %s824_s20 }
 0x12f   : > { %v1792_v42 = vsel %vm1169_vm0, %v810_v36, %v1751_v39  ;;  %s3917_s23 = sld [smem:[#allocation3 + %s839_s26]]  ;;  %v826_v43 = vld [vmem:[%s825_s7] sm:$0x1]  ;;  %v1757_v44 = vrot.slane %v822_v41, 5  ;;  %s843_s9 = sadd.s32 185, %s2908_s24 }
 0x130   : > { %v1793_v45 = vsel %vm1171_vm1, %v1792_v42, %v1754_v40  ;;  %s847_s10 = sadd.s32 186, %s2908_s24  ;;  %s829_s4 = scalar_lea.vmem %s4469_s1, %s828_s3  ;;  %v1760_v46 = vrot.slane %v826_v43, 4 }
 0x131   : > { %s844_s25 = sld [smem:[#allocation3 + %s843_s9]]  ;;  %v830_v47 = vld [vmem:[%s829_s4] sm:$0x1]  ;;  %s833_s29 = scalar_lea.vmem %s4469_s1, %s832_s8  ;;  %v1794_v48 = vsel %vm1173_vm2, %v1793_v45, %v1757_v44 }
 0x132   : > { %s848_s28 = sld [smem:[#allocation3 + %s847_s10]]  ;;  %v834_v49 = vld [vmem:[%s833_s29] sm:$0x1]  ;;  %v1763_v50 = vrot.slane %v830_v47, 3  ;;  %v1795_v51 = vsel %vm1175_vm3, %v1794_v48, %v1760_v46  ;;  %s851_s27 = sadd.s32 187, %s2908_s24 }
 0x133   : > { %s855_s26 = sadd.s32 188, %s2908_s24  ;;  %v1766_v52 = vrot.slane %v834_v49, 2  ;;  %s852_s13 = sld [smem:[#allocation3 + %s851_s27]] }
 0x134   : > { %s837_s19 = scalar_lea.vmem %s4469_s1, %s836_s12  ;;  %v1796_v54 = vsel %vm1177_vm4, %v1795_v51, %v1763_v50  ;;  %s856_s7 = sld [smem:[#allocation3 + %s855_s26]] }
 0x135   : > { %v838_v53 = vld [vmem:[%s837_s19] sm:$0x1]  ;;  %s841_s17 = scalar_lea.vmem %s4469_s1, %s3917_s23  ;;  %v1797_v56 = vsel %vm1179_vm5, %v1796_v54, %v1766_v52  ;;  %s859_s9 = sadd.s32 189, %s2908_s24 }
 0x136   : > { %v1769_v55 = vrot.slane %v838_v53, 1  ;;  %s863_s10 = sadd.s32 190, %s2908_s24  ;;  %s860_s4 = sld [smem:[#allocation3 + %s859_s9]]  ;;  %v842_v58 = vld [vmem:[%s841_s17] sm:$0x1] }
 0x137   : > { %s845_s6 = scalar_lea.vmem %s4469_s1, %s844_s25  ;;  %s864_s29 = sld [smem:[#allocation3 + %s863_s10]] }
 0x138   : > { %v1798_v57 = vsel %vm1181_vm6, %v1797_v56, %v1769_v55  ;;  %v846_v59 = vld [vmem:[%s845_s6] sm:$0x1]  ;;  %s849_s23 = scalar_lea.vmem %s4469_s1, %s848_s28  ;;  %s867_s27 = sadd.s32 191, %s2908_s24 }
 0x139   : > { %2053 = vst.msk [vmem:[%s2977_s15 + $0xb0] sm:$0xff] %vm2030_vm7, %v1798_v57  ;;  %v850_v60 = vld [vmem:[%s849_s23] sm:$0x1]  ;;  %v1772_v61 = vrot.slane %v846_v59, 7  ;;  %s871_s26 = sadd.s32 192, %s2908_s24  ;;  %s853_s5 = scalar_lea.vmem %s4469_s1, %s852_s13 }
 0x13a   : > { %s868_s19 = sld [smem:[#allocation3 + %s867_s27]]  ;;  %v1775_v62 = vrot.slane %v850_v60, 6  ;;  %v854_v63 = vld [vmem:[%s853_s5] sm:$0x1]  ;;  %s857_s28 = scalar_lea.vmem %s4469_s1, %s856_s7 }
 0x13b   : > { %v1799_v0 = vsel %vm1169_vm0, %v842_v58, %v1772_v61  ;;  %s3961_s17 = sld [smem:[#allocation3 + %s871_s26]]  ;;  %v858_v1 = vld [vmem:[%s857_s28] sm:$0x1]  ;;  %v1778_v2 = vrot.slane %v854_v63, 5  ;;  %s875_s9 = sadd.s32 193, %s2908_s24 }
 0x13c   : > { %v1800_v3 = vsel %vm1171_vm1, %v1799_v0, %v1775_v62  ;;  %s879_s10 = sadd.s32 194, %s2908_s24  ;;  %s861_s12 = scalar_lea.vmem %s4469_s1, %s860_s4  ;;  %v1781_v4 = vrot.slane %v858_v1, 4 }
 0x13d   : > { %s876_s6 = sld [smem:[#allocation3 + %s875_s9]]  ;;  %v862_v5 = vld [vmem:[%s861_s12] sm:$0x1]  ;;  %s865_s11 = scalar_lea.vmem %s4469_s1, %s864_s29  ;;  %v1801_v6 = vsel %vm1173_vm2, %v1800_v3, %v1778_v2 }
 0x13e   : > { %s880_s23 = sld [smem:[#allocation3 + %s879_s10]]  ;;  %v866_v7 = vld [vmem:[%s865_s11] sm:$0x1]  ;;  %v1784_v8 = vrot.slane %v862_v5, 3  ;;  %v1802_v9 = vsel %vm1175_vm3, %v1801_v6, %v1781_v4  ;;  %s883_s27 = sadd.s32 195, %s2908_s24 }
 0x13f   : > { %s887_s26 = sadd.s32 196, %s2908_s24  ;;  %v1787_v10 = vrot.slane %v866_v7, 2  ;;  %s884_s5 = sld [smem:[#allocation3 + %s883_s27]] }
 0x140   : > { %s869_s25 = scalar_lea.vmem %s4469_s1, %s868_s19  ;;  %v1803_v12 = vsel %vm1177_vm4, %v1802_v9, %v1784_v8  ;;  %s888_s28 = sld [smem:[#allocation3 + %s887_s26]] }
 0x141   : > { %v870_v11 = vld [vmem:[%s869_s25] sm:$0x1]  ;;  %s873_s30 = scalar_lea.vmem %s4469_s1, %s3961_s17  ;;  %v1804_v14 = vsel %vm1179_vm5, %v1803_v12, %v1787_v10  ;;  %s891_s9 = sadd.s32 197, %s2908_s24 }
 0x142   : > { %v1790_v13 = vrot.slane %v870_v11, 1  ;;  %s895_s10 = sadd.s32 198, %s2908_s24  ;;  %s892_s12 = sld [smem:[#allocation3 + %s891_s9]]  ;;  %v874_v16 = vld [vmem:[%s873_s30] sm:$0x1] }
 0x143   : > { %s877_s14 = scalar_lea.vmem %s4469_s1, %s876_s6  ;;  %s896_s11 = sld [smem:[#allocation3 + %s895_s10]] }
 0x144   : > { %v1805_v15 = vsel %vm1181_vm6, %v1804_v14, %v1790_v13  ;;  %v878_v17 = vld [vmem:[%s877_s14] sm:$0x1]  ;;  %s881_s17 = scalar_lea.vmem %s4469_s1, %s880_s23  ;;  %s899_s27 = sadd.s32 199, %s2908_s24 }
 0x145   : > { %2054 = vst.msk [vmem:[%s2977_s15 + $0xb8] sm:$0xff] %vm2030_vm7, %v1805_v15  ;;  %v882_v18 = vld [vmem:[%s881_s17] sm:$0x1]  ;;  %v1807_v19 = vrot.slane %v878_v17, 7  ;;  %s903_s26 = sadd.s32 200, %s2908_s24  ;;  %s885_s3 = scalar_lea.vmem %s4469_s1, %s884_s5 }
 0x146   : > { %s900_s25 = sld [smem:[#allocation3 + %s899_s27]]  ;;  %v1810_v20 = vrot.slane %v882_v18, 6  ;;  %v886_v21 = vld [vmem:[%s885_s3] sm:$0x1]  ;;  %s889_s23 = scalar_lea.vmem %s4469_s1, %s888_s28 }
 0x147   : > { %v1848_v22 = vsel %vm1169_vm0, %v874_v16, %v1807_v19  ;;  %s4005_s30 = sld [smem:[#allocation3 + %s903_s26]]  ;;  %v890_v23 = vld [vmem:[%s889_s23] sm:$0x1]  ;;  %v1813_v24 = vrot.slane %v886_v21, 5  ;;  %s907_s9 = sadd.s32 201, %s2908_s24 }
 0x148   : > { %v1849_v25 = vsel %vm1171_vm1, %v1848_v22, %v1810_v20  ;;  %s911_s10 = sadd.s32 202, %s2908_s24  ;;  %s893_s19 = scalar_lea.vmem %s4469_s1, %s892_s12  ;;  %v1816_v26 = vrot.slane %v890_v23, 4 }
 0x149   : > { %s908_s14 = sld [smem:[#allocation3 + %s907_s9]]  ;;  %v894_v27 = vld [vmem:[%s893_s19] sm:$0x1]  ;;  %s897_s20 = scalar_lea.vmem %s4469_s1, %s896_s11  ;;  %v1850_v28 = vsel %vm1173_vm2, %v1849_v25, %v1813_v24 }
 0x14a   : > { %s912_s17 = sld [smem:[#allocation3 + %s911_s10]]  ;;  %v898_v29 = vld [vmem:[%s897_s20] sm:$0x1]  ;;  %v1819_v30 = vrot.slane %v894_v27, 3  ;;  %v1851_v31 = vsel %vm1175_vm3, %v1850_v28, %v1816_v26  ;;  %s915_s27 = sadd.s32 203, %s2908_s24 }
 0x14b   : > { %s919_s26 = sadd.s32 204, %s2908_s24  ;;  %v1822_v32 = vrot.slane %v898_v29, 2  ;;  %s916_s3 = sld [smem:[#allocation3 + %s915_s27]] }
 0x14c   : > { %s901_s6 = scalar_lea.vmem %s4469_s1, %s900_s25  ;;  %v1852_v34 = vsel %vm1177_vm4, %v1851_v31, %v1819_v30  ;;  %s920_s23 = sld [smem:[#allocation3 + %s919_s26]] }
 0x14d   : > { %v902_v33 = vld [vmem:[%s901_s6] sm:$0x1]  ;;  %s905_s8 = scalar_lea.vmem %s4469_s1, %s4005_s30  ;;  %v1853_v36 = vsel %vm1179_vm5, %v1852_v34, %v1822_v32  ;;  %s923_s9 = sadd.s32 205, %s2908_s24 }
 0x14e   : > { %v1825_v35 = vrot.slane %v902_v33, 1  ;;  %s927_s10 = sadd.s32 206, %s2908_s24  ;;  %s924_s19 = sld [smem:[#allocation3 + %s923_s9]]  ;;  %v906_v38 = vld [vmem:[%s905_s8] sm:$0x1] }
 0x14f   : > { %s909_s13 = scalar_lea.vmem %s4469_s1, %s908_s14  ;;  %s928_s20 = sld [smem:[#allocation3 + %s927_s10]] }
 0x150   : > { %v1854_v37 = vsel %vm1181_vm6, %v1853_v36, %v1825_v35  ;;  %v910_v39 = vld [vmem:[%s909_s13] sm:$0x1]  ;;  %s913_s30 = scalar_lea.vmem %s4469_s1, %s912_s17  ;;  %s931_s27 = sadd.s32 207, %s2908_s24 }
 0x151   : > { %2055 = vst.msk [vmem:[%s2977_s15 + $0xc0] sm:$0xff] %vm2030_vm7, %v1854_v37  ;;  %v914_v40 = vld [vmem:[%s913_s30] sm:$0x1]  ;;  %v1828_v41 = vrot.slane %v910_v39, 7  ;;  %s935_s26 = sadd.s32 208, %s2908_s24  ;;  %s917_s4 = scalar_lea.vmem %s4469_s1, %s916_s3 }
 0x152   : > { %s932_s6 = sld [smem:[#allocation3 + %s931_s27]]  ;;  %v1831_v42 = vrot.slane %v914_v40, 6  ;;  %v918_v43 = vld [vmem:[%s917_s4] sm:$0x1]  ;;  %s921_s17 = scalar_lea.vmem %s4469_s1, %s920_s23 }
 0x153   : > { %v1855_v44 = vsel %vm1169_vm0, %v906_v38, %v1828_v41  ;;  %s4049_s8 = sld [smem:[#allocation3 + %s935_s26]]  ;;  %v922_v45 = vld [vmem:[%s921_s17] sm:$0x1]  ;;  %v1834_v46 = vrot.slane %v918_v43, 5  ;;  %s939_s9 = sadd.s32 209, %s2908_s24 }
 0x154   : > { %v1856_v47 = vsel %vm1171_vm1, %v1855_v44, %v1831_v42  ;;  %s943_s10 = sadd.s32 210, %s2908_s24  ;;  %s925_s25 = scalar_lea.vmem %s4469_s1, %s924_s19  ;;  %v1837_v48 = vrot.slane %v922_v45, 4 }
 0x155   : > { %s940_s13 = sld [smem:[#allocation3 + %s939_s9]]  ;;  %v926_v49 = vld [vmem:[%s925_s25] sm:$0x1]  ;;  %s929_s7 = scalar_lea.vmem %s4469_s1, %s928_s20  ;;  %v1857_v50 = vsel %vm1173_vm2, %v1856_v47, %v1834_v46 }
 0x156   : > { %s944_s30 = sld [smem:[#allocation3 + %s943_s10]]  ;;  %v930_v51 = vld [vmem:[%s929_s7] sm:$0x1]  ;;  %v1840_v52 = vrot.slane %v926_v49, 3  ;;  %v1858_v53 = vsel %vm1175_vm3, %v1857_v50, %v1837_v48  ;;  %s947_s27 = sadd.s32 211, %s2908_s24 }
 0x157   : > { %s951_s26 = sadd.s32 212, %s2908_s24  ;;  %v1843_v54 = vrot.slane %v930_v51, 2  ;;  %s948_s4 = sld [smem:[#allocation3 + %s947_s27]] }
 0x158   : > { %s933_s14 = scalar_lea.vmem %s4469_s1, %s932_s6  ;;  %v1859_v56 = vsel %vm1177_vm4, %v1858_v53, %v1840_v52  ;;  %s952_s17 = sld [smem:[#allocation3 + %s951_s26]] }
 0x159   : > { %v934_v55 = vld [vmem:[%s933_s14] sm:$0x1]  ;;  %s937_s29 = scalar_lea.vmem %s4469_s1, %s4049_s8  ;;  %v1860_v58 = vsel %vm1179_vm5, %v1859_v56, %v1843_v54  ;;  %s955_s9 = sadd.s32 213, %s2908_s24 }
 0x15a   : > { %v1846_v57 = vrot.slane %v934_v55, 1  ;;  %s959_s10 = sadd.s32 214, %s2908_s24  ;;  %s956_s25 = sld [smem:[#allocation3 + %s955_s9]]  ;;  %v938_v60 = vld [vmem:[%s937_s29] sm:$0x1] }
 0x15b   : > { %s941_s5 = scalar_lea.vmem %s4469_s1, %s940_s13  ;;  %s960_s7 = sld [smem:[#allocation3 + %s959_s10]] }
 0x15c   : > { %v1861_v59 = vsel %vm1181_vm6, %v1860_v58, %v1846_v57  ;;  %v942_v61 = vld [vmem:[%s941_s5] sm:$0x1]  ;;  %s945_s8 = scalar_lea.vmem %s4469_s1, %s944_s30  ;;  %s963_s27 = sadd.s32 215, %s2908_s24 }
 0x15d   : > { %2056 = vst.msk [vmem:[%s2977_s15 + $0xc8] sm:$0xff] %vm2030_vm7, %v1861_v59  ;;  %v946_v62 = vld [vmem:[%s945_s8] sm:$0x1]  ;;  %v1863_v63 = vrot.slane %v942_v61, 7  ;;  %s967_s26 = sadd.s32 216, %s2908_s24  ;;  %s949_s12 = scalar_lea.vmem %s4469_s1, %s948_s4 }
 0x15e   : > { %s964_s14 = sld [smem:[#allocation3 + %s963_s27]]  ;;  %v1866_v0 = vrot.slane %v946_v62, 6  ;;  %v950_v1 = vld [vmem:[%s949_s12] sm:$0x1]  ;;  %s953_s30 = scalar_lea.vmem %s4469_s1, %s952_s17 }
 0x15f   : > { %v1904_v2 = vsel %vm1169_vm0, %v938_v60, %v1863_v63  ;;  %s4093_s29 = sld [smem:[#allocation3 + %s967_s26]]  ;;  %v954_v3 = vld [vmem:[%s953_s30] sm:$0x1]  ;;  %v1869_v4 = vrot.slane %v950_v1, 5  ;;  %s971_s9 = sadd.s32 217, %s2908_s24 }
 0x160   : > { %v1905_v5 = vsel %vm1171_vm1, %v1904_v2, %v1866_v0  ;;  %s975_s10 = sadd.s32 218, %s2908_s24  ;;  %s957_s6 = scalar_lea.vmem %s4469_s1, %s956_s25  ;;  %v1872_v6 = vrot.slane %v954_v3, 4 }
 0x161   : > { %s972_s5 = sld [smem:[#allocation3 + %s971_s9]]  ;;  %v958_v7 = vld [vmem:[%s957_s6] sm:$0x1]  ;;  %s961_s28 = scalar_lea.vmem %s4469_s1, %s960_s7  ;;  %v1906_v8 = vsel %vm1173_vm2, %v1905_v5, %v1869_v4 }
 0x162   : > { %s976_s8 = sld [smem:[#allocation3 + %s975_s10]]  ;;  %v962_v9 = vld [vmem:[%s961_s28] sm:$0x1]  ;;  %v1875_v10 = vrot.slane %v958_v7, 3  ;;  %v1907_v11 = vsel %vm1175_vm3, %v1906_v8, %v1872_v6  ;;  %s979_s27 = sadd.s32 219, %s2908_s24 }
 0x163   : > { %s983_s26 = sadd.s32 220, %s2908_s24  ;;  %v1878_v12 = vrot.slane %v962_v9, 2  ;;  %s980_s12 = sld [smem:[#allocation3 + %s979_s27]] }
 0x164   : > { %s965_s13 = scalar_lea.vmem %s4469_s1, %s964_s14  ;;  %v1908_v14 = vsel %vm1177_vm4, %v1907_v11, %v1875_v10  ;;  %s984_s30 = sld [smem:[#allocation3 + %s983_s26]] }
 0x165   : > { %v966_v13 = vld [vmem:[%s965_s13] sm:$0x1]  ;;  %s969_s11 = scalar_lea.vmem %s4469_s1, %s4093_s29  ;;  %v1909_v16 = vsel %vm1179_vm5, %v1908_v14, %v1878_v12  ;;  %s987_s9 = sadd.s32 221, %s2908_s24 }
 0x166   : > { %v1881_v15 = vrot.slane %v966_v13, 1  ;;  %s991_s10 = sadd.s32 222, %s2908_s24  ;;  %s988_s6 = sld [smem:[#allocation3 + %s987_s9]]  ;;  %v970_v18 = vld [vmem:[%s969_s11] sm:$0x1] }
 0x167   : > { %s973_s3 = scalar_lea.vmem %s4469_s1, %s972_s5  ;;  %s992_s28 = sld [smem:[#allocation3 + %s991_s10]] }
 0x168   : > { %v1910_v17 = vsel %vm1181_vm6, %v1909_v16, %v1881_v15  ;;  %v974_v19 = vld [vmem:[%s973_s3] sm:$0x1]  ;;  %s977_s29 = scalar_lea.vmem %s4469_s1, %s976_s8  ;;  %s995_s27 = sadd.s32 223, %s2908_s24 }
 0x169   : > { %2057 = vst.msk [vmem:[%s2977_s15 + $0xd0] sm:$0xff] %vm2030_vm7, %v1910_v17  ;;  %v978_v20 = vld [vmem:[%s977_s29] sm:$0x1]  ;;  %v1884_v21 = vrot.slane %v974_v19, 7  ;;  %s999_s26 = sadd.s32 224, %s2908_s24  ;;  %s981_s19 = scalar_lea.vmem %s4469_s1, %s980_s12 }
 0x16a   : > { %s996_s13 = sld [smem:[#allocation3 + %s995_s27]]  ;;  %v1887_v22 = vrot.slane %v978_v20, 6  ;;  %v982_v23 = vld [vmem:[%s981_s19] sm:$0x1]  ;;  %s985_s8 = scalar_lea.vmem %s4469_s1, %s984_s30 }
 0x16b   : > { %v1911_v24 = vsel %vm1169_vm0, %v970_v18, %v1884_v21  ;;  %s4137_s11 = sld [smem:[#allocation3 + %s999_s26]]  ;;  %v986_v25 = vld [vmem:[%s985_s8] sm:$0x1]  ;;  %v1890_v26 = vrot.slane %v982_v23, 5  ;;  %s1003_s9 = sadd.s32 225, %s2908_s24 }
 0x16c   : > { %v1912_v27 = vsel %vm1171_vm1, %v1911_v24, %v1887_v22  ;;  %s1007_s10 = sadd.s32 226, %s2908_s24  ;;  %s989_s14 = scalar_lea.vmem %s4469_s1, %s988_s6  ;;  %v1893_v28 = vrot.slane %v986_v25, 4 }
 0x16d   : > { %s1004_s3 = sld [smem:[#allocation3 + %s1003_s9]]  ;;  %v990_v29 = vld [vmem:[%s989_s14] sm:$0x1]  ;;  %s993_s23 = scalar_lea.vmem %s4469_s1, %s992_s28  ;;  %v1913_v30 = vsel %vm1173_vm2, %v1912_v27, %v1890_v26 }
 0x16e   : > { %s1008_s29 = sld [smem:[#allocation3 + %s1007_s10]]  ;;  %v994_v31 = vld [vmem:[%s993_s23] sm:$0x1]  ;;  %v1896_v32 = vrot.slane %v990_v29, 3  ;;  %v1914_v33 = vsel %vm1175_vm3, %v1913_v30, %v1893_v28  ;;  %s1011_s27 = sadd.s32 227, %s2908_s24 }
 0x16f   : > { %s1015_s26 = sadd.s32 228, %s2908_s24  ;;  %v1899_v34 = vrot.slane %v994_v31, 2  ;;  %s1012_s19 = sld [smem:[#allocation3 + %s1011_s27]] }
 0x170   : > { %s997_s5 = scalar_lea.vmem %s4469_s1, %s996_s13  ;;  %v1915_v36 = vsel %vm1177_vm4, %v1914_v33, %v1896_v32  ;;  %s1016_s8 = sld [smem:[#allocation3 + %s1015_s26]] }
 0x171   : > { %v998_v35 = vld [vmem:[%s997_s5] sm:$0x1]  ;;  %s1001_s20 = scalar_lea.vmem %s4469_s1, %s4137_s11  ;;  %v1916_v38 = vsel %vm1179_vm5, %v1915_v36, %v1899_v34  ;;  %s1019_s9 = sadd.s32 229, %s2908_s24 }
 0x172   : > { %v1902_v37 = vrot.slane %v998_v35, 1  ;;  %s1023_s10 = sadd.s32 230, %s2908_s24  ;;  %s1020_s14 = sld [smem:[#allocation3 + %s1019_s9]]  ;;  %v1002_v40 = vld [vmem:[%s1001_s20] sm:$0x1] }
 0x173   : > { %s1005_s4 = scalar_lea.vmem %s4469_s1, %s1004_s3  ;;  %s1024_s23 = sld [smem:[#allocation3 + %s1023_s10]] }
 0x174   : > { %v1917_v39 = vsel %vm1181_vm6, %v1916_v38, %v1902_v37  ;;  %v1006_v41 = vld [vmem:[%s1005_s4] sm:$0x1]  ;;  %s1009_s11 = scalar_lea.vmem %s4469_s1, %s1008_s29  ;;  %s1027_s27 = sadd.s32 231, %s2908_s24 }
 0x175   : > { %2058 = vst.msk [vmem:[%s2977_s15 + $0xd8] sm:$0xff] %vm2030_vm7, %v1917_v39  ;;  %v1010_v42 = vld [vmem:[%s1009_s11] sm:$0x1]  ;;  %v1919_v43 = vrot.slane %v1006_v41, 7  ;;  %s1031_s26 = sadd.s32 232, %s2908_s24  ;;  %s1013_s25 = scalar_lea.vmem %s4469_s1, %s1012_s19 }
 0x176   : > { %s1028_s5 = sld [smem:[#allocation3 + %s1027_s27]]  ;;  %v1922_v44 = vrot.slane %v1010_v42, 6  ;;  %v1014_v45 = vld [vmem:[%s1013_s25] sm:$0x1]  ;;  %s1017_s29 = scalar_lea.vmem %s4469_s1, %s1016_s8 }
 0x177   : > { %v1960_v46 = vsel %vm1169_vm0, %v1002_v40, %v1919_v43  ;;  %s4181_s20 = sld [smem:[#allocation3 + %s1031_s26]]  ;;  %v1018_v47 = vld [vmem:[%s1017_s29] sm:$0x1]  ;;  %v1925_v48 = vrot.slane %v1014_v45, 5  ;;  %s1035_s9 = sadd.s32 233, %s2908_s24 }
 0x178   : > { %v1961_v49 = vsel %vm1171_vm1, %v1960_v46, %v1922_v44  ;;  %s1039_s10 = sadd.s32 234, %s2908_s24  ;;  %s1021_s13 = scalar_lea.vmem %s4469_s1, %s1020_s14  ;;  %v1928_v50 = vrot.slane %v1018_v47, 4 }
 0x179   : > { %s1036_s4 = sld [smem:[#allocation3 + %s1035_s9]]  ;;  %v1022_v51 = vld [vmem:[%s1021_s13] sm:$0x1]  ;;  %s1025_s17 = scalar_lea.vmem %s4469_s1, %s1024_s23  ;;  %v1962_v52 = vsel %vm1173_vm2, %v1961_v49, %v1925_v48 }
 0x17a   : > { %s1040_s11 = sld [smem:[#allocation3 + %s1039_s10]]  ;;  %v1026_v53 = vld [vmem:[%s1025_s17] sm:$0x1]  ;;  %v1931_v54 = vrot.slane %v1022_v51, 3  ;;  %v1963_v55 = vsel %vm1175_vm3, %v1962_v52, %v1928_v50  ;;  %s1043_s27 = sadd.s32 235, %s2908_s24 }
 0x17b   : > { %s1047_s26 = sadd.s32 236, %s2908_s24  ;;  %v1934_v56 = vrot.slane %v1026_v53, 2  ;;  %s1044_s25 = sld [smem:[#allocation3 + %s1043_s27]] }
 0x17c   : > { %s1029_s3 = scalar_lea.vmem %s4469_s1, %s1028_s5  ;;  %v1964_v58 = vsel %vm1177_vm4, %v1963_v55, %v1931_v54  ;;  %s1048_s29 = sld [smem:[#allocation3 + %s1047_s26]] }
 0x17d   : > { %v1030_v57 = vld [vmem:[%s1029_s3] sm:$0x1]  ;;  %s1033_s7 = scalar_lea.vmem %s4469_s1, %s4181_s20  ;;  %v1965_v60 = vsel %vm1179_vm5, %v1964_v58, %v1934_v56  ;;  %s1051_s9 = sadd.s32 237, %s2908_s24 }
 0x17e   : > { %v1937_v59 = vrot.slane %v1030_v57, 1  ;;  %s1055_s10 = sadd.s32 238, %s2908_s24  ;;  %s1052_s13 = sld [smem:[#allocation3 + %s1051_s9]]  ;;  %v1034_v62 = vld [vmem:[%s1033_s7] sm:$0x1] }
 0x17f   : > { %s1037_s12 = scalar_lea.vmem %s4469_s1, %s1036_s4  ;;  %s1056_s17 = sld [smem:[#allocation3 + %s1055_s10]] }
 0x180   : > { %v1966_v61 = vsel %vm1181_vm6, %v1965_v60, %v1937_v59  ;;  %v1038_v63 = vld [vmem:[%s1037_s12] sm:$0x1]  ;;  %s1041_s20 = scalar_lea.vmem %s4469_s1, %s1040_s11  ;;  %s1059_s27 = sadd.s32 239, %s2908_s24 }
 0x181   : > { %2059 = vst.msk [vmem:[%s2977_s15 + $0xe0] sm:$0xff] %vm2030_vm7, %v1966_v61  ;;  %v1042_v0 = vld [vmem:[%s1041_s20] sm:$0x1]  ;;  %v1940_v1 = vrot.slane %v1038_v63, 7  ;;  %s1063_s26 = sadd.s32 240, %s2908_s24  ;;  %s1045_s6 = scalar_lea.vmem %s4469_s1, %s1044_s25 }
 0x182   : > { %s1060_s3 = sld [smem:[#allocation3 + %s1059_s27]]  ;;  %v1943_v2 = vrot.slane %v1042_v0, 6  ;;  %v1046_v3 = vld [vmem:[%s1045_s6] sm:$0x1]  ;;  %s1049_s11 = scalar_lea.vmem %s4469_s1, %s1048_s29 }
 0x183   : > { %v1967_v4 = vsel %vm1169_vm0, %v1034_v62, %v1940_v1  ;;  %s4225_s7 = sld [smem:[#allocation3 + %s1063_s26]]  ;;  %v1050_v5 = vld [vmem:[%s1049_s11] sm:$0x1]  ;;  %v1946_v6 = vrot.slane %v1046_v3, 5  ;;  %s1067_s9 = sadd.s32 241, %s2908_s24 }
 0x184   : > { %v1968_v7 = vsel %vm1171_vm1, %v1967_v4, %v1943_v2  ;;  %s1071_s10 = sadd.s32 242, %s2908_s24  ;;  %s1053_s5 = scalar_lea.vmem %s4469_s1, %s1052_s13  ;;  %v1949_v8 = vrot.slane %v1050_v5, 4 }
 0x185   : > { %s1068_s12 = sld [smem:[#allocation3 + %s1067_s9]]  ;;  %v1054_v9 = vld [vmem:[%s1053_s5] sm:$0x1]  ;;  %s1057_s30 = scalar_lea.vmem %s4469_s1, %s1056_s17  ;;  %v1969_v10 = vsel %vm1173_vm2, %v1968_v7, %v1946_v6 }
 0x186   : > { %s1072_s20 = sld [smem:[#allocation3 + %s1071_s10]]  ;;  %v1058_v11 = vld [vmem:[%s1057_s30] sm:$0x1]  ;;  %v1952_v12 = vrot.slane %v1054_v9, 3  ;;  %v1970_v13 = vsel %vm1175_vm3, %v1969_v10, %v1949_v8  ;;  %s1075_s27 = sadd.s32 243, %s2908_s24 }
 0x187   : > { %s1079_s26 = sadd.s32 244, %s2908_s24  ;;  %v1955_v14 = vrot.slane %v1058_v11, 2  ;;  %s1076_s6 = sld [smem:[#allocation3 + %s1075_s27]] }
 0x188   : > { %s1061_s4 = scalar_lea.vmem %s4469_s1, %s1060_s3  ;;  %v1971_v16 = vsel %vm1177_vm4, %v1970_v13, %v1952_v12  ;;  %s1080_s11 = sld [smem:[#allocation3 + %s1079_s26]] }
 0x189   : > { %v1062_v15 = vld [vmem:[%s1061_s4] sm:$0x1]  ;;  %s1065_s28 = scalar_lea.vmem %s4469_s1, %s4225_s7  ;;  %v1972_v18 = vsel %vm1179_vm5, %v1971_v16, %v1955_v14  ;;  %s1083_s9 = sadd.s32 245, %s2908_s24 }
 0x18a   : > { %v1958_v17 = vrot.slane %v1062_v15, 1  ;;  %s1087_s10 = sadd.s32 246, %s2908_s24  ;;  %s1084_s5 = sld [smem:[#allocation3 + %s1083_s9]]  ;;  %v1066_v20 = vld [vmem:[%s1065_s28] sm:$0x1] }
 0x18b   : > { %s1069_s19 = scalar_lea.vmem %s4469_s1, %s1068_s12  ;;  %s1088_s30 = sld [smem:[#allocation3 + %s1087_s10]] }
 0x18c   : > { %v1973_v19 = vsel %vm1181_vm6, %v1972_v18, %v1958_v17  ;;  %v1070_v21 = vld [vmem:[%s1069_s19] sm:$0x1]  ;;  %s1073_s7 = scalar_lea.vmem %s4469_s1, %s1072_s20  ;;  %s1091_s27 = sadd.s32 247, %s2908_s24 }
 0x18d   : > { %2060 = vst.msk [vmem:[%s2977_s15 + $0xe8] sm:$0xff] %vm2030_vm7, %v1973_v19  ;;  %v1074_v22 = vld [vmem:[%s1073_s7] sm:$0x1]  ;;  %v1975_v23 = vrot.slane %v1070_v21, 7  ;;  %s1095_s26 = sadd.s32 248, %s2908_s24  ;;  %s1077_s14 = scalar_lea.vmem %s4469_s1, %s1076_s6 }
 0x18e   : > { %s1092_s4 = sld [smem:[#allocation3 + %s1091_s27]]  ;;  %v1978_v24 = vrot.slane %v1074_v22, 6  ;;  %v1078_v25 = vld [vmem:[%s1077_s14] sm:$0x1]  ;;  %s1081_s20 = scalar_lea.vmem %s4469_s1, %s1080_s11 }
 0x18f   : > { %v2016_v26 = vsel %vm1169_vm0, %v1066_v20, %v1975_v23  ;;  %s4269_s28 = sld [smem:[#allocation3 + %s1095_s26]]  ;;  %v1082_v27 = vld [vmem:[%s1081_s20] sm:$0x1]  ;;  %v1981_v28 = vrot.slane %v1078_v25, 5  ;;  %s1099_s9 = sadd.s32 249, %s2908_s24 }
 0x190   : > { %v2017_v29 = vsel %vm1171_vm1, %v2016_v26, %v1978_v24  ;;  %s1103_s10 = sadd.s32 250, %s2908_s24  ;;  %s1085_s3 = scalar_lea.vmem %s4469_s1, %s1084_s5  ;;  %v1984_v30 = vrot.slane %v1082_v27, 4 }
 0x191   : > { %s1100_s19 = sld [smem:[#allocation3 + %s1099_s9]]  ;;  %v1086_v31 = vld [vmem:[%s1085_s3] sm:$0x1]  ;;  %s1089_s8 = scalar_lea.vmem %s4469_s1, %s1088_s30  ;;  %v2018_v32 = vsel %vm1173_vm2, %v2017_v29, %v1981_v28 }
 0x192   : > { %s1104_s7 = sld [smem:[#allocation3 + %s1103_s10]]  ;;  %v1090_v33 = vld [vmem:[%s1089_s8] sm:$0x1]  ;;  %v1987_v34 = vrot.slane %v1086_v31, 3  ;;  %v2019_v35 = vsel %vm1175_vm3, %v2018_v32, %v1984_v30  ;;  %s1107_s27 = sadd.s32 251, %s2908_s24 }
 0x193   : > { %s1111_s26 = sadd.s32 252, %s2908_s24  ;;  %v1990_v36 = vrot.slane %v1090_v33, 2  ;;  %s1108_s14 = sld [smem:[#allocation3 + %s1107_s27]] }
 0x194   : > { %s1093_s12 = scalar_lea.vmem %s4469_s1, %s1092_s4  ;;  %v2020_v38 = vsel %vm1177_vm4, %v2019_v35, %v1987_v34  ;;  %s1112_s20 = sld [smem:[#allocation3 + %s1111_s26]] }
 0x195   : > { %v1094_v37 = vld [vmem:[%s1093_s12] sm:$0x1]  ;;  %s1097_s23 = scalar_lea.vmem %s4469_s1, %s4269_s28  ;;  %v2021_v40 = vsel %vm1179_vm5, %v2020_v38, %v1990_v36  ;;  %s1115_s9 = sadd.s32 253, %s2908_s24 }
 0x196   : > { %v1993_v39 = vrot.slane %v1094_v37, 1  ;;  %s1119_s10 = sadd.s32 254, %s2908_s24  ;;  %s1116_s3 = sld [smem:[#allocation3 + %s1115_s9]]  ;;  %v1098_v42 = vld [vmem:[%s1097_s23] sm:$0x1] }
 0x197   : > { %s1101_s4 = scalar_lea.vmem %s4469_s1, %s1100_s19  ;;  %s1120_s28 = sld [smem:[#allocation3 + %s1119_s10]] }
 0x198   : > { %v2022_v41 = vsel %vm1181_vm6, %v2021_v40, %v1993_v39  ;;  %v1102_v43 = vld [vmem:[%s1101_s4] sm:$0x1]  ;;  %s1105_s8 = scalar_lea.vmem %s4469_s1, %s1104_s7  ;;  %s1123_s27 = sadd.s32 255, %s2908_s24 }
 0x199   : > { %2061 = vst.msk [vmem:[%s2977_s15 + $0xf0] sm:$0xff] %vm2030_vm7, %v2022_v41  ;;  %v1106_v44 = vld [vmem:[%s1105_s8] sm:$0x1]  ;;  %v1996_v45 = vrot.slane %v1102_v43, 7  ;;  %s1109_s13 = scalar_lea.vmem %s4469_s1, %s1108_s14  ;;  %s1124_s19 = sld [smem:[#allocation3 + %s1123_s27]] }
 0x19a   : > { %v1999_v46 = vrot.slane %v1106_v44, 6  ;;  %v1110_v47 = vld [vmem:[%s1109_s13] sm:$0x1]  ;;  %s1113_s17 = scalar_lea.vmem %s4469_s1, %s1112_s20  ;;  %s4336_s8 = scalar_lea.vmem (%p2903_p9), %s4470_s2, %s2908_s24  }
 0x19b   : > { %v2023_v48 = vsel %vm1169_vm0, %v1098_v42, %v1996_v45  ;;  %v1114_v49 = vld [vmem:[%s1113_s17] sm:$0x1]  ;;  %v2002_v50 = vrot.slane %v1110_v47, 5 }
 0x19c   : > { %v2024_v51 = vsel %vm1171_vm1, %v2023_v48, %v1999_v46  ;;  %s1117_s9 = scalar_lea.vmem %s4469_s1, %s1116_s3  ;;  %v2005_v52 = vrot.slane %v1114_v49, 4  ;;  %s2652_s3 = sshll.u32 (%p2903_p9), %s2892_s0, 5 }
 0x19d   : > { %v1118_v53 = vld [vmem:[%s1117_s9] sm:$0x1]  ;;  %s1121_s6 = scalar_lea.vmem %s4469_s1, %s1120_s28  ;;  %v2025_v54 = vsel %vm1173_vm2, %v2024_v51, %v2002_v50  ;;  %s2071_s28 = ssub.s32 (%p2903_p9), 75, %s2652_s3 }
 0x19e   : > { %v1122_v55 = vld [vmem:[%s1121_s6] sm:$0x1]  ;;  %v2008_v56 = vrot.slane %v1118_v53, 3  ;;  %v2026_v57 = vsel %vm1175_vm3, %v2025_v54, %v2005_v52  ;;  %2069 = sbr.rel (!%p2903_p9) target bundleno = 477 (0x1dd), region = 28  ;;  %p2072_p12 = scmp.lt.s32.totalorder (%p2903_p9), %s2071_s28, 32 }
 0x19f   : > { %s1125_s4 = scalar_lea.vmem %s4469_s1, %s1124_s19  ;;  %v2011_v58 = vrot.slane %v1122_v55, 2 }
 0x1a0   : > { %v1126_v59 = vld [vmem:[%s1125_s4] sm:$0x1]  ;;  %v2027_v60 = vsel %vm1177_vm4, %v2026_v57, %v2008_v56 }
 0x1a1   : > { %v2014_v61 = vrot.slane %v1126_v59, 1  ;;  %v2028_v62 = vsel %vm1179_vm5, %v2027_v60, %v2011_v58 }
 0x1a3   : > { %v2029_v63 = vsel %vm1181_vm6, %v2028_v62, %v2014_v61 }
 0x1a4   : > { %2062 = vst.msk [vmem:[%s2977_s15 + $0xf8] sm:$0xff] %vm2030_vm7, %v2029_v63 }
 0x1a5   : > { %s4481_s28 = smov (!%p2072_p12, %s2071_s28), 32 }
 0x1a6   : > { %s2653_s27 = sshll.u32 %s4481_s28, 7 }
 0x1a7   : > { %p2656_p13 = scmp.eq.s32.totalorder %s2653_s27, 0 }
 0x1a8   : > { %s4342_s26 = sshrl.u32 (!%p2656_p13), %s4481_s28, 5 }
 0x1a9   : > { %2080 = sbr.rel (%p2656_p13) target bundleno = 477 (0x1dd), region = 32  ;;  %p2657_p0 = scmp.le.s32.totalorder (!%p2656_p13), %s4342_s26, 0 }
 0x1b0   : > { %2608 = sbr.rel (%p2657_p0) target bundleno = 456 (0x1c8), region = 361  ;;  %s4472_s0 = smov (!%p2657_p0), %s4336_s8 }
 0x1b1   : > { %s4473_s22 = smov (!%p2657_p0), %s2977_s15  ;;  %s4351_s24 = smov (!%p2657_p0), 0  }
 0x1b2   : > { %s4353_s5 = smov (!%p2657_p0), 0  }
 0x1b7 LB: >> { %v2204_v0 = vld [vmem:[%s2836_s22] sm:$0xff]  ;;  %v2206_v1 = vld [vmem:[%s2836_s22 + $0x8] sm:$0xff]  ;;  %v2208_v2 = vld [vmem:[%s2836_s22 + $0x10] sm:$0xff]  ;;  %s2268_s13 = sadd.s32 1, %s2840_s24  ;;  %s2198_s5 = sadd.s32 1, %s2844_s5   ;;  %s2844_s5 = sphi %s4353_s5, %s2198_s5   ;;  %s2840_s24 = sphi %s4351_s24, %s4476_s24   ;;  %s2836_s22 = sphi %s4473_s22, %s4475_s22   ;;  %s2832_s0 = sphi %s4472_s0, %s4474_s0  }
 0x1b8   : >> { %2205 = vst [vmem:[%s2832_s0] sm:$0xff] %v2204_v0  ;;  %2207 = vst [vmem:[%s2832_s0 + $0x8] sm:$0xff] %v2206_v1  ;;  %v2210_v3 = vld [vmem:[%s2836_s22 + $0x18] sm:$0xff]  ;;  %v2212_v4 = vld [vmem:[%s2836_s22 + $0x20] sm:$0xff]  ;;  %p2269_p1 = scmp.ge.s32.totalorder %s2268_s13, %s4342_s26  ;;  %p2197_p2 = scmp.ge.s32.totalorder %s2198_s5, %s4342_s26 }
 0x1b9   : >> { %2209 = vst [vmem:[%s2832_s0 + $0x10] sm:$0xff] %v2208_v2  ;;  %v2214_v5 = vld [vmem:[%s2836_s22 + $0x28] sm:$0xff]  ;;  %2211 = vst [vmem:[%s2832_s0 + $0x18] sm:$0xff] %v2210_v3  ;;  %v2216_v6 = vld [vmem:[%s2836_s22 + $0x30] sm:$0xff] }
 0x1ba   : >> { %2213 = vst [vmem:[%s2832_s0 + $0x20] sm:$0xff] %v2212_v4  ;;  %2215 = vst [vmem:[%s2832_s0 + $0x28] sm:$0xff] %v2214_v5  ;;  %v2218_v7 = vld [vmem:[%s2836_s22 + $0x38] sm:$0xff]  ;;  %v2220_v8 = vld [vmem:[%s2836_s22 + $0x40] sm:$0xff]  ;;  %s4483_s13 = smov (%p2269_p1, %s2268_s13), 0 }
 0x1bb   : >> { %2217 = vst [vmem:[%s2832_s0 + $0x30] sm:$0xff] %v2216_v6  ;;  %2219 = vst [vmem:[%s2832_s0 + $0x38] sm:$0xff] %v2218_v7  ;;  %v2222_v9 = vld [vmem:[%s2836_s22 + $0x48] sm:$0xff]  ;;  %v2224_v10 = vld [vmem:[%s2836_s22 + $0x50] sm:$0xff]  ;;  %s2658_s19 = sshll.u32 %s4483_s13, 8  ;;  %s4476_s24 = smov %s4483_s13 }
 0x1bc   : >> { %2221 = vst [vmem:[%s2832_s0 + $0x40] sm:$0xff] %v2220_v8  ;;  %v2226_v11 = vld [vmem:[%s2836_s22 + $0x58] sm:$0xff]  ;;  %2223 = vst [vmem:[%s2832_s0 + $0x48] sm:$0xff] %v2222_v9  ;;  %v2228_v12 = vld [vmem:[%s2836_s22 + $0x60] sm:$0xff]  ;;  %s4409_s12 = scalar_lea.vmem %s2977_s15, %s2658_s19 [#allocation4]   ;;  %s2274_s30 = scalar_lea.vmem %s4336_s8, %s2658_s19  }
 0x1bd   : >> { %2225 = vst [vmem:[%s2832_s0 + $0x50] sm:$0xff] %v2224_v10  ;;  %2227 = vst [vmem:[%s2832_s0 + $0x58] sm:$0xff] %v2226_v11  ;;  %v2230_v13 = vld [vmem:[%s2836_s22 + $0x68] sm:$0xff]  ;;  %v2232_v14 = vld [vmem:[%s2836_s22 + $0x70] sm:$0xff] }
 0x1be   : >> { %2229 = vst [vmem:[%s2832_s0 + $0x60] sm:$0xff] %v2228_v12  ;;  %2231 = vst [vmem:[%s2832_s0 + $0x68] sm:$0xff] %v2230_v13  ;;  %v2234_v15 = vld [vmem:[%s2836_s22 + $0x78] sm:$0xff]  ;;  %v2236_v16 = vld [vmem:[%s2836_s22 + $0x80] sm:$0xff] }
 0x1bf   : >> { %2233 = vst [vmem:[%s2832_s0 + $0x70] sm:$0xff] %v2232_v14  ;;  %v2238_v17 = vld [vmem:[%s2836_s22 + $0x88] sm:$0xff]  ;;  %2235 = vst [vmem:[%s2832_s0 + $0x78] sm:$0xff] %v2234_v15  ;;  %v2240_v18 = vld [vmem:[%s2836_s22 + $0x90] sm:$0xff] }
 0x1c0   : >> { %2237 = vst [vmem:[%s2832_s0 + $0x80] sm:$0xff] %v2236_v16  ;;  %2239 = vst [vmem:[%s2832_s0 + $0x88] sm:$0xff] %v2238_v17  ;;  %v2242_v19 = vld [vmem:[%s2836_s22 + $0x98] sm:$0xff]  ;;  %v2244_v20 = vld [vmem:[%s2836_s22 + $0xa0] sm:$0xff] }
 0x1c1   : >> { %2241 = vst [vmem:[%s2832_s0 + $0x90] sm:$0xff] %v2240_v18  ;;  %2243 = vst [vmem:[%s2832_s0 + $0x98] sm:$0xff] %v2242_v19  ;;  %v2246_v21 = vld [vmem:[%s2836_s22 + $0xa8] sm:$0xff]  ;;  %v2248_v22 = vld [vmem:[%s2836_s22 + $0xb0] sm:$0xff]  ;;  %2200 = sbr.rel (!%p2197_p2) target bundleno = 439 (0x1b7), region = 367 }
 0x1c2   : >> { %2245 = vst [vmem:[%s2832_s0 + $0xa0] sm:$0xff] %v2244_v20  ;;  %v2250_v23 = vld [vmem:[%s2836_s22 + $0xb8] sm:$0xff]  ;;  %2247 = vst [vmem:[%s2832_s0 + $0xa8] sm:$0xff] %v2246_v21  ;;  %v2252_v24 = vld [vmem:[%s2836_s22 + $0xc0] sm:$0xff] }
 0x1c3   : >> { %2249 = vst [vmem:[%s2832_s0 + $0xb0] sm:$0xff] %v2248_v22  ;;  %2251 = vst [vmem:[%s2832_s0 + $0xb8] sm:$0xff] %v2250_v23  ;;  %v2254_v25 = vld [vmem:[%s2836_s22 + $0xc8] sm:$0xff]  ;;  %v2256_v26 = vld [vmem:[%s2836_s22 + $0xd0] sm:$0xff] }
 0x1c4   : >> { %2253 = vst [vmem:[%s2832_s0 + $0xc0] sm:$0xff] %v2252_v24  ;;  %2255 = vst [vmem:[%s2832_s0 + $0xc8] sm:$0xff] %v2254_v25  ;;  %v2258_v27 = vld [vmem:[%s2836_s22 + $0xd8] sm:$0xff]  ;;  %v2260_v28 = vld [vmem:[%s2836_s22 + $0xe0] sm:$0xff] }
 0x1c5   : >> { %2257 = vst [vmem:[%s2832_s0 + $0xd0] sm:$0xff] %v2256_v26  ;;  %v2262_v29 = vld [vmem:[%s2836_s22 + $0xe8] sm:$0xff]  ;;  %2259 = vst [vmem:[%s2832_s0 + $0xd8] sm:$0xff] %v2258_v27  ;;  %v2264_v30 = vld [vmem:[%s2836_s22 + $0xf0] sm:$0xff] }
 0x1c6   : >> { %2261 = vst [vmem:[%s2832_s0 + $0xe0] sm:$0xff] %v2260_v28  ;;  %2263 = vst [vmem:[%s2832_s0 + $0xe8] sm:$0xff] %v2262_v29  ;;  %v2266_v31 = vld [vmem:[%s2836_s22 + $0xf8] sm:$0xff]  ;;  %s4475_s22 = smov %s4409_s12 }
 0x1c7   : >> { %2265 = vst [vmem:[%s2832_s0 + $0xf0] sm:$0xff] %v2264_v30  ;;  %2267 = vst [vmem:[%s2832_s0 + $0xf8] sm:$0xff] %v2266_v31  ;;  %s4474_s0 = smov %s2274_s30 }
 0x1c8 PF: > { %s4450_s17 = sand.u32 31, %s4481_s28   ;;  %s2669_s7 = sshll.u32 %s4342_s26, 8 }
 0x1c9   : > { %s2279_s23 = scalar_lea.vmem %s2977_s15, %s2669_s7 [#allocation4]   ;;  %s2281_s9 = scalar_lea.vmem %s4336_s8, %s2669_s7  }
 0x1ca   : > { %p2663_p3 = scmp.le.s32.totalorder %s4450_s17, 0 }
 0x1cb   : > { %s2846_s14 = smov (!%p2663_p3), %s2281_s9   ;;  %s2850_s10 = smov (!%p2663_p3), %s2279_s23  }
 0x1cc   : > { %2622 = sbr.rel (%p2663_p3) target bundleno = 477 (0x1dd), region = 372  ;;  %s2854_s6 = smov (!%p2663_p3), 0  }
 0x1cd   : > { %s2858_s20 = smov (!%p2663_p3), 0  }
 0x1d3 LB: >> { %v2291_v32 = vld [vmem:[%s2852_s10] sm:$0xff]  ;;  %s2293_s25 = sadd.s32 1, %s2856_s6  ;;  %s2285_s20 = sadd.s32 1, %s2860_s20   ;;  %s2860_s20 = sphi %s2858_s20, %s2285_s20   ;;  %s2856_s6 = sphi %s2854_s6, %s2855_s6   ;;  %s2852_s10 = sphi %s2850_s10, %s2298_s10   ;;  %s2848_s14 = sphi %s2846_s14, %s2299_s14  }
 0x1d4   : >> { %2292 = vst [vmem:[%s2848_s14] sm:$0xff] %v2291_v32  ;;  %p2294_p4 = scmp.ge.s32.totalorder %s2293_s25, %s4450_s17  ;;  %p2284_p5 = scmp.ge.s32.totalorder %s2285_s20, %s4450_s17 }
 0x1d6   : >> { %s4485_s25 = smov (%p2294_p4, %s2293_s25), 0  ;;  %2287 = sbr.rel (!%p2284_p5) target bundleno = 467 (0x1d3), region = 378 }
 0x1d7   : >> { %s2664_s15 = sshll.u32 %s4485_s25, 3  ;;  %s2855_s6 = smov %s4485_s25  }
 0x1d8   : >> { %s2298_s10 = scalar_lea.vmem %s2279_s23, %s2664_s15 [#allocation4]   ;;  %s2299_s14 = scalar_lea.vmem %s2281_s9, %s2664_s15  }
 0x1dd PF: > { %p15_p6 = scmp.ge.s32.totalorder %s2894_s18, 5   ;;  %s4477_s15 = smov %s2824_s16 }
 0x1de   : > { %s4478_s16 = smov %s2901_s21  ;;  %s4479_s17 = smov %s2894_s18 }
 0x1df   :  { %17 = sbr.rel (!%p15_p6) target bundleno = 18 (0x12), region = 389 }

</bundles_post_ra>
